<compile_context>
chip_gen: v5e
topology: v5e:2x2
jax: 0.10.0
libtpu: 0.0.40
codegen_flags: <defaults>
</compile_context>

<pallas_src>
import functools

import jax
import jax.numpy as jnp
from jax.experimental import pallas as pl
from jax.experimental.pallas import tpu as pltpu

# ---- module config (use_batch_norm=False, use_dropout=False) ----
PROFILE_LEN = 64
N_PARAMS = 8
LATENT_DIM = 16
H1, H2 = 1000, 300          # torch hidden sizes
H1P, H2P = 1024, 384        # lane-padded hidden sizes
LANE = 128
NEG_SLOPE = 0.01            # F.leaky_relu default

# lane layout of the fused 128-wide slabs
MU_OFF = PROFILE_LEN                  # 64: mu in output slab / z slot in decoder input
LV_OFF = MU_OFF + LATENT_DIM          # 80: logvar in output slab
YD_OFF = MU_OFF + LATENT_DIM          # 80: y slot in decoder-input slab
assert PROFILE_LEN + N_PARAMS <= LANE
assert LV_OFF + LATENT_DIM <= LANE
assert YD_OFF + N_PARAMS <= LANE


def _leaky_relu(x):
    return jnp.where(x > 0, x, NEG_SLOPE * x)


def _round_up(n, m):
    return (n + m - 1) // m * m


# --------------------------------------------------------------------------
# Kernel
# --------------------------------------------------------------------------
def cvae1_kernel(xy_ref, ey_ref,
                 w1, b1, w2, b2, w3, b3, w4, b4, w5, b5, w6, b6,
                 out_ref):
    f32 = jnp.float32
    bf16 = jnp.bfloat16
    dot = functools.partial(jnp.dot, preferred_element_type=f32)

    # ----- encode(cat(x, y)): fused, lane-padded -----
    h1 = _leaky_relu(dot(xy_ref[...], w1[...]) + b1[...]).astype(bf16)   # (TB,1024)
    h2 = _leaky_relu(dot(h1, w2[...]) + b2[...]).astype(bf16)            # (TB, 384)

    # fused fc31|fc32 -> slab: mu @ [64,80), logvar @ [80,96), exact zeros elsewhere
    mulv = dot(h2, w3[...]) + b3[...]                                    # (TB, 128) f32

    # ----- reparameterize, aligned with the z slot of the decoder-input slab -----
    lane = jax.lax.broadcasted_iota(jnp.int32, mulv.shape, 1)
    z_slot = (lane >= MU_OFF) & (lane < MU_OFF + LATENT_DIM)
    lv_at_z = jnp.roll(mulv, -LATENT_DIM, axis=-1)        # logvar lanes [80,96) -> [64,80)
    std = jnp.exp(jnp.where(z_slot, 0.5 * lv_at_z, 0.0))  # std on z lanes, 1.0 elsewhere
    mu_at_z = jnp.where(z_slot, mulv, 0.0)                # mu on z lanes, 0 elsewhere
    # ey = [0 | eps @ 64:80 | y @ 80:88 | 0]  ->  dec_in = [0 | z | y | 0]
    dec_in = (mu_at_z + ey_ref[...] * std).astype(bf16)

    # ----- decode(cat(z, y)): fused, lane-padded -----
    h4 = _leaky_relu(dot(dec_in, w4[...]) + b4[...]).astype(bf16)        # (TB, 384)
    h5 = _leaky_relu(dot(h4, w5[...]) + b5[...]).astype(bf16)            # (TB,1024)
    recon = dot(h5, w6[...]) + b6[...]                # recon @ [0,64), exact zeros elsewhere

    # lane-dense output slab: [recon 64 | mu 16 | logvar 16 | 0]
    out_ref[...] = recon + mulv


# --------------------------------------------------------------------------
# Wrapper
# --------------------------------------------------------------------------
def cvae1_forward(x, y, eps, packed, tb=128):
    B = x.shape[0]
    TB = min(tb, _round_up(B, 8))
    Bp = _round_up(B, TB)

    # encoder-input slab [x | y | 0]  (bf16: matmul operand only)
    xy = jnp.zeros((Bp, LANE), jnp.float32)
    xy = xy.at[:B, :PROFILE_LEN].set(x)
    xy = xy.at[:B, PROFILE_LEN:PROFILE_LEN + N_PARAMS].set(y)
    xy = xy.astype(jnp.bfloat16)

    # reparam / decoder helper slab [0 | eps | y | 0]  (f32: used in VPU math)
    ey = jnp.zeros((Bp, LANE), jnp.float32)
    ey = ey.at[:B, MU_OFF:MU_OFF + LATENT_DIM].set(eps)
    ey = ey.at[:B, YD_OFF:YD_OFF + N_PARAMS].set(y)

    grid = (pl.cdiv(Bp, TB),)
    row_spec = pl.BlockSpec((TB, LANE), lambda i: (i, 0))
    # weights/biases: full-array blocks with a constant index_map -> fetched once,
    # VMEM-resident across all batch-grid steps.
    w_specs = [pl.BlockSpec(p.shape, lambda i: (0, 0)) for p in packed]

    out = pl.pallas_call(
        cvae1_kernel,
        out_shape=jax.ShapeDtypeStruct((Bp, LANE), jnp.float32),
        grid=grid,
        in_specs=[row_spec, row_spec] + w_specs,
        out_specs=pl.BlockSpec((TB, LANE), lambda i: (i, 0)),
        compiler_params=pltpu.CompilerParams(
            dimension_semantics=("parallel",),
            vmem_limit_bytes=16 << 20),
    )(xy, ey, *packed)

    recon = out[:B, :PROFILE_LEN]
    mu = out[:B, MU_OFF:MU_OFF + LATENT_DIM]
    logvar = out[:B, LV_OFF:LV_OFF + LATENT_DIM]
    return recon, mu, logvar


# --------------------------------------------------------------------------
# Parameter init (nn.Linear-style) and packing into padded bf16 kernel weights
# --------------------------------------------------------------------------
def init_params(key):
    """f32 weights stored pre-transposed as (in, out); biases as (1, out)."""
    def linear(k, fan_in, fan_out):
        kw, kb = jax.random.split(k)
        bound = 1.0 / jnp.sqrt(float(fan_in))
        w = jax.random.uniform(kw, (fan_in, fan_out), jnp.float32, -bound, bound)
        b = jax.random.uniform(kb, (1, fan_out), jnp.float32, -bound, bound)
        return w, b

    ks = jax.random.split(key, 7)
    w1, b1 = linear(ks[0], PROFILE_LEN + N_PARAMS, H1)   # fc1
    w2, b2 = linear(ks[1], H1, H2)                       # fc2
    w31, b31 = linear(ks[2], H2, LATENT_DIM)             # fc31
    w32, b32 = linear(ks[3], H2, LATENT_DIM)             # fc32
    w4, b4 = linear(ks[4], LATENT_DIM + N_PARAMS, H2)    # fc4
    w5, b5 = linear(ks[5], H2, H1)                       # fc5
    w6, b6 = linear(ks[6], H1, PROFILE_LEN)              # fc6
    return (w1, b1, w2, b2, w31, b31, w32, b32, w4, b4, w5, b5, w6, b6)


def pack_params(p):
    """Zero-pad to lane multiples, fuse concat/stacked layers, cast weights to bf16."""
    (w1, b1, w2, b2, w31, b31, w32, b32, w4, b4, w5, b5, w6, b6) = p
    bf16 = jnp.bfloat16

    def pad_to(a, rows, cols):
        return jnp.pad(a, ((0, rows - a.shape[0]), (0, cols - a.shape[1])))

    W1 = pad_to(w1, LANE, H1P).astype(bf16)          # rows: [x|y|0], cols: 1000 -> 1024
    B1 = pad_to(b1, 1, H1P)
    W2 = pad_to(w2, H1P, H2P).astype(bf16)
    B2 = pad_to(b2, 1, H2P)

    # fc31 | fc32 stacked into output-slab lane positions
    W3 = jnp.zeros((H2P, LANE), jnp.float32)
    W3 = W3.at[:H2, MU_OFF:MU_OFF + LATENT_DIM].set(w31)
    W3 = W3.at[:H2, LV_OFF:LV_OFF + LATENT_DIM].set(w32)
    W3 = W3.astype(bf16)
    B3 = jnp.zeros((1, LANE), jnp.float32)
    B3 = B3.at[:, MU_OFF:MU_OFF + LATENT_DIM].set(b31)
    B3 = B3.at[:, LV_OFF:LV_OFF + LATENT_DIM].set(b32)

    # fc4 rows placed at the decoder-input slab's z / y lanes
    W4 = jnp.zeros((LANE, H2P), jnp.float32)
    W4 = W4.at[MU_OFF:MU_OFF + LATENT_DIM, :H2].set(w4[:LATENT_DIM])
    W4 = W4.at[YD_OFF:YD_OFF + N_PARAMS, :H2].set(w4[LATENT_DIM:])
    W4 = W4.astype(bf16)
    B4 = pad_to(b4, 1, H2P)

    W5 = pad_to(w5, H2P, H1P).astype(bf16)
    B5 = pad_to(b5, 1, H1P)
    W6 = pad_to(w6, H1P, LANE).astype(bf16)          # recon cols [0,64), rest zero
    B6 = pad_to(b6, 1, LANE)

    return (W1, B1, W2, B2, W3, B3, W4, B4, W5, B5, W6, B6)


# --------------------------------------------------------------------------
# Pure-JAX reference (mirrors the kernel's numerics: bf16 matmul operands,
# f32 accumulation, f32 elementwise) expressed in original module terms.
# --------------------------------------------------------------------------
def reference_forward(x, y, eps, params_f32):
    (w1, b1, w2, b2, w31, b31, w32, b32, w4, b4, w5, b5, w6, b6) = params_f32

    def mm(a, w):
        return jnp.dot(a.astype(jnp.bfloat16), w.astype(jnp.bfloat16),
                       preferred_element_type=jnp.float32)

    xy = jnp.concatenate([x, y], axis=1)
    h1 = _leaky_relu(mm(xy, w1) + b1)
    h2 = _leaky_relu(mm(h1, w2) + b2)
    mu = mm(h2, w31) + b31
    logvar = mm(h2, w32) + b32
    z = mu + eps * jnp.exp(0.5 * logvar)
    zy = jnp.concatenate([z, y], axis=1)
    h4 = _leaky_relu(mm(zy, w4) + b4)
    h5 = _leaky_relu(mm(h4, w5) + b5)
    recon = mm(h5, w6) + b6
    return recon, mu, logvar


if __name__ == "__main__":
    key = jax.random.PRNGKey(0)
    k_params, k_x, k_y, k_eps = jax.random.split(key, 4)

    B = 8
    x = jax.random.normal(k_x, (B, PROFILE_LEN), jnp.float32)    # profiles
    y = jax.random.normal(k_y, (B, N_PARAMS), jnp.float32)       # parameters
    eps = jax.random.normal(k_eps, (B, LATENT_DIM), jnp.float32) # torch.randn_like(std)

    params = init_params(k_params)
    packed = pack_params(params)

    recon, mu, logvar = cvae1_forward(x, y, eps, packed)
    jax.block_until_ready((recon, mu, logvar))

    r_ref, mu_ref, lv_ref = reference_forward(x, y, eps, params)
    assert jnp.allclose(mu, mu_ref, atol=1e-3, rtol=1e-3), \
        float(jnp.max(jnp.abs(mu - mu_ref)))
    assert jnp.allclose(logvar, lv_ref, atol=1e-3, rtol=1e-3), \
        float(jnp.max(jnp.abs(logvar - lv_ref)))
    assert jnp.allclose(recon, r_ref, atol=1e-3, rtol=1e-3), \
        float(jnp.max(jnp.abs(recon - r_ref)))

    print("KERNEL_OK")
</pallas_src>

<mosaic_0001>
module attributes {stable_mosaic.version = 11 : i64} {
  func.func @cvae1_kernel(%arg0: i32, %arg1: memref<8x128xbf16, #tpu.memory_space<vmem>>, %arg2: memref<8x128xf32, #tpu.memory_space<vmem>>, %arg3: memref<128x1024xbf16, #tpu.memory_space<vmem>>, %arg4: memref<1x1024xf32, #tpu.memory_space<vmem>>, %arg5: memref<1024x384xbf16, #tpu.memory_space<vmem>>, %arg6: memref<1x384xf32, #tpu.memory_space<vmem>>, %arg7: memref<384x128xbf16, #tpu.memory_space<vmem>>, %arg8: memref<1x128xf32, #tpu.memory_space<vmem>>, %arg9: memref<128x384xbf16, #tpu.memory_space<vmem>>, %arg10: memref<1x384xf32, #tpu.memory_space<vmem>>, %arg11: memref<384x1024xbf16, #tpu.memory_space<vmem>>, %arg12: memref<1x1024xf32, #tpu.memory_space<vmem>>, %arg13: memref<1024x128xbf16, #tpu.memory_space<vmem>>, %arg14: memref<1x128xf32, #tpu.memory_space<vmem>>, %arg15: memref<8x128xf32, #tpu.memory_space<vmem>>) attributes {dimension_semantics = [#tpu.dimension_semantics<parallel>], iteration_bounds = array<i64: 1>, scalar_prefetch = 0 : i64, scratch_operands = 0 : i64, tpu.core_type = #tpu.core_type<tc>, window_params = [{transform_indices = @transform_0, window_bounds = array<i64: 8, 128>}, {transform_indices = @transform_1, window_bounds = array<i64: 8, 128>}, {pipeline_mode = #tpu.pipeline_mode<synchronous>, transform_indices = @transform_2, window_bounds = array<i64: 128, 1024>}, {pipeline_mode = #tpu.pipeline_mode<synchronous>, transform_indices = @transform_3, window_bounds = array<i64: 1, 1024>}, {pipeline_mode = #tpu.pipeline_mode<synchronous>, transform_indices = @transform_4, window_bounds = array<i64: 1024, 384>}, {pipeline_mode = #tpu.pipeline_mode<synchronous>, transform_indices = @transform_5, window_bounds = array<i64: 1, 384>}, {pipeline_mode = #tpu.pipeline_mode<synchronous>, transform_indices = @transform_6, window_bounds = array<i64: 384, 128>}, {pipeline_mode = #tpu.pipeline_mode<synchronous>, transform_indices = @transform_7, window_bounds = array<i64: 1, 128>}, {pipeline_mode = #tpu.pipeline_mode<synchronous>, transform_indices = @transform_8, window_bounds = array<i64: 128, 384>}, {pipeline_mode = #tpu.pipeline_mode<synchronous>, transform_indices = @transform_9, window_bounds = array<i64: 1, 384>}, {pipeline_mode = #tpu.pipeline_mode<synchronous>, transform_indices = @transform_10, window_bounds = array<i64: 384, 1024>}, {pipeline_mode = #tpu.pipeline_mode<synchronous>, transform_indices = @transform_11, window_bounds = array<i64: 1, 1024>}, {pipeline_mode = #tpu.pipeline_mode<synchronous>, transform_indices = @transform_12, window_bounds = array<i64: 1024, 128>}, {pipeline_mode = #tpu.pipeline_mode<synchronous>, transform_indices = @transform_13, window_bounds = array<i64: 1, 128>}, {transform_indices = @transform_14, window_bounds = array<i64: 8, 128>}]} {
    %c0 = arith.constant 0 : index
    %c0_0 = arith.constant 0 : index
    %0 = vector.load %arg1[%c0, %c0_0] : memref<8x128xbf16, #tpu.memory_space<vmem>>, vector<8x128xbf16>
    %c0_1 = arith.constant 0 : index
    %c0_2 = arith.constant 0 : index
    %1 = vector.load %arg3[%c0_1, %c0_2] : memref<128x1024xbf16, #tpu.memory_space<vmem>>, vector<128x1024xbf16>
    %cst = arith.constant dense<0.000000e+00> : vector<8x1024xf32>
    %2 = tpu.matmul %0, %1, %cst {dimension_numbers = #tpu.dot_dimension_numbers<[1], [0], [0], [1], [0, 0, 1, 1], [], []>} : vector<8x128xbf16>, vector<128x1024xbf16>, vector<8x1024xf32> -> vector<8x1024xf32>
    %c0_3 = arith.constant 0 : index
    %c0_4 = arith.constant 0 : index
    %3 = vector.load %arg4[%c0_3, %c0_4] : memref<1x1024xf32, #tpu.memory_space<vmem>>, vector<1x1024xf32>
    %4 = vector.broadcast %3 : vector<1x1024xf32> to vector<8x1024xf32>
    %5 = arith.addf %2, %4 : vector<8x1024xf32>
    %cst_5 = arith.constant 0.000000e+00 : f32
    %6 = vector.broadcast %cst_5 : f32 to vector<8x1024xf32>
    %7 = arith.cmpf ogt, %5, %6 : vector<8x1024xf32>
    %cst_6 = arith.constant 0.00999999977 : f32
    %8 = vector.broadcast %cst_6 : f32 to vector<8x1024xf32>
    %9 = arith.mulf %8, %5 : vector<8x1024xf32>
    %10 = arith.select %7, %5, %9 : vector<8x1024xi1>, vector<8x1024xf32>
    %11 = arith.truncf %10 : vector<8x1024xf32> to vector<8x1024xbf16>
    %c0_7 = arith.constant 0 : index
    %c0_8 = arith.constant 0 : index
    %12 = vector.load %arg5[%c0_7, %c0_8] : memref<1024x384xbf16, #tpu.memory_space<vmem>>, vector<1024x384xbf16>
    %cst_9 = arith.constant dense<0.000000e+00> : vector<8x384xf32>
    %13 = tpu.matmul %11, %12, %cst_9 {dimension_numbers = #tpu.dot_dimension_numbers<[1], [0], [0], [1], [0, 0, 1, 1], [], []>} : vector<8x1024xbf16>, vector<1024x384xbf16>, vector<8x384xf32> -> vector<8x384xf32>
    %c0_10 = arith.constant 0 : index
    %c0_11 = arith.constant 0 : index
    %14 = vector.load %arg6[%c0_10, %c0_11] : memref<1x384xf32, #tpu.memory_space<vmem>>, vector<1x384xf32>
    %15 = vector.broadcast %14 : vector<1x384xf32> to vector<8x384xf32>
    %16 = arith.addf %13, %15 : vector<8x384xf32>
    %cst_12 = arith.constant 0.000000e+00 : f32
    %17 = vector.broadcast %cst_12 : f32 to vector<8x384xf32>
    %18 = arith.cmpf ogt, %16, %17 : vector<8x384xf32>
    %cst_13 = arith.constant 0.00999999977 : f32
    %19 = vector.broadcast %cst_13 : f32 to vector<8x384xf32>
    %20 = arith.mulf %19, %16 : vector<8x384xf32>
    %21 = arith.select %18, %16, %20 : vector<8x384xi1>, vector<8x384xf32>
    %22 = arith.truncf %21 : vector<8x384xf32> to vector<8x384xbf16>
    %c0_14 = arith.constant 0 : index
    %c0_15 = arith.constant 0 : index
    %23 = vector.load %arg7[%c0_14, %c0_15] : memref<384x128xbf16, #tpu.memory_space<vmem>>, vector<384x128xbf16>
    %cst_16 = arith.constant dense<0.000000e+00> : vector<8x128xf32>
    %24 = tpu.matmul %22, %23, %cst_16 {dimension_numbers = #tpu.dot_dimension_numbers<[1], [0], [0], [1], [0, 0, 1, 1], [], []>} : vector<8x384xbf16>, vector<384x128xbf16>, vector<8x128xf32> -> vector<8x128xf32>
    %c0_17 = arith.constant 0 : index
    %c0_18 = arith.constant 0 : index
    %25 = vector.load %arg8[%c0_17, %c0_18] : memref<1x128xf32, #tpu.memory_space<vmem>>, vector<1x128xf32>
    %26 = vector.broadcast %25 : vector<1x128xf32> to vector<8x128xf32>
    %27 = arith.addf %24, %26 : vector<8x128xf32>
    %28 = tpu.iota {dimensions = array<i32: 1>} : vector<8x128xi32>
    %c64_i32 = arith.constant 64 : i32
    %29 = vector.broadcast %c64_i32 : i32 to vector<8x128xi32>
    %30 = arith.cmpi sge, %28, %29 : vector<8x128xi32>
    %c80_i32 = arith.constant 80 : i32
    %31 = vector.broadcast %c80_i32 : i32 to vector<8x128xi32>
    %32 = arith.cmpi slt, %28, %31 : vector<8x128xi32>
    %33 = arith.andi %30, %32 : vector<8x128xi1>
    %34 = vector.extract_strided_slice %27 {offsets = [0, 16], sizes = [8, 112], strides = [1, 1]} : vector<8x128xf32> to vector<8x112xf32>
    %35 = vector.extract_strided_slice %27 {offsets = [0, 0], sizes = [8, 16], strides = [1, 1]} : vector<8x128xf32> to vector<8x16xf32>
    %36 = tpu.concatenate %34, %35 in 1 : vector<8x112xf32>, vector<8x16xf32> -> vector<8x128xf32>
    %cst_19 = arith.constant 5.000000e-01 : f32
    %37 = vector.broadcast %cst_19 : f32 to vector<8x128xf32>
    %38 = arith.mulf %37, %36 : vector<8x128xf32>
    %cst_20 = arith.constant 0.000000e+00 : f32
    %39 = vector.broadcast %cst_20 : f32 to vector<8x128xf32>
    %40 = arith.select %33, %38, %39 : vector<8x128xi1>, vector<8x128xf32>
    %41 = math.exp %40 : vector<8x128xf32>
    %cst_21 = arith.constant 0.000000e+00 : f32
    %42 = vector.broadcast %cst_21 : f32 to vector<8x128xf32>
    %43 = arith.select %33, %27, %42 : vector<8x128xi1>, vector<8x128xf32>
    %c0_22 = arith.constant 0 : index
    %c0_23 = arith.constant 0 : index
    %44 = vector.load %arg2[%c0_22, %c0_23] : memref<8x128xf32, #tpu.memory_space<vmem>>, vector<8x128xf32>
    %45 = arith.mulf %44, %41 : vector<8x128xf32>
    %46 = arith.addf %43, %45 : vector<8x128xf32>
    %47 = arith.truncf %46 : vector<8x128xf32> to vector<8x128xbf16>
    %c0_24 = arith.constant 0 : index
    %c0_25 = arith.constant 0 : index
    %48 = vector.load %arg9[%c0_24, %c0_25] : memref<128x384xbf16, #tpu.memory_space<vmem>>, vector<128x384xbf16>
    %cst_26 = arith.constant dense<0.000000e+00> : vector<8x384xf32>
    %49 = tpu.matmul %47, %48, %cst_26 {dimension_numbers = #tpu.dot_dimension_numbers<[1], [0], [0], [1], [0, 0, 1, 1], [], []>} : vector<8x128xbf16>, vector<128x384xbf16>, vector<8x384xf32> -> vector<8x384xf32>
    %c0_27 = arith.constant 0 : index
    %c0_28 = arith.constant 0 : index
    %50 = vector.load %arg10[%c0_27, %c0_28] : memref<1x384xf32, #tpu.memory_space<vmem>>, vector<1x384xf32>
    %51 = vector.broadcast %50 : vector<1x384xf32> to vector<8x384xf32>
    %52 = arith.addf %49, %51 : vector<8x384xf32>
    %cst_29 = arith.constant 0.000000e+00 : f32
    %53 = vector.broadcast %cst_29 : f32 to vector<8x384xf32>
    %54 = arith.cmpf ogt, %52, %53 : vector<8x384xf32>
    %cst_30 = arith.constant 0.00999999977 : f32
    %55 = vector.broadcast %cst_30 : f32 to vector<8x384xf32>
    %56 = arith.mulf %55, %52 : vector<8x384xf32>
    %57 = arith.select %54, %52, %56 : vector<8x384xi1>, vector<8x384xf32>
    %58 = arith.truncf %57 : vector<8x384xf32> to vector<8x384xbf16>
    %c0_31 = arith.constant 0 : index
    %c0_32 = arith.constant 0 : index
    %59 = vector.load %arg11[%c0_31, %c0_32] : memref<384x1024xbf16, #tpu.memory_space<vmem>>, vector<384x1024xbf16>
    %cst_33 = arith.constant dense<0.000000e+00> : vector<8x1024xf32>
    %60 = tpu.matmul %58, %59, %cst_33 {dimension_numbers = #tpu.dot_dimension_numbers<[1], [0], [0], [1], [0, 0, 1, 1], [], []>} : vector<8x384xbf16>, vector<384x1024xbf16>, vector<8x1024xf32> -> vector<8x1024xf32>
    %c0_34 = arith.constant 0 : index
    %c0_35 = arith.constant 0 : index
    %61 = vector.load %arg12[%c0_34, %c0_35] : memref<1x1024xf32, #tpu.memory_space<vmem>>, vector<1x1024xf32>
    %62 = vector.broadcast %61 : vector<1x1024xf32> to vector<8x1024xf32>
    %63 = arith.addf %60, %62 : vector<8x1024xf32>
    %cst_36 = arith.constant 0.000000e+00 : f32
    %64 = vector.broadcast %cst_36 : f32 to vector<8x1024xf32>
    %65 = arith.cmpf ogt, %63, %64 : vector<8x1024xf32>
    %cst_37 = arith.constant 0.00999999977 : f32
    %66 = vector.broadcast %cst_37 : f32 to vector<8x1024xf32>
    %67 = arith.mulf %66, %63 : vector<8x1024xf32>
    %68 = arith.select %65, %63, %67 : vector<8x1024xi1>, vector<8x1024xf32>
    %69 = arith.truncf %68 : vector<8x1024xf32> to vector<8x1024xbf16>
    %c0_38 = arith.constant 0 : index
    %c0_39 = arith.constant 0 : index
    %70 = vector.load %arg13[%c0_38, %c0_39] : memref<1024x128xbf16, #tpu.memory_space<vmem>>, vector<1024x128xbf16>
    %cst_40 = arith.constant dense<0.000000e+00> : vector<8x128xf32>
    %71 = tpu.matmul %69, %70, %cst_40 {dimension_numbers = #tpu.dot_dimension_numbers<[1], [0], [0], [1], [0, 0, 1, 1], [], []>} : vector<8x1024xbf16>, vector<1024x128xbf16>, vector<8x128xf32> -> vector<8x128xf32>
    %c0_41 = arith.constant 0 : index
    %c0_42 = arith.constant 0 : index
    %72 = vector.load %arg14[%c0_41, %c0_42] : memref<1x128xf32, #tpu.memory_space<vmem>>, vector<1x128xf32>
    %73 = vector.broadcast %72 : vector<1x128xf32> to vector<8x128xf32>
    %74 = arith.addf %71, %73 : vector<8x128xf32>
    %75 = arith.addf %74, %27 : vector<8x128xf32>
    %c0_43 = arith.constant 0 : index
    %c0_44 = arith.constant 0 : index
    %76 = vector.load %arg15[%c0_43, %c0_44] : memref<8x128xf32, #tpu.memory_space<vmem>>, vector<8x128xf32>
    tpu.vector_store %arg15[%c0_43, %c0_44], %75 {strides = array<i32>} : memref<8x128xf32, #tpu.memory_space<vmem>>, vector<8x128xf32>,
    return
  }
  func.func @transform_0(%arg0: i32) -> (i32, i32) {
    %c0_i32 = arith.constant 0 : i32
    %c0_i32_0 = arith.constant 0 : i32
    return %arg0, %c0_i32 : i32, i32
  }
  func.func @transform_1(%arg0: i32) -> (i32, i32) {
    %c0_i32 = arith.constant 0 : i32
    %c0_i32_0 = arith.constant 0 : i32
    return %arg0, %c0_i32 : i32, i32
  }
  func.func @transform_2(%arg0: i32) -> (i32, i32) {
    %c0_i32 = arith.constant 0 : i32
    %c0_i32_0 = arith.constant 0 : i32
    %c0_i32_1 = arith.constant 0 : i32
    return %c0_i32, %c0_i32_0 : i32, i32
  }
  func.func @transform_3(%arg0: i32) -> (i32, i32) {
    %c0_i32 = arith.constant 0 : i32
    %c0_i32_0 = arith.constant 0 : i32
    %c0_i32_1 = arith.constant 0 : i32
    return %c0_i32, %c0_i32_0 : i32, i32
  }
  func.func @transform_4(%arg0: i32) -> (i32, i32) {
    %c0_i32 = arith.constant 0 : i32
    %c0_i32_0 = arith.constant 0 : i32
    %c0_i32_1 = arith.constant 0 : i32
    return %c0_i32, %c0_i32_0 : i32, i32
  }
  func.func @transform_5(%arg0: i32) -> (i32, i32) {
    %c0_i32 = arith.constant 0 : i32
    %c0_i32_0 = arith.constant 0 : i32
    %c0_i32_1 = arith.constant 0 : i32
    return %c0_i32, %c0_i32_0 : i32, i32
  }
  func.func @transform_6(%arg0: i32) -> (i32, i32) {
    %c0_i32 = arith.constant 0 : i32
    %c0_i32_0 = arith.constant 0 : i32
    %c0_i32_1 = arith.constant 0 : i32
    return %c0_i32, %c0_i32_0 : i32, i32
  }
  func.func @transform_7(%arg0: i32) -> (i32, i32) {
    %c0_i32 = arith.constant 0 : i32
    %c0_i32_0 = arith.constant 0 : i32
    %c0_i32_1 = arith.constant 0 : i32
    return %c0_i32, %c0_i32_0 : i32, i32
  }
  func.func @transform_8(%arg0: i32) -> (i32, i32) {
    %c0_i32 = arith.constant 0 : i32
    %c0_i32_0 = arith.constant 0 : i32
    %c0_i32_1 = arith.constant 0 : i32
    return %c0_i32, %c0_i32_0 : i32, i32
  }
  func.func @transform_9(%arg0: i32) -> (i32, i32) {
    %c0_i32 = arith.constant 0 : i32
    %c0_i32_0 = arith.constant 0 : i32
    %c0_i32_1 = arith.constant 0 : i32
    return %c0_i32, %c0_i32_0 : i32, i32
  }
  func.func @transform_10(%arg0: i32) -> (i32, i32) {
    %c0_i32 = arith.constant 0 : i32
    %c0_i32_0 = arith.constant 0 : i32
    %c0_i32_1 = arith.constant 0 : i32
    return %c0_i32, %c0_i32_0 : i32, i32
  }
  func.func @transform_11(%arg0: i32) -> (i32, i32) {
    %c0_i32 = arith.constant 0 : i32
    %c0_i32_0 = arith.constant 0 : i32
    %c0_i32_1 = arith.constant 0 : i32
    return %c0_i32, %c0_i32_0 : i32, i32
  }
  func.func @transform_12(%arg0: i32) -> (i32, i32) {
    %c0_i32 = arith.constant 0 : i32
    %c0_i32_0 = arith.constant 0 : i32
    %c0_i32_1 = arith.constant 0 : i32
    return %c0_i32, %c0_i32_0 : i32, i32
  }
  func.func @transform_13(%arg0: i32) -> (i32, i32) {
    %c0_i32 = arith.constant 0 : i32
    %c0_i32_0 = arith.constant 0 : i32
    %c0_i32_1 = arith.constant 0 : i32
    return %c0_i32, %c0_i32_0 : i32, i32
  }
  func.func @transform_14(%arg0: i32) -> (i32, i32) {
    %c0_i32 = arith.constant 0 : i32
    %c0_i32_0 = arith.constant 0 : i32
    return %arg0, %c0_i32 : i32, i32
  }
}

</mosaic_0001>

<bundles_post_ra>
// kernel: tpu_custom_call.1
= control target key start
LH: loop header
LB: loop body
LE: loop exit
PB: predicated region body
PF: predicated region fallthrough
CT: control target
= control target key end

     0   :  { %19 = vsyncpa [#allocation3], 0  ;;  %s8380_s0 = inlined_call_operand.hbm [shape: bf16[8,128], index: 0, kind: input, shape index: {}]   ;;  %s8381_s1 = inlined_call_operand.hbm [shape: f32[8,128], index: 1, kind: input, shape index: {}]   ;;  %s8382_s2 = inlined_call_operand.hbm [shape: bf16[128,1024], index: 2, kind: input, shape index: {}]   ;;  %s8383_s3 = inlined_call_operand.hbm [shape: f32[1,1024], index: 3, kind: input, shape index: {}]   ;;  %s8384_s4 = inlined_call_operand.hbm [shape: bf16[1024,384], index: 4, kind: input, shape index: {}]   ;;  %s8385_s5 = inlined_call_operand.hbm [shape: f32[1,384], index: 5, kind: input, shape index: {}]   ;;  %s8386_s6 = inlined_call_operand.hbm [shape: bf16[384,128], index: 6, kind: input, shape index: {}]   ;;  %s8387_s7 = inlined_call_operand.vmem [shape: f32[1,128], index: 7, kind: input, shape index: {}]   ;;  %s8388_s8 = inlined_call_operand.hbm [shape: bf16[128,384], index: 8, kind: input, shape index: {}]   ;;  %s8389_s9 = inlined_call_operand.hbm [shape: f32[1,384], index: 9, kind: input, shape index: {}]   ;;  %s8390_s10 = inlined_call_operand.hbm [shape: bf16[384,1024], index: 10, kind: input, shape index: {}]   ;;  %s8391_s11 = inlined_call_operand.vmem [shape: f32[1,1024], index: 11, kind: input, shape index: {}]   ;;  %s8392_s12 = inlined_call_operand.hbm [shape: bf16[1024,128], index: 12, kind: input, shape index: {}]   ;;  %s8393_s13 = inlined_call_operand.vmem [shape: f32[1,128], index: 13, kind: input, shape index: {}]   ;;  %s8394_s14 = inlined_call_operand.hbm [shape: f32[8,128], index: 14, kind: output, shape index: {}]  }
   0x1   :  { %20 = vsyncpa [#allocation6], 0 }
   0x2   :  { %21 = vsyncpa [#allocation9], 0 }
   0x3   :  { %22 = vsyncpa [#allocation12], 0 }
   0x4   :  { %23 = vsyncpa [#allocation15], 0 }
   0x5   :  { %24 = vsyncpa [#allocation18], 0  ;;  %s42_s15 = sshll.u32 %s8381_s1, 4  ;;  %s43_s15 = int_to_ptr.hbm [resolvable:$true] %s42_s15 }
   0x6   :  { %25 = vsyncpa [#allocation4], 0  ;;  %s8115_s16 = smov [#allocation5]   ;;  %s66_s20 = sshll.u32 %s8383_s3, 4  ;;  %s67_s20 = int_to_ptr.hbm [resolvable:$true] %s66_s20 }
   0x7   :  { %s44_s17 = sshll.u32 %s8115_s16, 4  ;;  %s8116_s21 = smov [#allocation8]   ;;  %s45_s17 = int_to_ptr.vmem [resolvable:$true] %s44_s17 }
   0x8   :  { %47 = dma.hbm_to_vmem [thread:$0]  %s43_s15, 128, %s45_s17, [#allocation6]  }
   0x9   :  { %s68_s22 = sshll.u32 %s8116_s21, 4  ;;  %s90_s25 = sshll.u32 %s8385_s5, 4  ;;  %s69_s22 = int_to_ptr.vmem [resolvable:$true] %s68_s22  ;;  %s91_s25 = int_to_ptr.hbm [resolvable:$true] %s90_s25 }
   0xa   :  { %71 = dma.hbm_to_vmem [thread:$0]  %s67_s20, 128, %s69_s22, [#allocation9]  }
   0xb   :  { %s8117_s1 = smov [#allocation11]   ;;  %s115_s29 = sshll.u32 %s8388_s8, 4  ;;  %s116_s29 = int_to_ptr.hbm [resolvable:$true] %s115_s29 }
   0xc   :  { %s92_s26 = sshll.u32 %s8117_s1, 4  ;;  %s8118_s3 = smov [#allocation14]   ;;  %s93_s26 = int_to_ptr.vmem [resolvable:$true] %s92_s26 }
   0xd   :  { %95 = dma.hbm_to_vmem [thread:$0]  %s91_s25, 48, %s93_s26, [#allocation12]  }
   0xe   :  { %s117_s30 = sshll.u32 %s8118_s3, 4  ;;  %s8119_s15 = smov 192   ;;  %s118_s30 = int_to_ptr.vmem [resolvable:$true] %s117_s30 }
   0xf   :  { %s8120_s16 = smov 12   ;;  %s139_s18 = sshll.u32 %s8390_s10, 4  ;;  %s140_s18 = int_to_ptr.hbm [resolvable:$true] %s139_s18 }
  0x10   :  { %123 = dma.hbm_to_vmem [thread:$0]  %s116_s29, 3072, %s118_s30, [#allocation15], %s8119_s15, %s8119_s15, %s8120_s16  }
  0x11   :  { %s8121_s19 = smov [#allocation17]   ;;  %s31_s22 = sshll.u32 %s8380_s0, 4  ;;  %s32_s22 = int_to_ptr.hbm [resolvable:$true] %s31_s22 }
  0x12   :  { %s141_s20 = sshll.u32 %s8121_s19, 4  ;;  %s8122_s23 = smov 512   ;;  %s142_s20 = int_to_ptr.vmem [resolvable:$true] %s141_s20 }
  0x13   :  { %s8123_s24 = smov 32   ;;  %s8124_s25 = smov [#allocation2]  }
  0x14   :  { %147 = dma.hbm_to_vmem [thread:$0]  %s140_s18, 24576, %s142_s20, [#allocation18], %s8122_s23, %s8122_s23, %s8123_s24  }
  0x15   :  { %s33_s1 = sshll.u32 %s8124_s25, 4  ;;  %s52_s28 = sshll.u32 %s8382_s2, 4  ;;  %s34_s1 = int_to_ptr.vmem [resolvable:$true] %s33_s1  ;;  %s53_s28 = int_to_ptr.hbm [resolvable:$true] %s52_s28 }
  0x16   :  { %36 = dma.hbm_to_vmem [thread:$0]  %s32_s22, 64, %s34_s1, [#allocation3]  }
  0x17   :  { %s76_s3 = sshll.u32 %s8384_s4, 4  ;;  %s8125_s30 = smov [#allocation7]   ;;  %s77_s3 = int_to_ptr.hbm [resolvable:$true] %s76_s3 }
  0x18   :  { %s54_s5 = sshll.u32 %s8125_s30, 4  ;;  %s8126_s0 = smov [#allocation10]   ;;  %s55_s5 = int_to_ptr.vmem [resolvable:$true] %s54_s5 }
  0x19   :  { %60 = dma.hbm_to_vmem [thread:$0]  %s53_s28, 8192, %s55_s5, [#allocation6], %s8122_s23, %s8122_s23, %s8123_s24  }
  0x1a   :  { %s78_s17 = sshll.u32 %s8126_s0, 4  ;;  %s100_s20 = sshll.u32 %s8386_s6, 4  ;;  %s79_s17 = int_to_ptr.vmem [resolvable:$true] %s78_s17  ;;  %s101_s20 = int_to_ptr.hbm [resolvable:$true] %s100_s20 }
  0x1b   :  { %84 = dma.hbm_to_vmem [thread:$0]  %s77_s3, 24576, %s79_s17, [#allocation9], %s8119_s15, %s8119_s15, %s8120_s16  }
  0x1c   :  { %s8127_s2 = smov [#allocation13]   ;;  %s129_s22 = sshll.u32 %s8389_s9, 4  ;;  %s130_s22 = int_to_ptr.hbm [resolvable:$true] %s129_s22 }
  0x1d   :  { %s102_s8 = sshll.u32 %s8127_s2, 4  ;;  %s8128_s23 = smov 64   ;;  %s103_s8 = int_to_ptr.vmem [resolvable:$true] %s102_s8 }
  0x1e   :  { %s8129_s24 = smov 4   ;;  %s8130_s25 = smov [#allocation16]  }
  0x1f   :  { %108 = dma.hbm_to_vmem [thread:$0]  %s101_s20, 3072, %s103_s8, [#allocation12], %s8128_s23, %s8128_s23, %s8129_s24  }
  0x20   :  { %s131_s1 = sshll.u32 %s8130_s25, 4  ;;  %s154_s27 = sshll.u32 %s8392_s12, 4  ;;  %s132_s1 = int_to_ptr.vmem [resolvable:$true] %s131_s1  ;;  %s155_s27 = int_to_ptr.hbm [resolvable:$true] %s154_s27 }
  0x21   :  { %134 = dma.hbm_to_vmem [thread:$0]  %s130_s22, 48, %s132_s1, [#allocation15]  }
  0x22   :  { %s8131_s15 = smov [#allocation19]  }
  0x23   :  { %s156_s16 = sshll.u32 %s8131_s15, 4  ;;  %s157_s16 = int_to_ptr.vmem [resolvable:$true] %s156_s16 }
  0x24   :  { %162 = dma.hbm_to_vmem [thread:$0]  %s155_s27, 8192, %s157_s16, [#allocation18], %s8128_s23, %s8128_s23, %s8129_s24  }
  0x25   :  { %8101 = dma.done.wait [#allocation3], 64  }
  0x26   :  { %8102 = vsyncadd [#allocation3], 4294967232 }
  0x27   :  { %8103 = dma.done.wait [#allocation6], 8320  }
  0x28   :  { %8104 = vsyncadd [#allocation6], 4294958976 }
  0x29   :  { %8105 = dma.done.wait [#allocation9], 24704  }
  0x2a   :  { %8106 = vsyncadd [#allocation9], 4294942592 }
  0x2b   :  { %8107 = dma.done.wait [#allocation12], 3120  }
  0x2c   :  { %8108 = vsyncadd [#allocation12], 4294964176 }
  0x2d   :  { %8109 = dma.done.wait [#allocation15], 3120  }
  0x2e   :  { %8110 = vsyncadd [#allocation15], 4294964176 }
  0x2f   :  { %8111 = dma.done.wait [#allocation18], 32768  }
  0x30   :  { %8112 = vsyncadd [#allocation18], 4294934528  ;;  %v5216_v0 = vld [vmem:[#allocation7 + $0x1c0] sm:$0xf]  ;;  %v7286_v2 = vld [vmem:[#allocation7 + $0x1c4] sm:$0xf] }
  0x31   :  { %v7290_v1 = vld [vmem:[#allocation7 + $0x1dc] sm:$0xf0]  ;;  %v5218_v4 = vld [vmem:[#allocation7 + $0x1e0] sm:$0xf0]  ;;  %v5224_v5 = vld [vmem:[#allocation7 + $0x1c8] sm:$0xf] }
  0x32   :  { %v5217_v3 = vor.u32 %v7290_v1, %v5216_v0  ;;  %v7291_v6 = vld [vmem:[#allocation7 + $0x1e4] sm:$0xf0]  ;;  %v5221_v7 = vor.u32 %v7286_v2, %v5218_v4  ;;  %v7287_v9 = vld [vmem:[#allocation7 + $0x1cc] sm:$0xf]  ;;  %v5184_v11 = vld [vmem:[#allocation7 + $0x180] sm:$0xf] }
  0x33   :  { %v5225_v8 = vor.u32 %v7291_v6, %v5224_v5  ;;  %v5226_v10 = vld [vmem:[#allocation7 + $0x1e8] sm:$0xf0]  ;;  %v7282_v13 = vld [vmem:[#allocation7 + $0x19c] sm:$0xf0]  ;;  %v7278_v14 = vld [vmem:[#allocation7 + $0x184] sm:$0xf] }
  0x34   :  { %612 = vmatpush.bf16.msra.mxu0 %v5217_v3  ;;  %v5229_v12 = vor.u32 %v7287_v9, %v5226_v10  ;;  %v5186_v15 = vld [vmem:[#allocation7 + $0x1a0] sm:$0xf0]  ;;  %625 = vmatpush.bf16.msra.mxu1 %v5221_v7  ;;  %v5185_v16 = vor.u32 %v7282_v13, %v5184_v11  ;;  %v5192_v18 = vld [vmem:[#allocation7 + $0x188] sm:$0xf]  ;;  %v7279_v20 = vld [vmem:[#allocation7 + $0x18c] sm:$0xf] }
  0x35   :  { %638 = vmatpush.bf16.msra.mxu2 %v5225_v8  ;;  %v5189_v17 = vor.u32 %v7278_v14, %v5186_v15  ;;  %v7283_v19 = vld [vmem:[#allocation7 + $0x1a4] sm:$0xf0]  ;;  %v5194_v22 = vld [vmem:[#allocation7 + $0x1a8] sm:$0xf0]  ;;  %v5152_v23 = vld [vmem:[#allocation7 + $0x140] sm:$0xf] }
  0x36   :  { %651 = vmatpush.bf16.msra.mxu3 %v5229_v12  ;;  %v5193_v21 = vor.u32 %v7283_v19, %v5192_v18  ;;  %v7274_v24 = vld [vmem:[#allocation7 + $0x15c] sm:$0xf0]  ;;  %v5197_v25 = vor.u32 %v7279_v20, %v5194_v22  ;;  %v7270_v26 = vld [vmem:[#allocation7 + $0x144] sm:$0xf]  ;;  %v5160_v28 = vld [vmem:[#allocation7 + $0x148] sm:$0xf] }
  0x37   :  { %v5154_v27 = vld [vmem:[#allocation7 + $0x160] sm:$0xf0]  ;;  %v5153_v29 = vor.u32 %v7274_v24, %v5152_v23  ;;  %v7275_v30 = vld [vmem:[#allocation7 + $0x164] sm:$0xf0]  ;;  %v7271_v31 = vld [vmem:[#allocation7 + $0x14c] sm:$0xf] }
  0x38   :  { %613 = vmatpush.bf16.msra.mxu0 %v5185_v16  ;;  %v5162_v32 = vld [vmem:[#allocation7 + $0x168] sm:$0xf0]  ;;  %626 = vmatpush.bf16.msra.mxu1 %v5189_v17  ;;  %v5157_v33 = vor.u32 %v7270_v26, %v5154_v27  ;;  %v5161_v34 = vor.u32 %v7275_v30, %v5160_v28  ;;  %v5120_v35 = vld [vmem:[#allocation7 + $0x100] sm:$0xf]  ;;  %v7262_v37 = vld [vmem:[#allocation7 + $0x104] sm:$0xf] }
  0x39   :  { %639 = vmatpush.bf16.msra.mxu2 %v5193_v21  ;;  %v7266_v36 = vld [vmem:[#allocation7 + $0x11c] sm:$0xf0]  ;;  %v5165_v38 = vor.u32 %v7271_v31, %v5162_v32  ;;  %v5122_v39 = vld [vmem:[#allocation7 + $0x120] sm:$0xf0]  ;;  %v5128_v40 = vld [vmem:[#allocation7 + $0x108] sm:$0xf] }
  0x3a   :  { %652 = vmatpush.bf16.msra.mxu3 %v5197_v25  ;;  %v7267_v41 = vld [vmem:[#allocation7 + $0x124] sm:$0xf0]  ;;  %v7263_v42 = vld [vmem:[#allocation7 + $0x10c] sm:$0xf]  ;;  %v5121_v44 = vor.u32 %v7266_v36, %v5120_v35  ;;  %v5125_v45 = vor.u32 %v7262_v37, %v5122_v39  ;;  %v5088_v47 = vld [vmem:[#allocation7 + $0xc0] sm:$0xf] }
  0x3b   :  { %v5130_v43 = vld [vmem:[#allocation7 + $0x128] sm:$0xf0]  ;;  %v5129_v46 = vor.u32 %v7267_v41, %v5128_v40  ;;  %v7258_v48 = vld [vmem:[#allocation7 + $0xdc] sm:$0xf0]  ;;  %v7254_v49 = vld [vmem:[#allocation7 + $0xc4] sm:$0xf] }
  0x3c   :  { %614 = vmatpush.bf16.msra.mxu0 %v5153_v29  ;;  %627 = vmatpush.bf16.msra.mxu1 %v5157_v33  ;;  %v5133_v50 = vor.u32 %v7263_v42, %v5130_v43  ;;  %v5090_v51 = vld [vmem:[#allocation7 + $0xe0] sm:$0xf0]  ;;  %v5096_v52 = vld [vmem:[#allocation7 + $0xc8] sm:$0xf]  ;;  %v7255_v54 = vld [vmem:[#allocation7 + $0xcc] sm:$0xf]  ;;  %v5089_v56 = vor.u32 %v7258_v48, %v5088_v47 }
  0x3d   :  { %640 = vmatpush.bf16.msra.mxu2 %v5161_v34  ;;  %v7259_v53 = vld [vmem:[#allocation7 + $0xe4] sm:$0xf0]  ;;  %v5098_v55 = vld [vmem:[#allocation7 + $0xe8] sm:$0xf0]  ;;  %v5093_v57 = vor.u32 %v7254_v49, %v5090_v51  ;;  %v5056_v59 = vld [vmem:[#allocation7 + $0x80] sm:$0xf] }
  0x3e   :  { %653 = vmatpush.bf16.msra.mxu3 %v5165_v38  ;;  %v5097_v58 = vor.u32 %v7259_v53, %v5096_v52  ;;  %v7250_v60 = vld [vmem:[#allocation7 + $0x9c] sm:$0xf0]  ;;  %v7246_v61 = vld [vmem:[#allocation7 + $0x84] sm:$0xf]  ;;  %v5101_v62 = vor.u32 %v7255_v54, %v5098_v55  ;;  %v5064_v0 = vld [vmem:[#allocation7 + $0x88] sm:$0xf] }
  0x3f   :  { %v5058_v63 = vld [vmem:[#allocation7 + $0xa0] sm:$0xf0]  ;;  %v7251_v1 = vld [vmem:[#allocation7 + $0xa4] sm:$0xf0]  ;;  %v7247_v2 = vld [vmem:[#allocation7 + $0x8c] sm:$0xf]  ;;  %v5057_v4 = vor.u32 %v7250_v60, %v5056_v59 }
  0x40   :  { %615 = vmatpush.bf16.msra.mxu0 %v5121_v44  ;;  %628 = vmatpush.bf16.msra.mxu1 %v5125_v45  ;;  %v5066_v3 = vld [vmem:[#allocation7 + $0xa8] sm:$0xf0]  ;;  %v5061_v5 = vor.u32 %v7246_v61, %v5058_v63  ;;  %v5065_v6 = vor.u32 %v7251_v1, %v5064_v0  ;;  %v5024_v7 = vld [vmem:[#allocation7 + $0x40] sm:$0xf]  ;;  %v7238_v9 = vld [vmem:[#allocation7 + $0x44] sm:$0xf] }
  0x41   :  { %641 = vmatpush.bf16.msra.mxu2 %v5129_v46  ;;  %v7242_v8 = vld [vmem:[#allocation7 + $0x5c] sm:$0xf0]  ;;  %v5069_v10 = vor.u32 %v7247_v2, %v5066_v3  ;;  %v5026_v11 = vld [vmem:[#allocation7 + $0x60] sm:$0xf0]  ;;  %v5032_v12 = vld [vmem:[#allocation7 + $0x48] sm:$0xf] }
  0x42   :  { %654 = vmatpush.bf16.msra.mxu3 %v5133_v50  ;;  %v7243_v13 = vld [vmem:[#allocation7 + $0x64] sm:$0xf0]  ;;  %v7239_v14 = vld [vmem:[#allocation7 + $0x4c] sm:$0xf]  ;;  %v5025_v16 = vor.u32 %v7242_v8, %v5024_v7  ;;  %v4992_v17 = vld [vmem:[#allocation7] sm:$0xf]  ;;  %v5029_v19 = vor.u32 %v7238_v9, %v5026_v11 }
  0x43   :  { %v5034_v15 = vld [vmem:[#allocation7 + $0x68] sm:$0xf0]  ;;  %v7234_v18 = vld [vmem:[#allocation7 + $0x1c] sm:$0xf0]  ;;  %v5033_v20 = vor.u32 %v7243_v13, %v5032_v12  ;;  %v7230_v21 = vld [vmem:[#allocation7 + $0x4] sm:$0xf] }
  0x44   :  { %616 = vmatpush.bf16.msra.mxu0 %v5089_v56  ;;  %629 = vmatpush.bf16.msra.mxu1 %v5093_v57  ;;  %v4994_v22 = vld [vmem:[#allocation7 + $0x20] sm:$0xf0]  ;;  %v5000_v23 = vld [vmem:[#allocation7 + $0x8] sm:$0xf]  ;;  %v5037_v24 = vor.u32 %v7239_v14, %v5034_v15  ;;  %v7231_v26 = vld [vmem:[#allocation7 + $0xc] sm:$0xf]  ;;  %v4993_v31 = vor.u32 %v7234_v18, %v4992_v17 }
  0x45   :  { %642 = vmatpush.bf16.msra.mxu2 %v5097_v58  ;;  %v7235_v25 = vld [vmem:[#allocation7 + $0x24] sm:$0xf0]  ;;  %v5002_v27 = vld [vmem:[#allocation7 + $0x28] sm:$0xf0]  ;;  %v5232_v28 = vld [vmem:[#allocation7 + $0x1d0] sm:$0xf]  ;;  %v4997_v35 = vor.u32 %v7230_v21, %v4994_v22 }
  0x46   :  { %655 = vmatpush.bf16.msra.mxu3 %v5101_v62  ;;  %v7292_v29 = vld [vmem:[#allocation7 + $0x1ec] sm:$0xf0]  ;;  %v7288_v30 = vld [vmem:[#allocation7 + $0x1d4] sm:$0xf]  ;;  %v5240_v33 = vld [vmem:[#allocation7 + $0x1d8] sm:$0xf]  ;;  %v5001_v36 = vor.u32 %v7235_v25, %v5000_v23  ;;  %v5005_v39 = vor.u32 %v7231_v26, %v5002_v27 }
  0x47   :  { %v5234_v32 = vld [vmem:[#allocation7 + $0x1f0] sm:$0xf0]  ;;  %v7293_v34 = vld [vmem:[#allocation7 + $0x1f4] sm:$0xf0]  ;;  %v7289_v37 = vld [vmem:[#allocation7 + $0x1dc] sm:$0xf]  ;;  %v5233_v40 = vor.u32 %v7292_v29, %v5232_v28 }
  0x48   :  { %617 = vmatpush.bf16.msra.mxu0 %v5057_v4  ;;  %630 = vmatpush.bf16.msra.mxu1 %v5061_v5  ;;  %v5242_v38 = vld [vmem:[#allocation7 + $0x1f8] sm:$0xf0]  ;;  %v5237_v41 = vor.u32 %v7288_v30, %v5234_v32  ;;  %v5241_v42 = vor.u32 %v7293_v34, %v5240_v33  ;;  %v5200_v43 = vld [vmem:[#allocation7 + $0x190] sm:$0xf]  ;;  %v7280_v45 = vld [vmem:[#allocation7 + $0x194] sm:$0xf] }
  0x49   :  { %643 = vmatpush.bf16.msra.mxu2 %v5065_v6  ;;  %v7284_v44 = vld [vmem:[#allocation7 + $0x1ac] sm:$0xf0]  ;;  %v5245_v46 = vor.u32 %v7289_v37, %v5242_v38  ;;  %v5202_v47 = vld [vmem:[#allocation7 + $0x1b0] sm:$0xf0]  ;;  %v5208_v48 = vld [vmem:[#allocation7 + $0x198] sm:$0xf] }
  0x4a   :  { %656 = vmatpush.bf16.msra.mxu3 %v5069_v10  ;;  %v7285_v49 = vld [vmem:[#allocation7 + $0x1b4] sm:$0xf0]  ;;  %v8248_v50 = vld [vmem:[#allocation2] sm:$0xf]  ;;  %v7281_v51 = vld [vmem:[#allocation7 + $0x19c] sm:$0xf]  ;;  %v5201_v53 = vor.u32 %v7284_v44, %v5200_v43  ;;  %v5205_v54 = vor.u32 %v7280_v45, %v5202_v47 }
  0x4b   :  { %v5210_v52 = vld [vmem:[#allocation7 + $0x1b8] sm:$0xf0]  ;;  %v5209_v55 = vor.u32 %v7285_v49, %v5208_v48  ;;  %v5168_v56 = vld [vmem:[#allocation7 + $0x150] sm:$0xf]  ;;  %v7272_v58 = vld [vmem:[#allocation7 + $0x154] sm:$0xf] }
  0x4c   :  { %618 = vmatpush.bf16.msra.mxu0 %v5025_v16  ;;  %631 = vmatpush.bf16.msra.mxu1 %v5029_v19  ;;  %v7276_v57 = vld [vmem:[#allocation7 + $0x16c] sm:$0xf0]  ;;  %v5213_v59 = vor.u32 %v7281_v51, %v5210_v52  ;;  %v5170_v60 = vld [vmem:[#allocation7 + $0x170] sm:$0xf0]  ;;  %v5176_v61 = vld [vmem:[#allocation7 + $0x158] sm:$0xf] }
  0x4d   :  { %644 = vmatpush.bf16.msra.mxu2 %v5033_v20  ;;  %v7277_v62 = vld [vmem:[#allocation7 + $0x174] sm:$0xf0]  ;;  %v7273_v63 = vld [vmem:[#allocation7 + $0x15c] sm:$0xf]  ;;  %v5169_v1 = vor.u32 %v7276_v57, %v5168_v56  ;;  %v5173_v2 = vor.u32 %v7272_v58, %v5170_v60  ;;  %v5136_v4 = vld [vmem:[#allocation7 + $0x110] sm:$0xf] }
  0x4e   :  { %657 = vmatpush.bf16.msra.mxu3 %v5037_v24  ;;  %v5178_v0 = vld [vmem:[#allocation7 + $0x178] sm:$0xf0]  ;;  %v5177_v3 = vor.u32 %v7277_v62, %v5176_v61  ;;  %v7268_v5 = vld [vmem:[#allocation7 + $0x12c] sm:$0xf0]  ;;  %v7264_v6 = vld [vmem:[#allocation7 + $0x114] sm:$0xf] }
  0x4f   :  { %v5181_v7 = vor.u32 %v7273_v63, %v5178_v0  ;;  %v5138_v8 = vld [vmem:[#allocation7 + $0x130] sm:$0xf0]  ;;  %v5144_v9 = vld [vmem:[#allocation7 + $0x118] sm:$0xf]  ;;  %v7265_v11 = vld [vmem:[#allocation7 + $0x11c] sm:$0xf]  ;;  %v5137_v13 = vor.u32 %v7268_v5, %v5136_v4 }
  0x50   :  { %619 = vmatpush.bf16.msra.mxu0 %v4993_v31  ;;  %632 = vmatpush.bf16.msra.mxu1 %v4997_v35  ;;  %v7269_v10 = vld [vmem:[#allocation7 + $0x134] sm:$0xf0]  ;;  %v5146_v12 = vld [vmem:[#allocation7 + $0x138] sm:$0xf0]  ;;  %v5141_v14 = vor.u32 %v7264_v6, %v5138_v8  ;;  %v5104_v16 = vld [vmem:[#allocation7 + $0xd0] sm:$0xf] }
  0x51   :  { %645 = vmatpush.bf16.msra.mxu2 %v5001_v36  ;;  %v5145_v15 = vor.u32 %v7269_v10, %v5144_v9  ;;  %v7260_v17 = vld [vmem:[#allocation7 + $0xec] sm:$0xf0]  ;;  %v7256_v18 = vld [vmem:[#allocation7 + $0xd4] sm:$0xf]  ;;  %v5149_v19 = vor.u32 %v7265_v11, %v5146_v12  ;;  %v5112_v21 = vld [vmem:[#allocation7 + $0xd8] sm:$0xf] }
  0x52   :  { %658 = vmatpush.bf16.msra.mxu3 %v5005_v39  ;;  %v5106_v20 = vld [vmem:[#allocation7 + $0xf0] sm:$0xf0]  ;;  %v7261_v22 = vld [vmem:[#allocation7 + $0xf4] sm:$0xf0]  ;;  %v7257_v23 = vld [vmem:[#allocation7 + $0xdc] sm:$0xf]  ;;  %v5105_v25 = vor.u32 %v7260_v17, %v5104_v16 }
  0x53   :  { %620 = vmatmul.bf16.vlgmr.msra.gmra.mxu0 %v8248_v50  ;;  %633 = vmatmul.bf16.vlgmr.msra.gmra.mxu1 %v8248_v50  ;;  %v5114_v24 = vld [vmem:[#allocation7 + $0xf8] sm:$0xf0]  ;;  %v5109_v26 = vor.u32 %v7256_v18, %v5106_v20  ;;  %v5113_v27 = vor.u32 %v7261_v22, %v5112_v21  ;;  %v5072_v28 = vld [vmem:[#allocation7 + $0x90] sm:$0xf]  ;;  %v7248_v30 = vld [vmem:[#allocation7 + $0x94] sm:$0xf] }
  0x54   :  { %664 = vmatpush.bf16.msrb.mxu0 %v5233_v40  ;;  %677 = vmatpush.bf16.msrb.mxu1 %v5237_v41  ;;  %v7252_v29 = vld [vmem:[#allocation7 + $0xac] sm:$0xf0]  ;;  %v5117_v31 = vor.u32 %v7257_v23, %v5114_v24  ;;  %v5074_v32 = vld [vmem:[#allocation7 + $0xb0] sm:$0xf0]  ;;  %v5080_v33 = vld [vmem:[#allocation7 + $0x98] sm:$0xf] }
  0x55   :  { %690 = vmatpush.bf16.msrb.mxu2 %v5241_v42  ;;  %659 = vmatmul.bf16.vlgmr.msra.gmra.mxu3 %v8248_v50  ;;  %v7253_v34 = vld [vmem:[#allocation7 + $0xb4] sm:$0xf0]  ;;  %v7249_v35 = vld [vmem:[#allocation7 + $0x9c] sm:$0xf]  ;;  %v5073_v37 = vor.u32 %v7252_v29, %v5072_v28  ;;  %v5077_v38 = vor.u32 %v7248_v30, %v5074_v32  ;;  %v5040_v40 = vld [vmem:[#allocation7 + $0x50] sm:$0xf] }
  0x56   :  { %703 = vmatpush.bf16.msrb.mxu3 %v5245_v46  ;;  %646 = vmatmul.bf16.vlgmr.msra.gmra.mxu2 %v8248_v50  ;;  %v5082_v36 = vld [vmem:[#allocation7 + $0xb8] sm:$0xf0]  ;;  %v5081_v39 = vor.u32 %v7253_v34, %v5080_v33  ;;  %v7244_v41 = vld [vmem:[#allocation7 + $0x6c] sm:$0xf0]  ;;  %v7240_v42 = vld [vmem:[#allocation7 + $0x54] sm:$0xf] }
  0x57   :  { %v5085_v43 = vor.u32 %v7249_v35, %v5082_v36  ;;  %v5042_v44 = vld [vmem:[#allocation7 + $0x70] sm:$0xf0]  ;;  %v5048_v45 = vld [vmem:[#allocation7 + $0x58] sm:$0xf]  ;;  %v7241_v47 = vld [vmem:[#allocation7 + $0x5c] sm:$0xf]  ;;  %v5041_v49 = vor.u32 %v7244_v41, %v5040_v40 }
  0x58   :  { %665 = vmatpush.bf16.msrb.mxu0 %v5201_v53  ;;  %678 = vmatpush.bf16.msrb.mxu1 %v5205_v54  ;;  %v7245_v46 = vld [vmem:[#allocation7 + $0x74] sm:$0xf0]  ;;  %v5050_v48 = vld [vmem:[#allocation7 + $0x78] sm:$0xf0]  ;;  %v5008_v51 = vld [vmem:[#allocation7 + $0x10] sm:$0xf]  ;;  %v5045_v52 = vor.u32 %v7240_v42, %v5042_v44 }
  0x59   :  { %691 = vmatpush.bf16.msrb.mxu2 %v5209_v55  ;;  %v5049_v53 = vor.u32 %v7245_v46, %v5048_v45  ;;  %v7236_v54 = vld [vmem:[#allocation7 + $0x2c] sm:$0xf0]  ;;  %v7232_v55 = vld [vmem:[#allocation7 + $0x14] sm:$0xf]  ;;  %v5053_v57 = vor.u32 %v7241_v47, %v5050_v48  ;;  %v5016_v58 = vld [vmem:[#allocation7 + $0x18] sm:$0xf] }
  0x5a   :  { %704 = vmatpush.bf16.msrb.mxu3 %v5213_v59  ;;  %v5010_v56 = vld [vmem:[#allocation7 + $0x30] sm:$0xf0]  ;;  %v7237_v59 = vld [vmem:[#allocation7 + $0x34] sm:$0xf0]  ;;  %v7233_v60 = vld [vmem:[#allocation7 + $0x1c] sm:$0xf]  ;;  %v5009_v0 = vor.u32 %v7236_v54, %v5008_v51 }
  0x5b   :  { %v5018_v61 = vld [vmem:[#allocation7 + $0x38] sm:$0xf0]  ;;  %v5332_v62 = vld [vmem:[#allocation10 + $0xa8] sm:$0xf]  ;;  %v5017_v4 = vor.u32 %v7237_v59, %v5016_v58  ;;  %v7313_v11 = vld [vmem:[#allocation10 + $0x98] sm:$0xf0] }
  0x5c   :  { %666 = vmatpush.bf16.msrb.mxu0 %v5169_v1  ;;  %679 = vmatpush.bf16.msrb.mxu1 %v5173_v2  ;;  %v7316_v63 = vld [vmem:[#allocation10 + $0xb0] sm:$0xf0]  ;;  %v5428_v1 = vld [vmem:[#allocation10 + $0x168] sm:$0xf]  ;;  %v5021_v5 = vor.u32 %v7233_v60, %v5018_v61  ;;  %v5512_v20 = vld [vmem:[#allocation10 + $0x210] sm:$0xf] }
  0x5d   :  { %692 = vmatpush.bf16.msrb.mxu2 %v5177_v3  ;;  %v7340_v2 = vld [vmem:[#allocation10 + $0x170] sm:$0xf0]  ;;  %v5013_v3 = vor.u32 %v7232_v55, %v5010_v56  ;;  %v5333_v6 = vor.u32 %v7316_v63, %v5332_v62  ;;  %v5524_v8 = vld [vmem:[#allocation10 + $0x228] sm:$0xf]  ;;  %v7361_v21 = vld [vmem:[#allocation10 + $0x218] sm:$0xf0] }
  0x5e   :  { %705 = vmatpush.bf16.msrb.mxu3 %v5181_v7  ;;  %v5320_v7 = vld [vmem:[#allocation10 + $0x90] sm:$0xf]  ;;  %v7364_v9 = vld [vmem:[#allocation10 + $0x230] sm:$0xf0]  ;;  %v5429_v10 = vor.u32 %v7340_v2, %v5428_v1  ;;  %v5620_v12 = vld [vmem:[#allocation10 + $0x2e8] sm:$0xf]  ;;  %v5513_v28 = vor.u32 %v7361_v21, %v5512_v20 }
  0x5f   :  { %v5525_v16 = vor.u32 %v7364_v9, %v5524_v8  ;;  %v5321_v17 = vor.u32 %v7313_v11, %v5320_v7  ;;  %v7310_v23 = vld [vmem:[#allocation10 + $0x80] sm:$0xf0]  ;;  %v5608_v24 = vld [vmem:[#allocation10 + $0x2d0] sm:$0xf]  ;;  %v5500_v32 = vld [vmem:[#allocation10 + $0x1f8] sm:$0xf] }
  0x60   :  { %667 = vmatpush.bf16.msrb.mxu0 %v5137_v13  ;;  %680 = vmatpush.bf16.msrb.mxu1 %v5141_v14  ;;  %v7388_v13 = vld [vmem:[#allocation10 + $0x2f0] sm:$0xf0]  ;;  %v5416_v14 = vld [vmem:[#allocation10 + $0x150] sm:$0xf]  ;;  %v7358_v33 = vld [vmem:[#allocation10 + $0x200] sm:$0xf0] }
  0x61   :  { %693 = vmatpush.bf16.msrb.mxu2 %v5145_v15  ;;  %v7337_v15 = vld [vmem:[#allocation10 + $0x158] sm:$0xf0]  ;;  %v5621_v18 = vor.u32 %v7388_v13, %v5620_v12  ;;  %v7307_v35 = vld [vmem:[#allocation10 + $0x68] sm:$0xf0]  ;;  %v5596_v36 = vld [vmem:[#allocation10 + $0x2b8] sm:$0xf]  ;;  %v5501_v40 = vor.u32 %v7358_v33, %v5500_v32 }
  0x62   :  { %706 = vmatpush.bf16.msrb.mxu3 %v5149_v19  ;;  %v5308_v19 = vld [vmem:[#allocation10 + $0x78] sm:$0xf]  ;;  %v5417_v22 = vor.u32 %v7337_v15, %v5416_v14  ;;  %v5284_v41 = vld [vmem:[#allocation10 + $0x48] sm:$0xf]  ;;  %v5488_v44 = vld [vmem:[#allocation10 + $0x1e0] sm:$0xf] }
  0x63   :  { %v5309_v29 = vor.u32 %v7310_v23, %v5308_v19  ;;  %v7355_v45 = vld [vmem:[#allocation10 + $0x1e8] sm:$0xf0]  ;;  %v5584_v47 = vld [vmem:[#allocation10 + $0x2a0] sm:$0xf]  ;;  %v7328_v51 = vld [vmem:[#allocation10 + $0x110] sm:$0xf0] }
  0x64   :  { %668 = vmatpush.bf16.msrb.mxu0 %v5105_v25  ;;  %681 = vmatpush.bf16.msrb.mxu1 %v5109_v26  ;;  %v7385_v25 = vld [vmem:[#allocation10 + $0x2d8] sm:$0xf0]  ;;  %v5404_v26 = vld [vmem:[#allocation10 + $0x138] sm:$0xf]  ;;  %v7379_v48 = vld [vmem:[#allocation10 + $0x2a8] sm:$0xf0] }
  0x65   :  { %694 = vmatpush.bf16.msrb.mxu2 %v5113_v27  ;;  %v7334_v27 = vld [vmem:[#allocation10 + $0x140] sm:$0xf0]  ;;  %v5609_v30 = vor.u32 %v7385_v25, %v5608_v24  ;;  %v5585_v54 = vor.u32 %v7379_v48, %v5584_v47  ;;  %v5272_v55 = vld [vmem:[#allocation10 + $0x30] sm:$0xf]  ;;  %v5476_v56 = vld [vmem:[#allocation10 + $0x1c8] sm:$0xf] }
  0x66   :  { %707 = vmatpush.bf16.msrb.mxu3 %v5117_v31  ;;  %v5296_v31 = vld [vmem:[#allocation10 + $0x60] sm:$0xf]  ;;  %v5405_v34 = vor.u32 %v7334_v27, %v5404_v26  ;;  %v7301_v59 = vld [vmem:[#allocation10 + $0x38] sm:$0xf0]  ;;  %v5572_v60 = vld [vmem:[#allocation10 + $0x288] sm:$0xf] }
  0x67   :  { %v5297_v42 = vor.u32 %v7307_v35, %v5296_v31  ;;  %v7376_v61 = vld [vmem:[#allocation10 + $0x290] sm:$0xf0]  ;;  %v5368_v62 = vld [vmem:[#allocation10 + $0xf0] sm:$0xf]  ;;  %v7325_v63 = vld [vmem:[#allocation10 + $0xf8] sm:$0xf0]  ;;  %v5273_v1 = vor.u32 %v7301_v59, %v5272_v55 }
  0x68   :  { %669 = vmatpush.bf16.msrb.mxu0 %v5073_v37  ;;  %682 = vmatpush.bf16.msrb.mxu1 %v5077_v38  ;;  %v7382_v37 = vld [vmem:[#allocation10 + $0x2c0] sm:$0xf0]  ;;  %v5392_v38 = vld [vmem:[#allocation10 + $0x120] sm:$0xf]  ;;  %v5573_v2 = vor.u32 %v7376_v61, %v5572_v60  ;;  %v5560_v8 = vld [vmem:[#allocation10 + $0x270] sm:$0xf] }
  0x69   :  { %695 = vmatpush.bf16.msrb.mxu2 %v5081_v39  ;;  %v7331_v39 = vld [vmem:[#allocation10 + $0x128] sm:$0xf0]  ;;  %v7298_v7 = vld [vmem:[#allocation10 + $0x20] sm:$0xf0]  ;;  %v7373_v9 = vld [vmem:[#allocation10 + $0x278] sm:$0xf0] }
  0x6a   :  { %708 = vmatpush.bf16.msrb.mxu3 %v5085_v43  ;;  %v5597_v43 = vor.u32 %v7382_v37, %v5596_v36  ;;  %v5393_v46 = vor.u32 %v7331_v39, %v5392_v38  ;;  %v7322_v11 = vld [vmem:[#allocation10 + $0xe0] sm:$0xf0]  ;;  %v5248_v13 = vld [vmem:[#allocation10] sm:$0xf]  ;;  %v5561_v15 = vor.u32 %v7373_v9, %v5560_v8  ;;  %v5548_v21 = vld [vmem:[#allocation10 + $0x258] sm:$0xf] }
  0x6b   :  { %v5344_v20 = vld [vmem:[#allocation10 + $0xc0] sm:$0xf]  ;;  %v7319_v23 = vld [vmem:[#allocation10 + $0xc8] sm:$0xf0]  ;;  %v5716_v24 = vld [vmem:[#allocation10 + $0x3a8] sm:$0xf] }
  0x6c   :  { %670 = vmatpush.bf16.msrb.mxu0 %v5041_v49  ;;  %683 = vmatpush.bf16.msrb.mxu1 %v5045_v52  ;;  %v5380_v49 = vld [vmem:[#allocation10 + $0x108] sm:$0xf]  ;;  %v5489_v52 = vor.u32 %v7355_v45, %v5488_v44  ;;  %v7412_v25 = vld [vmem:[#allocation10 + $0x3b0] sm:$0xf0]  ;;  %v5704_v31 = vld [vmem:[#allocation10 + $0x390] sm:$0xf]  ;;  %v5345_v35 = vor.u32 %v7319_v23, %v5344_v20 }
  0x6d   :  { %696 = vmatpush.bf16.msrb.mxu2 %v5049_v53  ;;  %v5381_v58 = vor.u32 %v7328_v51, %v5380_v49  ;;  %v5812_v26 = vld [vmem:[#allocation10 + $0x468] sm:$0xf]  ;;  %v7436_v27 = vld [vmem:[#allocation10 + $0x470] sm:$0xf0]  ;;  %v5440_v32 = vld [vmem:[#allocation10 + $0x180] sm:$0xf]  ;;  %v5717_v36 = vor.u32 %v7412_v25, %v5716_v24 }
  0x6e   :  { %709 = vmatpush.bf16.msrb.mxu3 %v5053_v57  ;;  %v7352_v57 = vld [vmem:[#allocation10 + $0x1d0] sm:$0xf0]  ;;  %v7343_v33 = vld [vmem:[#allocation10 + $0x188] sm:$0xf0]  ;;  %v5908_v38 = vld [vmem:[#allocation10 + $0x528] sm:$0xf] }
  0x6f   :  { %v7367_v37 = vld [vmem:[#allocation10 + $0x248] sm:$0xf0]  ;;  %v7460_v39 = vld [vmem:[#allocation10 + $0x530] sm:$0xf0]  ;;  %v7433_v44 = vld [vmem:[#allocation10 + $0x458] sm:$0xf0]  ;;  %v5441_v45 = vor.u32 %v7343_v33, %v5440_v32 }
  0x70   :  { %671 = vmatpush.bf16.msrb.mxu0 %v5009_v0  ;;  %684 = vmatpush.bf16.msrb.mxu1 %v5013_v3  ;;  %v5477_v0 = vor.u32 %v7352_v57, %v5476_v56  ;;  %v5260_v3 = vld [vmem:[#allocation10 + $0x18] sm:$0xf]  ;;  %v5909_v47 = vor.u32 %v7460_v39, %v5908_v38  ;;  %v7406_v55 = vld [vmem:[#allocation10 + $0x380] sm:$0xf0]  ;;  %v5992_v56 = vld [vmem:[#allocation10 + $0x5d0] sm:$0xf] }
  0x71   :  { %697 = vmatpush.bf16.msrb.mxu2 %v5017_v4  ;;  %v5464_v4 = vld [vmem:[#allocation10 + $0x1b0] sm:$0xf]  ;;  %v5261_v14 = vor.u32 %v7298_v7, %v5260_v3  ;;  %v5692_v51 = vld [vmem:[#allocation10 + $0x378] sm:$0xf]  ;;  %v7481_v57 = vld [vmem:[#allocation10 + $0x5d8] sm:$0xf0] }
  0x72   :  { %710 = vmatpush.bf16.msrb.mxu3 %v5021_v5  ;;  %v7349_v5 = vld [vmem:[#allocation10 + $0x1b8] sm:$0xf0]  ;;  %v7430_v59 = vld [vmem:[#allocation10 + $0x440] sm:$0xf0]  ;;  %v5693_v61 = vor.u32 %v7406_v55, %v5692_v51  ;;  %v7403_v3 = vld [vmem:[#allocation10 + $0x368] sm:$0xf0] }
  0x73   :  { %672 = vmatmul.bf16.vlgmr.msrb.gmra.mxu0 %v8248_v50  ;;  %685 = vmatmul.bf16.vlgmr.msrb.gmra.mxu1 %v8248_v50  ;;  %v5465_v12 = vor.u32 %v7349_v5, %v5464_v4  ;;  %v5980_v4 = vld [vmem:[#allocation10 + $0x5b8] sm:$0xf]  ;;  %v7478_v5 = vld [vmem:[#allocation10 + $0x5c0] sm:$0xf0]  ;;  %v7427_v7 = vld [vmem:[#allocation10 + $0x428] sm:$0xf0] }
  0x74   :  { %2036 = vmatpush.bf16.msra.mxu0 %v5333_v6  ;;  %2049 = vmatpush.bf16.msra.mxu1 %v5429_v10  ;;  %v5369_v6 = vor.u32 %v7325_v63, %v5368_v62  ;;  %v5356_v10 = vld [vmem:[#allocation10 + $0xd8] sm:$0xf]  ;;  %v5993_v62 = vor.u32 %v7481_v57, %v5992_v56  ;;  %v5680_v63 = vld [vmem:[#allocation10 + $0x360] sm:$0xf]  ;;  %v5656_v24 = vld [vmem:[#allocation10 + $0x330] sm:$0xf] }
  0x75   :  { %698 = vmatmul.bf16.vlgmr.msrb.gmra.mxu2 %v8248_v50  ;;  %711 = vmatmul.bf16.vlgmr.msrb.gmra.mxu3 %v8248_v50  ;;  %v7304_v50 = vld [vmem:[#allocation10 + $0x50] sm:$0xf0]  ;;  %v5357_v19 = vor.u32 %v7322_v11, %v5356_v10  ;;  %v5681_v9 = vor.u32 %v7403_v3, %v5680_v63  ;;  %v5981_v10 = vor.u32 %v7478_v5, %v5980_v4  ;;  %v5668_v11 = vld [vmem:[#allocation10 + $0x348] sm:$0xf]  ;;  %v7397_v25 = vld [vmem:[#allocation10 + $0x338] sm:$0xf0] }
  0x76   :  { %2062 = vmatpush.bf16.msra.mxu2 %v5525_v16  ;;  %2075 = vmatpush.bf16.msra.mxu3 %v5621_v18  ;;  %v5285_v53 = vor.u32 %v7304_v50, %v5284_v41  ;;  %v7295_v16 = vld [vmem:[#allocation10 + $0x8] sm:$0xf0]  ;;  %v7346_v18 = vld [vmem:[#allocation10 + $0x1a0] sm:$0xf0]  ;;  %v7409_v41 = vld [vmem:[#allocation10 + $0x398] sm:$0xf0] }
  0x77   :  { %v6004_v50 = vld [vmem:[#allocation10 + $0x5e8] sm:$0xf]  ;;  %v5705_v48 = vor.u32 %v7409_v41, %v5704_v31  ;;  %v7448_v31 = vld [vmem:[#allocation10 + $0x4d0] sm:$0xf0]  ;;  %v5740_v38 = vld [vmem:[#allocation10 + $0x3d8] sm:$0xf] }
  0x78   :  { %2037 = vmatpush.bf16.msra.mxu0 %v5321_v17  ;;  %2050 = vmatpush.bf16.msra.mxu1 %v5417_v22  ;;  %v5452_v17 = vld [vmem:[#allocation10 + $0x198] sm:$0xf]  ;;  %v7370_v22 = vld [vmem:[#allocation10 + $0x260] sm:$0xf0]  ;;  %v5956_v32 = vld [vmem:[#allocation10 + $0x588] sm:$0xf] }
  0x79   :  { %v7442_v55 = vld [vmem:[#allocation10 + $0x4a0] sm:$0xf0]  ;;  %v5932_v56 = vld [vmem:[#allocation10 + $0x558] sm:$0xf]  ;;  %v5920_v63 = vld [vmem:[#allocation10 + $0x540] sm:$0xf] }
  0x7a   :  { %2063 = vmatpush.bf16.msra.mxu2 %v5513_v28  ;;  %2076 = vmatpush.bf16.msra.mxu3 %v5609_v30  ;;  %v5453_v28 = vor.u32 %v7346_v18, %v5452_v17  ;;  %v5549_v30 = vor.u32 %v7370_v22, %v5548_v21  ;;  %v7475_v17 = vld [vmem:[#allocation10 + $0x5a8] sm:$0xf0]  ;;  %v5764_v18 = vld [vmem:[#allocation10 + $0x408] sm:$0xf]  ;;  %s8132_s28 = smov 112   ;;  %s4975_s0 = sshll.u32 %s8394_s14, 4  ;;  %s4976_s0 = int_to_ptr.hbm [resolvable:$true] %s4975_s0 }
  0x7c   :  { %2038 = vmatpush.bf16.msra.mxu0 %v5309_v29  ;;  %2051 = vmatpush.bf16.msra.mxu1 %v5405_v34  ;;  %v5249_v29 = vor.u32 %v7295_v16, %v5248_v13  ;;  %v5536_v34 = vld [vmem:[#allocation10 + $0x240] sm:$0xf]  ;;  %v7451_v13 = vld [vmem:[#allocation10 + $0x4e8] sm:$0xf0] }
  0x7d   :  { %v5968_v16 = vld [vmem:[#allocation10 + $0x5a0] sm:$0xf] }
  0x7e   :  { %2064 = vmatpush.bf16.msra.mxu2 %v5501_v40  ;;  %2077 = vmatpush.bf16.msra.mxu3 %v5597_v43  ;;  %v5813_v40 = vor.u32 %v7436_v27, %v5812_v26  ;;  %v5800_v43 = vld [vmem:[#allocation10 + $0x450] sm:$0xf]  ;;  %v5969_v22 = vor.u32 %v7475_v17, %v5968_v16  ;;  %v7421_v27 = vld [vmem:[#allocation10 + $0x3f8] sm:$0xf0] }
  0x7f   :  { %v5752_v26 = vld [vmem:[#allocation10 + $0x3f0] sm:$0xf] }
  0x80   :  { %2039 = vmatpush.bf16.msra.mxu0 %v5297_v42  ;;  %2052 = vmatpush.bf16.msra.mxu1 %v5393_v46  ;;  %v7484_v42 = vld [vmem:[#allocation10 + $0x5f0] sm:$0xf0]  ;;  %v5537_v46 = vor.u32 %v7367_v37, %v5536_v34  ;;  %v7394_v37 = vld [vmem:[#allocation10 + $0x320] sm:$0xf0] }
  0x81   :  { %v6005_v49 = vor.u32 %v7484_v42, %v6004_v50  ;;  %v7472_v34 = vld [vmem:[#allocation10 + $0x590] sm:$0xf0]  ;;  %v5848_v50 = vld [vmem:[#allocation10 + $0x4b0] sm:$0xf]  ;;  %v7445_v42 = vld [vmem:[#allocation10 + $0x4b8] sm:$0xf0] }
  0x82   :  { %2065 = vmatpush.bf16.msra.mxu2 %v5489_v52  ;;  %2078 = vmatpush.bf16.msra.mxu3 %v5585_v54  ;;  %v5896_v52 = vld [vmem:[#allocation10 + $0x510] sm:$0xf]  ;;  %v5801_v54 = vor.u32 %v7433_v44, %v5800_v43  ;;  %v5849_v44 = vor.u32 %v7445_v42, %v5848_v50  ;;  %v7333_v50 = vld [vmem:[#allocation10 + $0x13c] sm:$0xf] }
  0x83   :  { %v5944_v43 = vld [vmem:[#allocation10 + $0x570] sm:$0xf] }
  0x84   :  { %2040 = vmatpush.bf16.msra.mxu0 %v5285_v53  ;;  %2053 = vmatpush.bf16.msra.mxu1 %v5381_v58  ;;  %v7457_v53 = vld [vmem:[#allocation10 + $0x518] sm:$0xf0]  ;;  %v5788_v58 = vld [vmem:[#allocation10 + $0x438] sm:$0xf] }
  0x85   :  { %v5897_v60 = vor.u32 %v7457_v53, %v5896_v52  ;;  %v7415_v52 = vld [vmem:[#allocation10 + $0x3c8] sm:$0xf0] }
  0x86   :  { %2066 = vmatpush.bf16.msra.mxu2 %v5477_v0  ;;  %2079 = vmatpush.bf16.msra.mxu3 %v5573_v2  ;;  %v5884_v0 = vld [vmem:[#allocation10 + $0x4f8] sm:$0xf]  ;;  %v5789_v2 = vor.u32 %v7430_v59, %v5788_v58  ;;  %v7466_v58 = vld [vmem:[#allocation10 + $0x560] sm:$0xf0] }
  0x87   :  { %v5933_v59 = vor.u32 %v7466_v58, %v5932_v56  ;;  %v5610_v56 = vld [vmem:[#allocation10 + $0x2dc] sm:$0xf0]  ;;  %v5298_v58 = vld [vmem:[#allocation10 + $0x6c] sm:$0xf0] }
  0x88   :  { %2041 = vmatpush.bf16.msra.mxu0 %v5273_v1  ;;  %2054 = vmatpush.bf16.msra.mxu1 %v5369_v6  ;;  %v7454_v1 = vld [vmem:[#allocation10 + $0x500] sm:$0xf0]  ;;  %v5776_v6 = vld [vmem:[#allocation10 + $0x420] sm:$0xf] }
  0x89   :  { %v5885_v8 = vor.u32 %v7454_v1, %v5884_v0  ;;  %v7463_v0 = vld [vmem:[#allocation10 + $0x548] sm:$0xf0] }
  0x8a   :  { %2067 = vmatpush.bf16.msra.mxu2 %v5465_v12  ;;  %2080 = vmatpush.bf16.msra.mxu3 %v5561_v15  ;;  %v5872_v12 = vld [vmem:[#allocation10 + $0x4e0] sm:$0xf]  ;;  %v7400_v15 = vld [vmem:[#allocation10 + $0x350] sm:$0xf0]  ;;  %v5921_v1 = vor.u32 %v7463_v0, %v5920_v63 }
  0x8b   :  { %v5873_v20 = vor.u32 %v7451_v13, %v5872_v12  ;;  %v5669_v21 = vor.u32 %v7400_v15, %v5668_v11  ;;  %v7339_v11 = vld [vmem:[#allocation10 + $0x16c] sm:$0xf]  ;;  %v5430_v13 = vld [vmem:[#allocation10 + $0x174] sm:$0xf0] }
  0x8c   :  { %2042 = vmatpush.bf16.msra.mxu0 %v5261_v14  ;;  %2055 = vmatpush.bf16.msra.mxu1 %v5357_v19  ;;  %v5777_v14 = vor.u32 %v7427_v7, %v5776_v6  ;;  %v7424_v19 = vld [vmem:[#allocation10 + $0x410] sm:$0xf0] }
  0x8d   :  { %v5765_v23 = vor.u32 %v7424_v19, %v5764_v18 }
  0x8e   :  { %2068 = vmatpush.bf16.msra.mxu2 %v5453_v28  ;;  %2081 = vmatpush.bf16.msra.mxu3 %v5549_v30  ;;  %v5657_v28 = vor.u32 %v7397_v25, %v5656_v24  ;;  %v5860_v30 = vld [vmem:[#allocation10 + $0x4c8] sm:$0xf] }
  0x8f   :  { %v5861_v33 = vor.u32 %v7448_v31, %v5860_v30  ;;  %v7363_v31 = vld [vmem:[#allocation10 + $0x22c] sm:$0xf] }
  0x90   :  { %2043 = vmatpush.bf16.msra.mxu0 %v5249_v29  ;;  %2056 = vmatpush.bf16.msra.mxu1 %v5345_v35  ;;  %v5753_v29 = vor.u32 %v7421_v27, %v5752_v26  ;;  %v5957_v35 = vor.u32 %v7472_v34, %v5956_v32  ;;  %v7336_v26 = vld [vmem:[#allocation10 + $0x154] sm:$0xf]  ;;  %v5418_v27 = vld [vmem:[#allocation10 + $0x15c] sm:$0xf0]  ;;  %v5526_v32 = vld [vmem:[#allocation10 + $0x234] sm:$0xf0] }
  0x92   :  { %2069 = vmatpush.bf16.msra.mxu2 %v5441_v45  ;;  %2082 = vmatpush.bf16.msra.mxu3 %v5537_v46  ;;  %v7469_v45 = vld [vmem:[#allocation10 + $0x578] sm:$0xf0] }
  0x93   :  { %v5945_v46 = vor.u32 %v7469_v45, %v5944_v43  ;;  %v5406_v43 = vld [vmem:[#allocation10 + $0x144] sm:$0xf0]  ;;  %v5529_v45 = vor.u32 %v7363_v31, %v5526_v32  ;;  %v5478_v31 = vld [vmem:[#allocation10 + $0x1d4] sm:$0xf0]  ;;  %v7375_v32 = vld [vmem:[#allocation10 + $0x28c] sm:$0xf] }
  0x94   :  { %2088 = vmatpush.bf16.msrb.mxu0 %v5717_v36  ;;  %2101 = vmatpush.bf16.msrb.mxu1 %v5813_v40  ;;  %v5644_v36 = vld [vmem:[#allocation10 + $0x318] sm:$0xf]  ;;  %v7418_v40 = vld [vmem:[#allocation10 + $0x3e0] sm:$0xf0] }
  0x95   :  { %v5645_v39 = vor.u32 %v7394_v37, %v5644_v36  ;;  %v5741_v41 = vor.u32 %v7418_v40, %v5740_v38  ;;  %v5622_v37 = vld [vmem:[#allocation10 + $0x2f4] sm:$0xf0]  ;;  %v7309_v38 = vld [vmem:[#allocation10 + $0x7c] sm:$0xf] }
  0x96   :  { %2114 = vmatpush.bf16.msrb.mxu2 %v5909_v47  ;;  %2127 = vmatpush.bf16.msrb.mxu3 %v6005_v49  ;;  %v5632_v47 = vld [vmem:[#allocation10 + $0x300] sm:$0xf] }
  0x97   :  { %v5728_v49 = vld [vmem:[#allocation10 + $0x3c0] sm:$0xf] }
  0x98   :  { %2089 = vmatpush.bf16.msrb.mxu0 %v5705_v48  ;;  %2102 = vmatpush.bf16.msrb.mxu1 %v5801_v54  ;;  %v7391_v48 = vld [vmem:[#allocation10 + $0x308] sm:$0xf0]  ;;  %v5729_v53 = vor.u32 %v7415_v52, %v5728_v49  ;;  %v5836_v54 = vld [vmem:[#allocation10 + $0x498] sm:$0xf]  ;;  %v5514_v52 = vld [vmem:[#allocation10 + $0x21c] sm:$0xf0] }
  0x99   :  { %v5633_v51 = vor.u32 %v7391_v48, %v5632_v47  ;;  %v5837_v57 = vor.u32 %v7442_v55, %v5836_v54  ;;  %v5409_v55 = vor.u32 %v7333_v50, %v5406_v43  ;;  %v5466_v50 = vld [vmem:[#allocation10 + $0x1bc] sm:$0xf0] }
  0x9a   :  { %2115 = vmatpush.bf16.msrb.mxu2 %v5897_v60  ;;  %2128 = vmatpush.bf16.msrb.mxu3 %v5993_v62  ;;  %v5824_v60 = vld [vmem:[#allocation10 + $0x480] sm:$0xf] }
  0x9c   :  { %2090 = vmatpush.bf16.msrb.mxu0 %v5693_v61  ;;  %2103 = vmatpush.bf16.msrb.mxu1 %v5789_v2  ;;  %v7439_v61 = vld [vmem:[#allocation10 + $0x488] sm:$0xf0]  ;;  %v8258_v2 = vld [vmem:[#allocation8] sm:$0xff] }
  0x9d   :  { %v5825_v62 = vor.u32 %v7439_v61, %v5824_v60  ;;  %v276_v3 = vperm.slane %v8258_v2, 0  ;;  %v277_v4 = vperm.slane %v8258_v2, 1  ;;  %v278_v15 = vperm.slane %v8258_v2, 2  ;;  %v7330_v60 = vld [vmem:[#allocation10 + $0x124] sm:$0xf] }
  0x9e   :  { %2116 = vmatpush.bf16.msrb.mxu2 %v5885_v8  ;;  %2129 = vmatpush.bf16.msrb.mxu3 %v5981_v10  ;;  %v5334_v10 = vld [vmem:[#allocation10 + $0xb4] sm:$0xf0]  ;;  %v279_v17 = vperm.slane %v8258_v2, 3  ;;  %v5394_v61 = vld [vmem:[#allocation10 + $0x12c] sm:$0xf0] }
  0xa0   :  { %2091 = vmatpush.bf16.msrb.mxu0 %v5681_v9  ;;  %2104 = vmatpush.bf16.msrb.mxu1 %v5777_v14  ;;  %v7315_v9 = vld [vmem:[#allocation10 + $0xac] sm:$0xf] }
  0xa1   :  { %v5337_v18 = vor.u32 %v7315_v9, %v5334_v10  ;;  %v5286_v9 = vld [vmem:[#allocation10 + $0x54] sm:$0xf0]  ;;  %v7327_v10 = vld [vmem:[#allocation10 + $0x10c] sm:$0xf] }
  0xa2   :  { %2117 = vmatpush.bf16.msrb.mxu2 %v5873_v20  ;;  %2130 = vmatpush.bf16.msrb.mxu3 %v5969_v22  ;;  %v7312_v22 = vld [vmem:[#allocation10 + $0x94] sm:$0xf] }
  0xa4   :  { %2092 = vmatpush.bf16.msrb.mxu0 %v5669_v21  ;;  %2105 = vmatpush.bf16.msrb.mxu1 %v5765_v23  ;;  %v5433_v21 = vor.u32 %v7339_v11, %v5430_v13  ;;  %v5322_v23 = vld [vmem:[#allocation10 + $0x9c] sm:$0xf0]  ;;  %v5382_v11 = vld [vmem:[#allocation10 + $0x114] sm:$0xf0] }
  0xa5   :  { %v5325_v36 = vor.u32 %v7312_v22, %v5322_v23  ;;  %v5274_v22 = vld [vmem:[#allocation10 + $0x3c] sm:$0xf0]  ;;  %v7324_v23 = vld [vmem:[#allocation10 + $0xf4] sm:$0xf] }
  0xa6   :  { %2118 = vmatpush.bf16.msrb.mxu2 %v5861_v33  ;;  %2131 = vmatpush.bf16.msrb.mxu3 %v5957_v35  ;;  %v7387_v33 = vld [vmem:[#allocation10 + $0x2ec] sm:$0xf] }
  0xa7   :  { %v5625_v48 = vor.u32 %v7387_v33, %v5622_v37  ;;  %v281_v37 = vperm.slane %v8258_v2, 5 }
  0xa8   :  { %2093 = vmatpush.bf16.msrb.mxu0 %v5657_v28  ;;  %2106 = vmatpush.bf16.msrb.mxu1 %v5753_v29 }
  0xaa   :  { %2119 = vmatpush.bf16.msrb.mxu2 %v5849_v44  ;;  %2132 = vmatpush.bf16.msrb.mxu3 %v5945_v46 }
  0xac   :  { %2094 = vmatpush.bf16.msrb.mxu0 %v5645_v39  ;;  %2107 = vmatpush.bf16.msrb.mxu1 %v5741_v41  ;;  %v5310_v39 = vld [vmem:[#allocation10 + $0x84] sm:$0xf0]  ;;  %v5421_v41 = vor.u32 %v7336_v26, %v5418_v27  ;;  %v280_v27 = vperm.slane %v8258_v2, 4 }
  0xad   :  { %v5313_v49 = vor.u32 %v7309_v38, %v5310_v39  ;;  %v7321_v38 = vld [vmem:[#allocation10 + $0xdc] sm:$0xf]  ;;  %v5358_v39 = vld [vmem:[#allocation10 + $0xe4] sm:$0xf0] }
  0xae   :  { %2120 = vmatpush.bf16.msrb.mxu2 %v5837_v57  ;;  %2133 = vmatpush.bf16.msrb.mxu3 %v5933_v59  ;;  %v7306_v57 = vld [vmem:[#allocation10 + $0x64] sm:$0xf] }
  0xb0   :  { %2095 = vmatpush.bf16.msrb.mxu0 %v5633_v51  ;;  %2108 = vmatpush.bf16.msrb.mxu1 %v5729_v53  ;;  %v7360_v51 = vld [vmem:[#allocation10 + $0x214] sm:$0xf] }
  0xb1   :  { %v7384_v53 = vld [vmem:[#allocation10 + $0x2d4] sm:$0xf]  ;;  %v5517_v63 = vor.u32 %v7360_v51, %v5514_v52 }
  0xb2   :  { %2121 = vmatpush.bf16.msrb.mxu2 %v5825_v62  ;;  %2134 = vmatpush.bf16.msrb.mxu3 %v5921_v1  ;;  %v5613_v0 = vor.u32 %v7384_v53, %v5610_v56  ;;  %v5301_v1 = vor.u32 %v7306_v57, %v5298_v58  ;;  %v5361_v53 = vor.u32 %v7321_v38, %v5358_v39  ;;  %v5346_v56 = vld [vmem:[#allocation10 + $0xcc] sm:$0xf0]  ;;  %v7411_v57 = vld [vmem:[#allocation10 + $0x3ac] sm:$0xf] }
  0xd0   :  { %v621_v5 = vpop.f32.mrf.mxu0  ;;  %v634_v7 = vpop.f32.mrf.mxu1 }
  0xd1   :  { %v622_v6 = vadd.f32 %v621_v5, %v276_v3  ;;  %v635_v8 = vadd.f32 %v634_v7, %v277_v4  ;;  %v7357_v3 = vld [vmem:[#allocation10 + $0x1fc] sm:$0xf]  ;;  %v5502_v4 = vld [vmem:[#allocation10 + $0x204] sm:$0xf0] }
  0xd2   :  { %v7381_v5 = vld [vmem:[#allocation10 + $0x2bc] sm:$0xf]  ;;  %v5598_v7 = vld [vmem:[#allocation10 + $0x2c4] sm:$0xf0] }
  0xd3   :  { %vm716_vm0 = vcmp.gt.f32.partialorder %v622_v6, 0.0  ;;  %v724_v12 = vmul.f32 0.01, %v622_v6  ;;  %vm717_vm1 = vcmp.gt.f32.partialorder %v635_v8, 0.0  ;;  %v725_v14 = vmul.f32 0.01, %v635_v8 }
  0xd4   :  { %v5601_v13 = vor.u32 %v7381_v5, %v5598_v7 }
  0xd5   :  { %v732_v16 = vsel %vm716_vm0, %v622_v6, %v724_v12  ;;  %v733_v20 = vsel %vm717_vm1, %v635_v8, %v725_v14  ;;  %v5397_v6 = vor.u32 %v7330_v60, %v5394_v61  ;;  %v7303_v8 = vld [vmem:[#allocation10 + $0x4c] sm:$0xf]  ;;  %v5505_v12 = vor.u32 %v7357_v3, %v5502_v4  ;;  %v5814_v61 = vld [vmem:[#allocation10 + $0x474] sm:$0xf0] }
  0xd6   :  { %v8264_v19 = vpack.c.bf16 %v732_v16, %v732_v16  ;;  %v8266_v24 = vpack.c.bf16 %v733_v20, %v733_v20  ;;  %v5289_v14 = vor.u32 %v7303_v8, %v5286_v9  ;;  %v5490_v16 = vld [vmem:[#allocation10 + $0x1ec] sm:$0xf0]  ;;  %v7435_v60 = vld [vmem:[#allocation10 + $0x46c] sm:$0xf]  ;;  %v282_v4 = vperm.slane %v8258_v2, 6 }
  0xd7   :  { %v5586_v20 = vld [vmem:[#allocation10 + $0x2ac] sm:$0xf0]  ;;  %v283_v8 = vperm.slane %v8258_v2, 7 }
  0xd8   :  { %v660_v29 = vpop.f32.mrf.mxu3  ;;  %v623_v30 = vpop.f32.mrf.mxu0  ;;  %2044 = vmatmul.bf16.vlgmr.msra.gmra.mxu0 %v8264_v19  ;;  %2057 = vmatmul.bf16.vlgmr.msra.gmra.mxu1 %v8266_v24 }
  0xd9   :  { %v647_v25 = vpop.f32.mrf.mxu2  ;;  %v661_v34 = vadd.f32 %v660_v29, %v279_v17  ;;  %2140 = vmatpush.bf16.msra.mxu0 %v5337_v18  ;;  %v636_v35 = vpop.f32.mrf.mxu1  ;;  %2153 = vmatpush.bf16.msra.mxu1 %v5433_v21  ;;  %v7378_v17 = vld [vmem:[#allocation10 + $0x2a4] sm:$0xf]  ;;  %v5385_v18 = vor.u32 %v7327_v10, %v5382_v11  ;;  %v7300_v21 = vld [vmem:[#allocation10 + $0x34] sm:$0xf]  ;;  %v7351_v30 = vld [vmem:[#allocation10 + $0x1cc] sm:$0xf] }
  0xda   :  { %v648_v28 = vadd.f32 %v647_v25, %v278_v15  ;;  %v7354_v15 = vld [vmem:[#allocation10 + $0x1e4] sm:$0xf]  ;;  %v5370_v25 = vld [vmem:[#allocation10 + $0xfc] sm:$0xf0]  ;;  %v5277_v29 = vor.u32 %v7300_v21, %v5274_v22  ;;  %v7297_v35 = vld [vmem:[#allocation10 + $0x1c] sm:$0xf]  ;;  %v5817_v21 = vor.u32 %v7435_v60, %v5814_v61 }
  0xdb   :  { %vm719_vm3 = vcmp.gt.f32.partialorder %v661_v34, 0.0  ;;  %v727_v42 = vmul.f32 0.01, %v661_v34  ;;  %v5493_v26 = vor.u32 %v7354_v15, %v5490_v16  ;;  %v5373_v33 = vor.u32 %v7324_v23, %v5370_v25  ;;  %v7369_v10 = vld [vmem:[#allocation10 + $0x25c] sm:$0xf] }
  0xdc   :  { %vm718_vm2 = vcmp.gt.f32.partialorder %v648_v28, 0.0  ;;  %v726_v40 = vmul.f32 0.01, %v648_v28  ;;  %v5550_v11 = vld [vmem:[#allocation10 + $0x264] sm:$0xf0] }
  0xdd   :  { %v735_v47 = vsel %vm719_vm3, %v661_v34, %v727_v42  ;;  %2141 = vmatpush.bf16.msra.mxu0 %v5325_v36  ;;  %2154 = vmatpush.bf16.msra.mxu1 %v5421_v41  ;;  %v5574_v34 = vld [vmem:[#allocation10 + $0x294] sm:$0xf0]  ;;  %v5262_v36 = vld [vmem:[#allocation10 + $0x24] sm:$0xf0]  ;;  %v7348_v41 = vld [vmem:[#allocation10 + $0x1b4] sm:$0xf] }
  0xde   :  { %v734_v44 = vsel %vm718_vm2, %v648_v28, %v726_v40  ;;  %v8272_v54 = vpack.c.bf16 %v735_v47, %v735_v47  ;;  %v5589_v28 = vor.u32 %v7378_v17, %v5586_v20  ;;  %v5481_v40 = vor.u32 %v7351_v30, %v5478_v31  ;;  %v7372_v42 = vld [vmem:[#allocation10 + $0x274] sm:$0xf]  ;;  %v5562_v47 = vld [vmem:[#allocation10 + $0x27c] sm:$0xf0]  ;;  %v7342_v25 = vld [vmem:[#allocation10 + $0x184] sm:$0xf] }
  0xdf   :  { %v8270_v46 = vpack.c.bf16 %v734_v44, %v734_v44  ;;  %v5577_v44 = vor.u32 %v7375_v32, %v5574_v34  ;;  %v7408_v15 = vld [vmem:[#allocation10 + $0x394] sm:$0xf]  ;;  %v5706_v16 = vld [vmem:[#allocation10 + $0x39c] sm:$0xf0]  ;;  %v7366_v30 = vld [vmem:[#allocation10 + $0x244] sm:$0xf] }
  0xe0   :  { %v662_v62 = vpop.f32.mrf.mxu3  ;;  %2083 = vmatmul.bf16.vlgmr.msra.gmra.mxu3 %v8272_v54  ;;  %v7432_v17 = vld [vmem:[#allocation10 + $0x454] sm:$0xf]  ;;  %v5802_v23 = vld [vmem:[#allocation10 + $0x45c] sm:$0xf0]  ;;  %v5538_v31 = vld [vmem:[#allocation10 + $0x24c] sm:$0xf0]  ;;  %v5709_v39 = vor.u32 %v7408_v15, %v5706_v16 }
  0xe1   :  { %v649_v59 = vpop.f32.mrf.mxu2  ;;  %2070 = vmatmul.bf16.vlgmr.msra.gmra.mxu2 %v8270_v46  ;;  %2179 = vmatpush.bf16.msra.mxu3 %v5625_v48  ;;  %v7294_v48 = vld [vmem:[#allocation10 + $0x4] sm:$0xf]  ;;  %v7459_v32 = vld [vmem:[#allocation10 + $0x52c] sm:$0xf]  ;;  %v5670_v15 = vld [vmem:[#allocation10 + $0x354] sm:$0xf0] }
  0xe2   :  { %2166 = vmatpush.bf16.msra.mxu2 %v5529_v45  ;;  %2142 = vmatpush.bf16.msra.mxu0 %v5313_v49  ;;  %v5265_v45 = vor.u32 %v7297_v35, %v5262_v36  ;;  %v5250_v49 = vld [vmem:[#allocation10 + $0xc] sm:$0xf0]  ;;  %v5718_v59 = vld [vmem:[#allocation10 + $0x3b4] sm:$0xf0]  ;;  %v7483_v36 = vld [vmem:[#allocation10 + $0x5ec] sm:$0xf] }
  0xe3   :  { %2155 = vmatpush.bf16.msra.mxu1 %v5409_v55  ;;  %v7318_v55 = vld [vmem:[#allocation10 + $0xc4] sm:$0xf]  ;;  %v5253_v5 = vor.u32 %v7294_v48, %v5250_v49  ;;  %v5910_v35 = vld [vmem:[#allocation10 + $0x534] sm:$0xf0]  ;;  %v5790_v48 = vld [vmem:[#allocation10 + $0x444] sm:$0xf0] }
  0xe4   :  { %v5349_v9 = vor.u32 %v7318_v55, %v5346_v56  ;;  %v7423_v16 = vld [vmem:[#allocation10 + $0x40c] sm:$0xf] }
  0xe5   :  { %2180 = vmatpush.bf16.msra.mxu3 %v5613_v0  ;;  %v5565_v0 = vor.u32 %v7372_v42, %v5562_v47  ;;  %v7429_v47 = vld [vmem:[#allocation10 + $0x43c] sm:$0xf] }
  0xe6   :  { %2167 = vmatpush.bf16.msra.mxu2 %v5517_v63  ;;  %2143 = vmatpush.bf16.msra.mxu0 %v5301_v1  ;;  %v5469_v63 = vor.u32 %v7348_v41, %v5466_v50  ;;  %v7345_v1 = vld [vmem:[#allocation10 + $0x19c] sm:$0xf]  ;;  %v5805_v50 = vor.u32 %v7432_v17, %v5802_v23  ;;  %v5793_v61 = vor.u32 %v7429_v47, %v5790_v48  ;;  %v5766_v17 = vld [vmem:[#allocation10 + $0x414] sm:$0xf0]  ;;  %v5874_v23 = vld [vmem:[#allocation10 + $0x4ec] sm:$0xf0] }
  0xe7   :  { %2156 = vmatpush.bf16.msra.mxu1 %v5397_v6  ;;  %v5454_v6 = vld [vmem:[#allocation10 + $0x1a4] sm:$0xf0]  ;;  %v5850_v47 = vld [vmem:[#allocation10 + $0x4bc] sm:$0xf0]  ;;  %v7468_v48 = vld [vmem:[#allocation10 + $0x574] sm:$0xf] }
  0xe8   :  { %v5457_v22 = vor.u32 %v7345_v1, %v5454_v6 }
  0xe9   :  { %2181 = vmatpush.bf16.msra.mxu3 %v5601_v13 }
  0xea   :  { %2168 = vmatpush.bf16.msra.mxu2 %v5505_v12  ;;  %2144 = vmatpush.bf16.msra.mxu0 %v5289_v14  ;;  %v5721_v14 = vor.u32 %v7411_v57, %v5718_v59  ;;  %v7456_v57 = vld [vmem:[#allocation10 + $0x514] sm:$0xf] }
  0xeb   :  { %2157 = vmatpush.bf16.msra.mxu1 %v5385_v18  ;;  %v7480_v59 = vld [vmem:[#allocation10 + $0x5d4] sm:$0xf] }
  0xed   :  { %2182 = vmatpush.bf16.msra.mxu3 %v5589_v28 }
  0xee   :  { %2169 = vmatpush.bf16.msra.mxu2 %v5493_v26  ;;  %2145 = vmatpush.bf16.msra.mxu0 %v5277_v29  ;;  %v5442_v26 = vld [vmem:[#allocation10 + $0x18c] sm:$0xf0]  ;;  %v5553_v29 = vor.u32 %v7369_v10, %v5550_v11  ;;  %v7477_v11 = vld [vmem:[#allocation10 + $0x5bc] sm:$0xf] }
  0xef   :  { %2158 = vmatpush.bf16.msra.mxu1 %v5373_v33  ;;  %v5445_v42 = vor.u32 %v7342_v25, %v5442_v26  ;;  %v5769_v26 = vor.u32 %v7423_v16, %v5766_v17  ;;  %v7338_v16 = vld [vmem:[#allocation10 + $0x160] sm:$0xf0] }
  0xf0   :  { %v673_v43 = vpop.f32.mrf.mxu0  ;;  %v686_v52 = vpop.f32.mrf.mxu1 }
  0xf1   :  { %v674_v51 = vadd.f32 %v673_v43, %v280_v27  ;;  %v687_v58 = vadd.f32 %v686_v52, %v281_v37  ;;  %2183 = vmatpush.bf16.msra.mxu3 %v5577_v44  ;;  %v6006_v37 = vld [vmem:[#allocation10 + $0x5f4] sm:$0xf0]  ;;  %v5694_v43 = vld [vmem:[#allocation10 + $0x384] sm:$0xf0]  ;;  %v5913_v52 = vor.u32 %v7459_v32, %v5910_v35 }
  0xf2   :  { %2170 = vmatpush.bf16.msra.mxu2 %v5481_v40  ;;  %2146 = vmatpush.bf16.msra.mxu0 %v5265_v45  ;;  %v7405_v40 = vld [vmem:[#allocation10 + $0x37c] sm:$0xf]  ;;  %v5541_v45 = vor.u32 %v7366_v30, %v5538_v31  ;;  %v6009_v55 = vor.u32 %v7483_v36, %v6006_v37  ;;  %v7420_v30 = vld [vmem:[#allocation10 + $0x3f4] sm:$0xf]  ;;  %v5754_v31 = vld [vmem:[#allocation10 + $0x3fc] sm:$0xf0] }
  0xf3   :  { %vm720_vm4 = vcmp.gt.f32.partialorder %v674_v51, 0.0  ;;  %v728_v62 = vmul.f32 0.01, %v674_v51  ;;  %vm721_vm5 = vcmp.gt.f32.partialorder %v687_v58, 0.0  ;;  %v729_v3 = vmul.f32 0.01, %v687_v58  ;;  %2159 = vmatpush.bf16.msra.mxu1 %v5361_v53 }
  0xf4   :  { %v5697_v56 = vor.u32 %v7405_v40, %v5694_v43  ;;  %v5862_v35 = vld [vmem:[#allocation10 + $0x4d4] sm:$0xf0]  ;;  %v5757_v37 = vor.u32 %v7420_v30, %v5754_v31  ;;  %v7393_v40 = vld [vmem:[#allocation10 + $0x31c] sm:$0xf]  ;;  %v5316_v30 = vld [vmem:[#allocation10 + $0x80] sm:$0xf] }
  0xf5   :  { %v736_v7 = vsel %vm720_vm4, %v674_v51, %v728_v62  ;;  %v737_v13 = vsel %vm721_vm5, %v687_v58, %v729_v3  ;;  %2184 = vmatpush.bf16.msra.mxu3 %v5565_v0  ;;  %v5898_v58 = vld [vmem:[#allocation10 + $0x51c] sm:$0xf0]  ;;  %v5682_v0 = vld [vmem:[#allocation10 + $0x36c] sm:$0xf0]  ;;  %v7426_v3 = vld [vmem:[#allocation10 + $0x424] sm:$0xf] }
  0xf6   :  { %v8280_v12 = vpack.c.bf16 %v736_v7, %v736_v7  ;;  %v8282_v18 = vpack.c.bf16 %v737_v13, %v737_v13  ;;  %2171 = vmatpush.bf16.msra.mxu2 %v5469_v63  ;;  %2147 = vmatpush.bf16.msra.mxu0 %v5253_v5  ;;  %v5994_v62 = vld [vmem:[#allocation10 + $0x5dc] sm:$0xf0]  ;;  %v7402_v63 = vld [vmem:[#allocation10 + $0x364] sm:$0xf]  ;;  %v5901_v5 = vor.u32 %v7456_v57, %v5898_v58  ;;  %v5982_v13 = vld [vmem:[#allocation10 + $0x5c4] sm:$0xf0] }
  0xf7   :  { %2160 = vmatpush.bf16.msra.mxu1 %v5349_v9  ;;  %v5997_v6 = vor.u32 %v7480_v59, %v5994_v62  ;;  %v5685_v7 = vor.u32 %v7402_v63, %v5682_v0  ;;  %v5886_v9 = vld [vmem:[#allocation10 + $0x504] sm:$0xf0]  ;;  %v5634_v57 = vld [vmem:[#allocation10 + $0x30c] sm:$0xf0]  ;;  %v7414_v58 = vld [vmem:[#allocation10 + $0x3c4] sm:$0xf] }
  0xf8   :  { %v699_v20 = vpop.f32.mrf.mxu2  ;;  %v712_v27 = vpop.f32.mrf.mxu3  ;;  %2096 = vmatmul.bf16.vlgmr.msrb.gmra.mxu0 %v8280_v12  ;;  %2109 = vmatmul.bf16.vlgmr.msrb.gmra.mxu1 %v8282_v18  ;;  %v5730_v59 = vld [vmem:[#allocation10 + $0x3cc] sm:$0xf0]  ;;  %v7317_v62 = vld [vmem:[#allocation10 + $0xb8] sm:$0xf0] }
  0xf9   :  { %v700_v2 = vadd.f32 %v699_v20, %v282_v4  ;;  %v675_v28 = vpop.f32.mrf.mxu0  ;;  %v713_v33 = vadd.f32 %v712_v27, %v283_v8  ;;  %v688_v34 = vpop.f32.mrf.mxu1  ;;  %2185 = vmatpush.bf16.msra.mxu3 %v5553_v29  ;;  %v5778_v4 = vld [vmem:[#allocation10 + $0x42c] sm:$0xf0]  ;;  %v7453_v8 = vld [vmem:[#allocation10 + $0x4fc] sm:$0xf]  ;;  %v5658_v29 = vld [vmem:[#allocation10 + $0x33c] sm:$0xf0] }
  0xfa   :  { %2192 = vmatpush.bf16.msrb.mxu0 %v5721_v14  ;;  %2172 = vmatpush.bf16.msra.mxu2 %v5457_v22  ;;  %v5781_v10 = vor.u32 %v7426_v3, %v5778_v4  ;;  %v7399_v14 = vld [vmem:[#allocation10 + $0x34c] sm:$0xf]  ;;  %v5889_v20 = vor.u32 %v7453_v8, %v5886_v9  ;;  %v7450_v22 = vld [vmem:[#allocation10 + $0x4e4] sm:$0xf]  ;;  %v5970_v27 = vld [vmem:[#allocation10 + $0x5ac] sm:$0xf0] }
  0xfb   :  { %vm722_vm6 = vcmp.gt.f32.partialorder %v700_v2, 0.0  ;;  %v730_v38 = vmul.f32 0.01, %v700_v2  ;;  %vm723_vm7 = vcmp.gt.f32.partialorder %v713_v33, 0.0  ;;  %v731_v41 = vmul.f32 0.01, %v713_v33  ;;  %2205 = vmatpush.bf16.msrb.mxu1 %v5817_v21 }
  0xfc   :  { %v5985_v21 = vor.u32 %v7477_v11, %v5982_v13  ;;  %v5673_v25 = vor.u32 %v7399_v14, %v5670_v15  ;;  %v7396_v28 = vld [vmem:[#allocation10 + $0x334] sm:$0xf]  ;;  %v5877_v32 = vor.u32 %v7450_v22, %v5874_v23  ;;  %v7447_v34 = vld [vmem:[#allocation10 + $0x4cc] sm:$0xf]  ;;  %v5436_v63 = vld [vmem:[#allocation10 + $0x170] sm:$0xf] }
  0xfd   :  { %v738_v44 = vsel %vm722_vm6, %v700_v2, %v730_v38  ;;  %v739_v51 = vsel %vm723_vm7, %v713_v33, %v731_v41  ;;  %2186 = vmatpush.bf16.msra.mxu3 %v5541_v45  ;;  %v7474_v2 = vld [vmem:[#allocation10 + $0x5a4] sm:$0xf]  ;;  %v5661_v36 = vor.u32 %v7396_v28, %v5658_v29  ;;  %v7471_v38 = vld [vmem:[#allocation10 + $0x58c] sm:$0xf]  ;;  %v5646_v41 = vld [vmem:[#allocation10 + $0x324] sm:$0xf0]  ;;  %v5865_v43 = vor.u32 %v7447_v34, %v5862_v35 }
  0xfe   :  { %v8286_v49 = vpack.c.bf16 %v738_v44, %v738_v44  ;;  %v8288_v53 = vpack.c.bf16 %v739_v51, %v739_v51  ;;  %2193 = vmatpush.bf16.msrb.mxu0 %v5709_v39  ;;  %2173 = vmatpush.bf16.msra.mxu2 %v5445_v42  ;;  %v5973_v33 = vor.u32 %v7474_v2, %v5970_v27  ;;  %v5958_v39 = vld [vmem:[#allocation10 + $0x594] sm:$0xf0]  ;;  %v5742_v42 = vld [vmem:[#allocation10 + $0x3e4] sm:$0xf0]  ;;  %v7444_v45 = vld [vmem:[#allocation10 + $0x4b4] sm:$0xf] }
  0xff   :  { %2206 = vmatpush.bf16.msrb.mxu1 %v5805_v50  ;;  %v7417_v50 = vld [vmem:[#allocation10 + $0x3dc] sm:$0xf]  ;;  %v5961_v44 = vor.u32 %v7471_v38, %v5958_v39  ;;  %v5649_v51 = vor.u32 %v7393_v40, %v5646_v41  ;;  %v5838_v4 = vld [vmem:[#allocation10 + $0x4a4] sm:$0xf0]  ;;  %v5328_v11 = vld [vmem:[#allocation10 + $0x98] sm:$0xf] }
 0x100   :  { %v701_v60 = vpop.f32.mrf.mxu2  ;;  %v714_v1 = vpop.f32.mrf.mxu3  ;;  %2122 = vmatmul.bf16.vlgmr.msrb.gmra.mxu2 %v8286_v49  ;;  %2135 = vmatmul.bf16.vlgmr.msrb.gmra.mxu3 %v8288_v53  ;;  %v7341_v0 = vld [vmem:[#allocation10 + $0x178] sm:$0xf0]  ;;  %v5934_v8 = vld [vmem:[#allocation10 + $0x564] sm:$0xf0]  ;;  %v7314_v14 = vld [vmem:[#allocation10 + $0xa0] sm:$0xf0] }
 0x101   :  { %2231 = vmatpush.bf16.msrb.mxu3 %v6009_v55  ;;  %v5946_v55 = vld [vmem:[#allocation10 + $0x57c] sm:$0xf0]  ;;  %v5340_v60 = vld [vmem:[#allocation10 + $0xb0] sm:$0xf]  ;;  %v7441_v3 = vld [vmem:[#allocation10 + $0x49c] sm:$0xf]  ;;  %v5329_v2 = vor.u32 %v7314_v14, %v5328_v11 }
 0x102   :  { %2218 = vmatpush.bf16.msrb.mxu2 %v5913_v52  ;;  %2194 = vmatpush.bf16.msrb.mxu0 %v5697_v56  ;;  %v5745_v52 = vor.u32 %v7417_v50, %v5742_v42  ;;  %v7390_v56 = vld [vmem:[#allocation10 + $0x304] sm:$0xf]  ;;  %v5949_v1 = vor.u32 %v7468_v48, %v5946_v55  ;;  %v5341_v9 = vor.u32 %v7317_v62, %v5340_v60  ;;  %v5424_v15 = vld [vmem:[#allocation10 + $0x158] sm:$0xf]  ;;  %v5922_v23 = vld [vmem:[#allocation10 + $0x54c] sm:$0xf0] }
 0x103   :  { %2207 = vmatpush.bf16.msrb.mxu1 %v5793_v61  ;;  %v5853_v61 = vor.u32 %v7444_v45, %v5850_v47  ;;  %v5841_v13 = vor.u32 %v7441_v3, %v5838_v4  ;;  %v7462_v22 = vld [vmem:[#allocation10 + $0x544] sm:$0xf]  ;;  %v5425_v27 = vor.u32 %v7338_v16, %v5424_v15  ;;  %v5628_v28 = vld [vmem:[#allocation10 + $0x2f0] sm:$0xf]  ;;  %v7389_v29 = vld [vmem:[#allocation10 + $0x2f8] sm:$0xf0] }
 0x104   :  { %v7335_v34 = vld [vmem:[#allocation10 + $0x148] sm:$0xf0]  ;;  %v5925_v35 = vor.u32 %v7462_v22, %v5922_v23  ;;  %v5520_v38 = vld [vmem:[#allocation10 + $0x218] sm:$0xf]  ;;  %v7362_v39 = vld [vmem:[#allocation10 + $0x220] sm:$0xf0] }
 0x105   :  { %2232 = vmatpush.bf16.msrb.mxu3 %v5997_v6  ;;  %v5733_v6 = vor.u32 %v7414_v58, %v5730_v59  ;;  %v5616_v50 = vld [vmem:[#allocation10 + $0x2d8] sm:$0xf]  ;;  %v7386_v42 = vld [vmem:[#allocation10 + $0x2e0] sm:$0xf0]  ;;  %v5400_v45 = vld [vmem:[#allocation10 + $0x128] sm:$0xf]  ;;  %v5521_v48 = vor.u32 %v7362_v39, %v5520_v38 }
 0x106   :  { %2219 = vmatpush.bf16.msrb.mxu2 %v5901_v5  ;;  %2195 = vmatpush.bf16.msrb.mxu0 %v5685_v7  ;;  %v5637_v5 = vor.u32 %v7390_v56, %v5634_v57  ;;  %v7465_v7 = vld [vmem:[#allocation10 + $0x55c] sm:$0xf]  ;;  %v7332_v47 = vld [vmem:[#allocation10 + $0x130] sm:$0xf0]  ;;  %v7359_v55 = vld [vmem:[#allocation10 + $0x208] sm:$0xf0] }
 0x107   :  { %2208 = vmatpush.bf16.msrb.mxu1 %v5781_v10  ;;  %v5437_v10 = vor.u32 %v7341_v0, %v5436_v63  ;;  %v5937_v17 = vor.u32 %v7465_v7, %v5934_v8  ;;  %v5401_v57 = vor.u32 %v7332_v47, %v5400_v45  ;;  %v5604_v58 = vld [vmem:[#allocation10 + $0x2c0] sm:$0xf]  ;;  %v7383_v59 = vld [vmem:[#allocation10 + $0x2c8] sm:$0xf0]  ;;  %v5292_v60 = vld [vmem:[#allocation10 + $0x50] sm:$0xf] }
 0x108   :  { %2148 = vmatmul.bf16.vlgmr.msra.gmra.mxu0 %v8264_v19  ;;  %2161 = vmatmul.bf16.vlgmr.msra.gmra.mxu1 %v8266_v24  ;;  %v5388_v62 = vld [vmem:[#allocation10 + $0x110] sm:$0xf]  ;;  %v7329_v63 = vld [vmem:[#allocation10 + $0x118] sm:$0xf0]  ;;  %v5496_v3 = vld [vmem:[#allocation10 + $0x1e8] sm:$0xf] }
 0x109   :  { %2233 = vmatpush.bf16.msrb.mxu3 %v5985_v21  ;;  %v5826_v21 = vld [vmem:[#allocation10 + $0x48c] sm:$0xf0]  ;;  %v7356_v4 = vld [vmem:[#allocation10 + $0x1f0] sm:$0xf0]  ;;  %v5592_v7 = vld [vmem:[#allocation10 + $0x2a8] sm:$0xf] }
 0x10a   :  { %2220 = vmatpush.bf16.msrb.mxu2 %v5889_v20  ;;  %2196 = vmatpush.bf16.msrb.mxu0 %v5673_v25  ;;  %v7438_v20 = vld [vmem:[#allocation10 + $0x484] sm:$0xf]  ;;  %v5532_v25 = vld [vmem:[#allocation10 + $0x230] sm:$0xf]  ;;  %v7380_v8 = vld [vmem:[#allocation10 + $0x2b0] sm:$0xf0]  ;;  %v5497_v14 = vor.u32 %v7356_v4, %v5496_v3 }
 0x10b   :  { %2209 = vmatpush.bf16.msrb.mxu1 %v5769_v26  ;;  %v7365_v26 = vld [vmem:[#allocation10 + $0x238] sm:$0xf0]  ;;  %v5829_v31 = vor.u32 %v7438_v20, %v5826_v21  ;;  %v5376_v11 = vld [vmem:[#allocation10 + $0xf8] sm:$0xf]  ;;  %v5593_v15 = vor.u32 %v7380_v8, %v5592_v7  ;;  %v5484_v16 = vld [vmem:[#allocation10 + $0x1d0] sm:$0xf] }
 0x10c   :  { %v5580_v22 = vld [vmem:[#allocation10 + $0x290] sm:$0xf]  ;;  %v7377_v23 = vld [vmem:[#allocation10 + $0x298] sm:$0xf0]  ;;  %v5352_v38 = vld [vmem:[#allocation10 + $0xc8] sm:$0xf] }
 0x10d   :  { %2234 = vmatpush.bf16.msrb.mxu3 %v5973_v33  ;;  %v5412_v33 = vld [vmem:[#allocation10 + $0x140] sm:$0xf]  ;;  %v7320_v39 = vld [vmem:[#allocation10 + $0xd0] sm:$0xf0]  ;;  %v7347_v47 = vld [vmem:[#allocation10 + $0x1a8] sm:$0xf0] }
 0x10e   :  { %2221 = vmatpush.bf16.msrb.mxu2 %v5877_v32  ;;  %2197 = vmatpush.bf16.msrb.mxu0 %v5661_v36  ;;  %v7311_v32 = vld [vmem:[#allocation10 + $0x88] sm:$0xf0]  ;;  %v5533_v36 = vor.u32 %v7365_v26, %v5532_v25  ;;  %v5413_v41 = vor.u32 %v7335_v34, %v5412_v33  ;;  %v5268_v25 = vld [vmem:[#allocation10 + $0x20] sm:$0xf]  ;;  %v5544_v3 = vld [vmem:[#allocation10 + $0x248] sm:$0xf] }
 0x10f   :  { %2210 = vmatpush.bf16.msrb.mxu1 %v5757_v37  ;;  %v5629_v37 = vor.u32 %v7389_v29, %v5628_v28  ;;  %v5317_v40 = vor.u32 %v7311_v32, %v5316_v30  ;;  %v7299_v26 = vld [vmem:[#allocation10 + $0x28] sm:$0xf0]  ;;  %v5581_v29 = vor.u32 %v7377_v23, %v5580_v22  ;;  %v5472_v30 = vld [vmem:[#allocation10 + $0x1b8] sm:$0xf]  ;;  %v5460_v45 = vld [vmem:[#allocation10 + $0x1a0] sm:$0xf] }
 0x110   :  { %2174 = vmatmul.bf16.vlgmr.msra.gmra.mxu2 %v8270_v46  ;;  %2187 = vmatmul.bf16.vlgmr.msra.gmra.mxu3 %v8272_v54  ;;  %v5568_v32 = vld [vmem:[#allocation10 + $0x278] sm:$0xf]  ;;  %v5269_v33 = vor.u32 %v7299_v26, %v5268_v25  ;;  %v7368_v4 = vld [vmem:[#allocation10 + $0x250] sm:$0xf0]  ;;  %v7458_v23 = vld [vmem:[#allocation10 + $0x520] sm:$0xf0] }
 0x111   :  { %2235 = vmatpush.bf16.msrb.mxu3 %v5961_v44  ;;  %v7308_v44 = vld [vmem:[#allocation10 + $0x70] sm:$0xf0]  ;;  %v5904_v22 = vld [vmem:[#allocation10 + $0x518] sm:$0xf] }
 0x112   :  { %2222 = vmatpush.bf16.msrb.mxu2 %v5865_v43  ;;  %2198 = vmatpush.bf16.msrb.mxu0 %v5649_v51  ;;  %v5304_v43 = vld [vmem:[#allocation10 + $0x68] sm:$0xf]  ;;  %v5617_v51 = vor.u32 %v7386_v42, %v5616_v50  ;;  %v7413_v50 = vld [vmem:[#allocation10 + $0x3b8] sm:$0xf0]  ;;  %v5820_v42 = vld [vmem:[#allocation10 + $0x470] sm:$0xf] }
 0x113   :  { %2211 = vmatpush.bf16.msrb.mxu1 %v5745_v52  ;;  %v5508_v52 = vld [vmem:[#allocation10 + $0x200] sm:$0xf]  ;;  %v5305_v56 = vor.u32 %v7308_v44, %v5304_v43  ;;  %v7437_v43 = vld [vmem:[#allocation10 + $0x478] sm:$0xf0]  ;;  %v6000_v26 = vld [vmem:[#allocation10 + $0x5d8] sm:$0xf] }
 0x114   :  { %v5509_v0 = vor.u32 %v7359_v55, %v5508_v52  ;;  %v5556_v52 = vld [vmem:[#allocation10 + $0x260] sm:$0xf]  ;;  %v7371_v55 = vld [vmem:[#allocation10 + $0x268] sm:$0xf0] }
 0x115   :  { %2236 = vmatpush.bf16.msrb.mxu3 %v5949_v1  ;;  %v5605_v1 = vor.u32 %v7383_v59, %v5604_v58  ;;  %v5712_v58 = vld [vmem:[#allocation10 + $0x398] sm:$0xf]  ;;  %v5461_v59 = vor.u32 %v7347_v47, %v5460_v45  ;;  %v5976_v45 = vld [vmem:[#allocation10 + $0x5a8] sm:$0xf]  ;;  %v7476_v47 = vld [vmem:[#allocation10 + $0x5b0] sm:$0xf0] }
 0x116   :  { %2223 = vmatpush.bf16.msrb.mxu2 %v5853_v61  ;;  %2199 = vmatpush.bf16.msrb.mxu0 %v5637_v5  ;;  %v7305_v61 = vld [vmem:[#allocation10 + $0x58] sm:$0xf0] }
 0x117   :  { %2212 = vmatpush.bf16.msrb.mxu1 %v5733_v6  ;;  %v5293_v5 = vor.u32 %v7305_v61, %v5292_v60  ;;  %v5389_v6 = vor.u32 %v7329_v63, %v5388_v62  ;;  %v7410_v60 = vld [vmem:[#allocation10 + $0x3a0] sm:$0xf0]  ;;  %v5808_v61 = vld [vmem:[#allocation10 + $0x458] sm:$0xf]  ;;  %v5557_v63 = vor.u32 %v7371_v55, %v5556_v52 }
 0x118   :  { %v7434_v62 = vld [vmem:[#allocation10 + $0x460] sm:$0xf0]  ;;  %v5713_v7 = vor.u32 %v7410_v60, %v5712_v58  ;;  %v5760_v55 = vld [vmem:[#allocation10 + $0x3f8] sm:$0xf]  ;;  %v5868_v58 = vld [vmem:[#allocation10 + $0x4d0] sm:$0xf] }
 0x119   :  { %2237 = vmatpush.bf16.msrb.mxu3 %v5937_v17  ;;  %2200 = vmatmul.bf16.vlgmr.msrb.gmra.mxu0 %v8280_v12  ;;  %v7353_v17 = vld [vmem:[#allocation10 + $0x1d8] sm:$0xf0]  ;;  %v5809_v8 = vor.u32 %v7434_v62, %v5808_v61  ;;  %v5964_v61 = vld [vmem:[#allocation10 + $0x590] sm:$0xf] }
 0x11a   :  { %2244 = vmatpush.bf16.msra.mxu0 %v5341_v9  ;;  %2224 = vmatpush.bf16.msrb.mxu2 %v5841_v13  ;;  %v5280_v9 = vld [vmem:[#allocation10 + $0x38] sm:$0xf]  ;;  %v7326_v13 = vld [vmem:[#allocation10 + $0x100] sm:$0xf0]  ;;  %v5485_v28 = vor.u32 %v7353_v17, %v5484_v16  ;;  %v5796_v17 = vld [vmem:[#allocation10 + $0x440] sm:$0xf] }
 0x11b   :  { %2257 = vmatpush.bf16.msra.mxu1 %v5437_v10  ;;  %v7302_v10 = vld [vmem:[#allocation10 + $0x40] sm:$0xf0]  ;;  %v5377_v21 = vor.u32 %v7326_v13, %v5376_v11  ;;  %v5700_v13 = vld [vmem:[#allocation10 + $0x380] sm:$0xf]  ;;  %v7473_v62 = vld [vmem:[#allocation10 + $0x598] sm:$0xf0] }
 0x11c   :  { %2213 = vmatmul.bf16.vlgmr.msrb.gmra.mxu1 %v8282_v18  ;;  %v5281_v20 = vor.u32 %v7302_v10, %v5280_v9  ;;  %v6012_v9 = vld [vmem:[#allocation10 + $0x5f0] sm:$0xf]  ;;  %v7485_v10 = vld [vmem:[#allocation10 + $0x5f8] sm:$0xf0] }
 0x11d   :  { %2238 = vmatpush.bf16.msrb.mxu3 %v5925_v35  ;;  %v7374_v35 = vld [vmem:[#allocation10 + $0x280] sm:$0xf0] }
 0x11e   :  { %2245 = vmatpush.bf16.msra.mxu0 %v5329_v2  ;;  %2225 = vmatpush.bf16.msrb.mxu2 %v5829_v31  ;;  %v5364_v2 = vld [vmem:[#allocation10 + $0xe0] sm:$0xf]  ;;  %v7350_v31 = vld [vmem:[#allocation10 + $0x1c0] sm:$0xf0]  ;;  %v5569_v44 = vor.u32 %v7374_v35, %v5568_v32 }
 0x11f   :  { %2258 = vmatpush.bf16.msra.mxu1 %v5425_v27  ;;  %v7323_v27 = vld [vmem:[#allocation10 + $0xe8] sm:$0xf0]  ;;  %v5988_v35 = vld [vmem:[#allocation10 + $0x5c0] sm:$0xf] }
 0x120   :  { %2239 = vmatmul.bf16.vlgmr.msrb.gmra.mxu3 %v8288_v53  ;;  %v5365_v34 = vor.u32 %v7323_v27, %v5364_v2  ;;  %v7482_v2 = vld [vmem:[#allocation10 + $0x5e0] sm:$0xf0] }
 0x121   :  { %2283 = vmatpush.bf16.msra.mxu3 %v5629_v37  ;;  %2226 = vmatmul.bf16.vlgmr.msrb.gmra.mxu2 %v8286_v49  ;;  %v7296_v37 = vld [vmem:[#allocation10 + $0x10] sm:$0xf0]  ;;  %v6001_v32 = vor.u32 %v7482_v2, %v6000_v26  ;;  %v5940_v26 = vld [vmem:[#allocation10 + $0x560] sm:$0xf]  ;;  %v7467_v2 = vld [vmem:[#allocation10 + $0x568] sm:$0xf0] }
 0x122   :  { %2270 = vmatpush.bf16.msra.mxu2 %v5533_v36  ;;  %2246 = vmatpush.bf16.msra.mxu0 %v5317_v40  ;;  %v5256_v36 = vld [vmem:[#allocation10 + $0x8] sm:$0xf]  ;;  %v5724_v40 = vld [vmem:[#allocation10 + $0x3b0] sm:$0xf] }
 0x123   :  { %2259 = vmatpush.bf16.msra.mxu1 %v5413_v41  ;;  %v5473_v41 = vor.u32 %v7350_v31, %v5472_v30  ;;  %v5784_v30 = vld [vmem:[#allocation10 + $0x428] sm:$0xf]  ;;  %v7428_v31 = vld [vmem:[#allocation10 + $0x430] sm:$0xf0] }
 0x125   :  { %2284 = vmatpush.bf16.msra.mxu3 %v5617_v51  ;;  %v5353_v51 = vor.u32 %v7320_v39, %v5352_v38  ;;  %v5676_v38 = vld [vmem:[#allocation10 + $0x350] sm:$0xf]  ;;  %v7401_v39 = vld [vmem:[#allocation10 + $0x358] sm:$0xf0] }
 0x126   :  { %2271 = vmatpush.bf16.msra.mxu2 %v5521_v48  ;;  %2247 = vmatpush.bf16.msra.mxu0 %v5305_v56  ;;  %v5257_v48 = vor.u32 %v7296_v37, %v5256_v36  ;;  %v5725_v56 = vor.u32 %v7413_v50, %v5724_v40  ;;  %v7479_v36 = vld [vmem:[#allocation10 + $0x5c8] sm:$0xf0]  ;;  %v5785_v37 = vor.u32 %v7428_v31, %v5784_v30  ;;  %v7425_v50 = vld [vmem:[#allocation10 + $0x418] sm:$0xf0]  ;;  %v5832_v30 = vld [vmem:[#allocation10 + $0x488] sm:$0xf] }
 0x127   :  { %2260 = vmatpush.bf16.msra.mxu1 %v5401_v57  ;;  %v5821_v57 = vor.u32 %v7437_v43, %v5820_v42  ;;  %v5989_v42 = vor.u32 %v7479_v36, %v5988_v35  ;;  %v5880_v43 = vld [vmem:[#allocation10 + $0x4e8] sm:$0xf]  ;;  %v7440_v31 = vld [vmem:[#allocation10 + $0x490] sm:$0xf0]  ;;  %v7491_v36 = vld [vmem:[#allocation13 + $0x28] sm:$0xff] }
 0x129   :  { %2285 = vmatpush.bf16.msra.mxu3 %v5605_v1  ;;  %v7344_v1 = vld [vmem:[#allocation10 + $0x190] sm:$0xf0] }
 0x12a   :  { %2272 = vmatpush.bf16.msra.mxu2 %v5509_v0  ;;  %2248 = vmatpush.bf16.msra.mxu0 %v5293_v5  ;;  %v5448_v0 = vld [vmem:[#allocation10 + $0x188] sm:$0xf]  ;;  %v5916_v5 = vld [vmem:[#allocation10 + $0x530] sm:$0xf] }
 0x12b   :  { %2261 = vmatpush.bf16.msra.mxu1 %v5389_v6  ;;  %v7461_v6 = vld [vmem:[#allocation10 + $0x538] sm:$0xf0]  ;;  %v5449_v11 = vor.u32 %v7344_v1, %v5448_v0  ;;  %v5652_v0 = vld [vmem:[#allocation10 + $0x320] sm:$0xf]  ;;  %v7395_v1 = vld [vmem:[#allocation10 + $0x328] sm:$0xf0] }
 0x12c   :  { %v5917_v16 = vor.u32 %v7461_v6, %v5916_v5  ;;  %v7419_v5 = vld [vmem:[#allocation10 + $0x3e8] sm:$0xf0]  ;;  %v5965_v6 = vor.u32 %v7473_v62, %v5964_v61 }
 0x12d   :  { %2286 = vmatpush.bf16.msra.mxu3 %v5593_v15  ;;  %v5545_v15 = vor.u32 %v7368_v4, %v5544_v3  ;;  %v5748_v4 = vld [vmem:[#allocation10 + $0x3e0] sm:$0xf] }
 0x12e   :  { %2273 = vmatpush.bf16.msra.mxu2 %v5497_v14  ;;  %2249 = vmatpush.bf16.msra.mxu0 %v5281_v20  ;;  %v7407_v14 = vld [vmem:[#allocation10 + $0x388] sm:$0xf0] }
 0x12f   :  { %2262 = vmatpush.bf16.msra.mxu1 %v5377_v21  ;;  %v7431_v20 = vld [vmem:[#allocation10 + $0x448] sm:$0xf0]  ;;  %v6013_v21 = vor.u32 %v7485_v10, %v6012_v9  ;;  %v5701_v25 = vor.u32 %v7407_v14, %v5700_v13  ;;  %v5653_v9 = vor.u32 %v7395_v1, %v5652_v0  ;;  %v5952_v10 = vld [vmem:[#allocation10 + $0x578] sm:$0xf]  ;;  %v5749_v13 = vor.u32 %v7419_v5, %v5748_v4  ;;  %v5640_v14 = vld [vmem:[#allocation10 + $0x308] sm:$0xf] }
 0x130   :  { %v5797_v27 = vor.u32 %v7431_v20, %v5796_v17  ;;  %v5736_v17 = vld [vmem:[#allocation10 + $0x3c8] sm:$0xf]  ;;  %v7416_v20 = vld [vmem:[#allocation10 + $0x3d0] sm:$0xf0] }
 0x131   :  { %2287 = vmatpush.bf16.msra.mxu3 %v5581_v29  ;;  %v7404_v29 = vld [vmem:[#allocation10 + $0x370] sm:$0xf0] }
 0x132   :  { %2274 = vmatpush.bf16.msra.mxu2 %v5485_v28  ;;  %2250 = vmatpush.bf16.msra.mxu0 %v5269_v33  ;;  %v5688_v28 = vld [vmem:[#allocation10 + $0x368] sm:$0xf]  ;;  %v7455_v33 = vld [vmem:[#allocation10 + $0x508] sm:$0xf0]  ;;  %v7496_v0 = vld [vmem:[#allocation13 + $0x50] sm:$0xff] }
 0x133   :  { %2263 = vmatpush.bf16.msra.mxu1 %v5365_v34  ;;  %v5689_v34 = vor.u32 %v7404_v29, %v5688_v28  ;;  %v7493_v28 = vld [vmem:[#allocation13 + $0x38] sm:$0xff] }
 0x135   :  { %2288 = vmatpush.bf16.msra.mxu3 %v5569_v44  ;;  %v7452_v44 = vld [vmem:[#allocation10 + $0x4f0] sm:$0xf0] }
 0x136   :  { %2275 = vmatpush.bf16.msra.mxu2 %v5473_v41  ;;  %2251 = vmatpush.bf16.msra.mxu0 %v5257_v48  ;;  %v5772_v41 = vld [vmem:[#allocation10 + $0x410] sm:$0xf]  ;;  %v5881_v52 = vor.u32 %v7452_v44, %v5880_v43  ;;  %v7486_v44 = vld [vmem:[#allocation13] sm:$0xff] }
 0x137   :  { %2264 = vmatpush.bf16.msra.mxu1 %v5353_v51  ;;  %v5773_v48 = vor.u32 %v7425_v50, %v5772_v41  ;;  %v5664_v51 = vld [vmem:[#allocation10 + $0x338] sm:$0xf]  ;;  %v7487_v43 = vld [vmem:[#allocation13 + $0x8] sm:$0xff] }
 0x139   :  { %2289 = vmatpush.bf16.msra.mxu3 %v5557_v63  ;;  %2252 = vmatmul.bf16.vlgmr.msra.gmra.mxu0 %v8264_v19  ;;  %v5905_v19 = vor.u32 %v7458_v23, %v5904_v22  ;;  %v5844_v22 = vld [vmem:[#allocation10 + $0x4a0] sm:$0xf]  ;;  %v7443_v23 = vld [vmem:[#allocation10 + $0x4a8] sm:$0xf0] }
 0x13a   :  { %2296 = vmatpush.bf16.msrb.mxu0 %v5725_v56  ;;  %2276 = vmatpush.bf16.msra.mxu2 %v5461_v59  ;;  %v7422_v56 = vld [vmem:[#allocation10 + $0x400] sm:$0xf0]  ;;  %v7449_v59 = vld [vmem:[#allocation10 + $0x4d8] sm:$0xf0]  ;;  %v5845_v29 = vor.u32 %v7443_v23, %v5844_v22 }
 0x13b   :  { %2309 = vmatpush.bf16.msrb.mxu1 %v5821_v57  ;;  %v5977_v57 = vor.u32 %v7476_v47, %v5976_v45  ;;  %v5761_v63 = vor.u32 %v7422_v56, %v5760_v55  ;;  %v5869_v3 = vor.u32 %v7449_v59, %v5868_v58  ;;  %v7499_v55 = vld [vmem:[#allocation13 + $0x68] sm:$0xff]  ;;  %v7498_v58 = vld [vmem:[#allocation13 + $0x60] sm:$0xff] }
 0x13c   :  { %2265 = vmatmul.bf16.vlgmr.msra.gmra.mxu1 %v8266_v24  ;;  %v5892_v24 = vld [vmem:[#allocation10 + $0x500] sm:$0xf] }
 0x13d   :  { %2290 = vmatpush.bf16.msra.mxu3 %v5545_v15  ;;  %v5893_v40 = vor.u32 %v7455_v33, %v5892_v24  ;;  %v7392_v15 = vld [vmem:[#allocation10 + $0x310] sm:$0xf0] }
 0x13e   :  { %2297 = vmatpush.bf16.msrb.mxu0 %v5713_v7  ;;  %2277 = vmatpush.bf16.msra.mxu2 %v5449_v11  ;;  %v5856_v7 = vld [vmem:[#allocation10 + $0x4b8] sm:$0xf]  ;;  %v7470_v11 = vld [vmem:[#allocation10 + $0x580] sm:$0xf0]  ;;  %v7464_v24 = vld [vmem:[#allocation10 + $0x550] sm:$0xf0] }
 0x13f   :  { %2310 = vmatpush.bf16.msrb.mxu1 %v5809_v8  ;;  %v7446_v8 = vld [vmem:[#allocation10 + $0x4c0] sm:$0xf0]  ;;  %v7492_v33 = vld [vmem:[#allocation13 + $0x30] sm:$0xff] }
 0x140   :  { %2291 = vmatmul.bf16.vlgmr.msra.gmra.mxu3 %v8272_v54  ;;  %v7398_v54 = vld [vmem:[#allocation10 + $0x340] sm:$0xf0] }
 0x141   :  { %2335 = vmatpush.bf16.msrb.mxu3 %v6013_v21  ;;  %2278 = vmatmul.bf16.vlgmr.msra.gmra.mxu2 %v8270_v46  ;;  %v5677_v46 = vor.u32 %v7401_v39, %v5676_v38  ;;  %v5665_v60 = vor.u32 %v7398_v54, %v5664_v51  ;;  %v5953_v21 = vor.u32 %v7470_v11, %v5952_v10  ;;  %v7490_v39 = vld [vmem:[#allocation13 + $0x20] sm:$0xff] }
 0x142   :  { %2322 = vmatpush.bf16.msrb.mxu2 %v5917_v16  ;;  %2298 = vmatpush.bf16.msrb.mxu0 %v5701_v25  ;;  %v5857_v16 = vor.u32 %v7446_v8, %v5856_v7  ;;  %v5641_v25 = vor.u32 %v7392_v15, %v5640_v14  ;;  %v7495_v8 = vld [vmem:[#allocation13 + $0x48] sm:$0xff] }
 0x143   :  { %2311 = vmatpush.bf16.msrb.mxu1 %v5797_v27  ;;  %v5737_v27 = vor.u32 %v7416_v20, %v5736_v17 }
 0x145   :  { %2336 = vmatpush.bf16.msrb.mxu3 %v6001_v32  ;;  %v5928_v32 = vld [vmem:[#allocation10 + $0x548] sm:$0xf] }
 0x146   :  { %2323 = vmatpush.bf16.msrb.mxu2 %v5905_v19  ;;  %2299 = vmatpush.bf16.msrb.mxu0 %v5689_v34  ;;  %v5941_v19 = vor.u32 %v7467_v2, %v5940_v26  ;;  %v5833_v34 = vor.u32 %v7440_v31, %v5832_v30  ;;  %v5929_v35 = vor.u32 %v7464_v24, %v5928_v32 }
 0x147   :  { %2312 = vmatpush.bf16.msrb.mxu1 %v5785_v37 }
 0x149   :  { %2337 = vmatpush.bf16.msrb.mxu3 %v5989_v42 }
 0x14a   :  { %2324 = vmatpush.bf16.msrb.mxu2 %v5893_v40  ;;  %2300 = vmatpush.bf16.msrb.mxu0 %v5677_v46  ;;  %v7489_v40 = vld [vmem:[#allocation13 + $0x18] sm:$0xff] }
 0x14b   :  { %2313 = vmatpush.bf16.msrb.mxu1 %v5773_v48  ;;  %v8308_v46 = vld [vmem:[#allocation11] sm:$0x7] }
 0x14c   :  { %v1006_v47 = vperm.slane %v8308_v46, 0  ;;  %v1007_v17 = vperm.slane %v8308_v46, 1 }
 0x14d   :  { %2338 = vmatpush.bf16.msrb.mxu3 %v5977_v57 }
 0x14e   :  { %2325 = vmatpush.bf16.msrb.mxu2 %v5881_v52  ;;  %2301 = vmatpush.bf16.msrb.mxu0 %v5665_v60  ;;  %v7497_v60 = vld [vmem:[#allocation13 + $0x58] sm:$0xff] }
 0x14f   :  { %2314 = vmatpush.bf16.msrb.mxu1 %v5761_v63 }
 0x151   :  { %2339 = vmatpush.bf16.msrb.mxu3 %v5965_v6 }
 0x152   :  { %2326 = vmatpush.bf16.msrb.mxu2 %v5869_v3  ;;  %2302 = vmatpush.bf16.msrb.mxu0 %v5653_v9 }
 0x153   :  { %2315 = vmatpush.bf16.msrb.mxu1 %v5749_v13  ;;  %v7494_v13 = vld [vmem:[#allocation13 + $0x40] sm:$0xff] }
 0x155   :  { %2340 = vmatpush.bf16.msrb.mxu3 %v5953_v21  ;;  %v2045_v37 = vpop.f32.mrf.mxu0  ;;  %v2058_v38 = vpop.f32.mrf.mxu1 }
 0x156   :  { %2327 = vmatpush.bf16.msrb.mxu2 %v5857_v16  ;;  %2303 = vmatpush.bf16.msrb.mxu0 %v5641_v25  ;;  %v2046_v51 = vadd.f32 %v2045_v37, %v1006_v47  ;;  %v7504_v47 = vld [vmem:[#allocation13 + $0x90] sm:$0xff] }
 0x157   :  { %2316 = vmatpush.bf16.msrb.mxu1 %v5737_v27 }
 0x158   :  { %v2059_v54 = vadd.f32 %v2058_v38, %v2046_v51  ;;  %v7509_v38 = vld [vmem:[#allocation13 + $0xb8] sm:$0xff]  ;;  %v7503_v51 = vld [vmem:[#allocation13 + $0x88] sm:$0xff] }
 0x159   :  { %2341 = vmatpush.bf16.msrb.mxu3 %v5941_v19  ;;  %2304 = vmatmul.bf16.vlgmr.msrb.gmra.mxu0 %v8280_v12  ;;  %v7488_v12 = vld [vmem:[#allocation13 + $0x10] sm:$0xff] }
 0x15a   :  { %2556 = vmatpush.bf16.msra.mxu0 %v7493_v28  ;;  %2328 = vmatpush.bf16.msrb.mxu2 %v5845_v29 }
 0x15b   :  { %2317 = vmatmul.bf16.vlgmr.msrb.gmra.mxu1 %v8282_v18 }
 0x15d   :  { %2342 = vmatpush.bf16.msrb.mxu3 %v5929_v35  ;;  %v2047_v41 = vpop.f32.mrf.mxu0  ;;  %v2060_v50 = vpop.f32.mrf.mxu1 }
 0x15e   :  { %2557 = vmatpush.bf16.msra.mxu0 %v7492_v33  ;;  %2329 = vmatpush.bf16.msrb.mxu2 %v5833_v34 }
 0x160   :  { %2343 = vmatmul.bf16.vlgmr.msrb.gmra.mxu3 %v8288_v53  ;;  %v7500_v53 = vld [vmem:[#allocation13 + $0x70] sm:$0xff] }
 0x161   :  { %2330 = vmatmul.bf16.vlgmr.msrb.gmra.mxu2 %v8286_v49  ;;  %v7501_v49 = vld [vmem:[#allocation13 + $0x78] sm:$0xff] }
 0x162   :  { %2558 = vmatpush.bf16.msra.mxu0 %v7491_v36  ;;  %2569 = vmatpush.bf16.msra.mxu1 %v7501_v49  ;;  %v7505_v49 = vld [vmem:[#allocation13 + $0x98] sm:$0xff] }
 0x163   :  { %v2084_v18 = vpop.f32.mrf.mxu3  ;;  %2582 = vmatpush.bf16.msra.mxu2 %v7509_v38  ;;  %v7526_v38 = vld [vmem:[#allocation14 + $0x80] sm:$0xf0] }
 0x164   :  { %v2071_v42 = vpop.f32.mrf.mxu2 }
 0x165   :  { %v2072_v57 = vadd.f32 %v2071_v42, %v2059_v54 }
 0x166   :  { %2559 = vmatpush.bf16.msra.mxu0 %v7490_v39  ;;  %2570 = vmatpush.bf16.msra.mxu1 %v7500_v53 }
 0x167   :  { %v2085_v59 = vadd.f32 %v2084_v18, %v2072_v57  ;;  %v7507_v18 = vld [vmem:[#allocation13 + $0xa8] sm:$0xff] }
 0x16a   :  { %2560 = vmatpush.bf16.msra.mxu0 %v7489_v40  ;;  %2571 = vmatpush.bf16.msra.mxu1 %v7499_v55  ;;  %v7508_v40 = vld [vmem:[#allocation13 + $0xb0] sm:$0xff]  ;;  %v7502_v55 = vld [vmem:[#allocation13 + $0x80] sm:$0xff] }
 0x16b   :  { %v2086_v48 = vpop.f32.mrf.mxu3  ;;  %2583 = vmatpush.bf16.msra.mxu2 %v7508_v40  ;;  %v6174_v40 = vld [vmem:[#allocation14 + $0x84] sm:$0xf0] }
 0x16c   :  { %v2073_v45 = vpop.f32.mrf.mxu2 }
 0x16e   :  { %2561 = vmatpush.bf16.msra.mxu0 %v7488_v12  ;;  %2572 = vmatpush.bf16.msra.mxu1 %v7498_v58 }
 0x16f   :  { %2584 = vmatpush.bf16.msra.mxu2 %v7507_v18 }
 0x172   :  { %2562 = vmatpush.bf16.msra.mxu0 %v7487_v43  ;;  %2573 = vmatpush.bf16.msra.mxu1 %v7497_v60  ;;  %v7506_v43 = vld [vmem:[#allocation13 + $0xa0] sm:$0xff] }
 0x173   :  { %2585 = vmatpush.bf16.msra.mxu2 %v7506_v43  ;;  %v7809_v43 = vld [vmem:[%s8387_s7] ss:$0 sm:$0xff] }
 0x175   :  { %v2097_v52 = vpop.f32.mrf.mxu0  ;;  %v2110_v56 = vpop.f32.mrf.mxu1 }
 0x176   :  { %2563 = vmatpush.bf16.msra.mxu0 %v7486_v44  ;;  %v2098_v61 = vadd.f32 %v2097_v52, %v2085_v59  ;;  %2574 = vmatpush.bf16.msra.mxu1 %v7496_v0 }
 0x177   :  { %2586 = vmatpush.bf16.msra.mxu2 %v7505_v49 }
 0x178   :  { %v2111_v1 = vadd.f32 %v2110_v56, %v2098_v61  ;;  %v1008_v56 = vperm.slane %v8308_v46, 2 }
 0x17a   :  { %2575 = vmatpush.bf16.msra.mxu1 %v7495_v8 }
 0x17b   :  { %2587 = vmatpush.bf16.msra.mxu2 %v7504_v47 }
 0x17d   :  { %v2099_v62 = vpop.f32.mrf.mxu0  ;;  %v2112_v63 = vpop.f32.mrf.mxu1 }
 0x17e   :  { %2576 = vmatpush.bf16.msra.mxu1 %v7494_v13 }
 0x17f   :  { %2588 = vmatpush.bf16.msra.mxu2 %v7503_v51  ;;  %v7523_v51 = vld [vmem:[#allocation14 + $0x68] sm:$0xf0] }
 0x183   :  { %v2123_v3 = vpop.f32.mrf.mxu2  ;;  %v2136_v5 = vpop.f32.mrf.mxu3  ;;  %2589 = vmatpush.bf16.msra.mxu2 %v7502_v55  ;;  %v6162_v55 = vld [vmem:[#allocation14 + $0x6c] sm:$0xf0] }
 0x184   :  { %v2124_v4 = vadd.f32 %v2123_v3, %v2111_v1 }
 0x185   :  { %v2149_v7 = vpop.f32.mrf.mxu0  ;;  %v2162_v9 = vpop.f32.mrf.mxu1 }
 0x186   :  { %v2137_v6 = vadd.f32 %v2136_v5, %v2124_v4  ;;  %v2150_v22 = vadd.f32 %v2149_v7, %v1007_v17 }
 0x188   :  { %vm2348_vm8 = vcmp.gt.f32.partialorder %v2137_v6, 0.0  ;;  %v2351_v10 = vmul.f32 0.01, %v2137_v6  ;;  %v2163_v26 = vadd.f32 %v2162_v9, %v2150_v22  ;;  %v7532_v22 = vld [vmem:[#allocation14 + $0xb0] sm:$0xf0] }
 0x18a   :  { %v2354_v11 = vsel %vm2348_vm8, %v2137_v6, %v2351_v10 }
 0x18b   :  { %v2357_v14 = vpack.c.bf16 %v2354_v11, %v2354_v11  ;;  %v2125_v15 = vpop.f32.mrf.mxu2  ;;  %v2138_v16 = vpop.f32.mrf.mxu3 }
 0x18d   :  { %2564 = vmatmul.bf16.vlgmr.msra.gmra.mxu0 %v2357_v14  ;;  %v2151_v20 = vpop.f32.mrf.mxu0  ;;  %v2164_v21 = vpop.f32.mrf.mxu1 }
 0x18e   :  { %v6196_v21 = vld [vmem:[#allocation14 + $0xa8] sm:$0xf] }
 0x193   :  { %v2175_v23 = vpop.f32.mrf.mxu2  ;;  %v2188_v25 = vpop.f32.mrf.mxu3 }
 0x194   :  { %v2176_v2 = vadd.f32 %v2175_v23, %v2163_v26  ;;  %v7531_v23 = vld [vmem:[#allocation14 + $0xac] sm:$0xf]  ;;  %v6198_v26 = vld [vmem:[#allocation14 + $0xb4] sm:$0xf0] }
 0x196   :  { %v2201_v27 = vpop.f32.mrf.mxu0  ;;  %v2189_v29 = vadd.f32 %v2188_v25, %v2176_v2  ;;  %v6197_v25 = vor.u32 %v7532_v22, %v6196_v21  ;;  %v6204_v2 = vld [vmem:[#allocation14 + $0xb0] sm:$0xf]  ;;  %v6126_v21 = vld [vmem:[#allocation14 + $0x24] sm:$0xf0]  ;;  %v6132_v22 = vld [vmem:[#allocation14 + $0x20] sm:$0xf] }
 0x198   :  { %v2202_v31 = vadd.f32 %v2201_v27, %v2189_v29  ;;  %v7533_v27 = vld [vmem:[#allocation14 + $0xb8] sm:$0xf0]  ;;  %2781 = vmatpush.bf16.msra.mxu3 %v6197_v25 }
 0x199   :  { %v2214_v28 = vpop.f32.mrf.mxu1  ;;  %v6205_v29 = vor.u32 %v7533_v27, %v6204_v2  ;;  %v6112_v2 = vld [vmem:[#allocation14] sm:$0xf]  ;;  %v7511_v27 = vld [vmem:[#allocation14 + $0x8] sm:$0xf0] }
 0x19a   :  { %v2215_v33 = vadd.f32 %v2214_v28, %v2202_v31  ;;  %v6201_v28 = vor.u32 %v7531_v23, %v6198_v26  ;;  %v7528_v31 = vld [vmem:[#allocation14 + $0x94] sm:$0xf]  ;;  %v7515_v23 = vld [vmem:[#allocation14 + $0x28] sm:$0xf0] }
 0x19b   :  { %v2177_v19 = vpop.f32.mrf.mxu2  ;;  %v2190_v30 = vpop.f32.mrf.mxu3  ;;  %2807 = vmatpush.bf16.msrb.mxu1 %v6205_v29  ;;  %v6133_v26 = vor.u32 %v7515_v23, %v6132_v22  ;;  %v6113_v29 = vor.u32 %v7511_v27, %v6112_v2  ;;  %v7626_v22 = vld [vmem:[#allocation17 + $0x2dc] sm:$0xf0]  ;;  %v7710_v2 = vld [vmem:[#allocation17 + $0x584] sm:$0xf] }
 0x19c   :  { %v6184_v19 = vld [vmem:[#allocation14 + $0x90] sm:$0xf]  ;;  %v7529_v30 = vld [vmem:[#allocation14 + $0x98] sm:$0xf0]  ;;  %2794 = vmatpush.bf16.msrb.mxu0 %v6201_v28  ;;  %v7510_v28 = vld [vmem:[#allocation14 + $0x4] sm:$0xf] }
 0x19e   :  { %v2203_v32 = vpop.f32.mrf.mxu0 }
 0x19f   :  { %v6185_v32 = vor.u32 %v7529_v30, %v6184_v19  ;;  %v6114_v19 = vld [vmem:[#allocation14 + $0xc] sm:$0xf0]  ;;  %v6120_v30 = vld [vmem:[#allocation14 + $0x8] sm:$0xf] }
 0x1a1   :  { %v2216_v24 = vpop.f32.mrf.mxu1  ;;  %2782 = vmatpush.bf16.msra.mxu3 %v6185_v32  ;;  %v6117_v32 = vor.u32 %v7510_v28, %v6114_v19  ;;  %v7562_v19 = vld [vmem:[#allocation17 + $0xdc] sm:$0xf0] }
 0x1a2   :  { %v6186_v24 = vld [vmem:[#allocation14 + $0x9c] sm:$0xf0] }
 0x1a3   :  { %v2240_v35 = vpop.f32.mrf.mxu3 }
 0x1a4   :  { %v2227_v34 = vpop.f32.mrf.mxu2 }
 0x1a5   :  { %v2228_v36 = vadd.f32 %v2227_v34, %v2215_v33  ;;  %v6192_v33 = vld [vmem:[#allocation14 + $0x98] sm:$0xf]  ;;  %v7530_v34 = vld [vmem:[#allocation14 + $0xa0] sm:$0xf0] }
 0x1a7   :  { %v2241_v37 = vadd.f32 %v2240_v35, %v2228_v36  ;;  %v6189_v35 = vor.u32 %v7528_v31, %v6186_v24  ;;  %v6193_v36 = vor.u32 %v7530_v34, %v6192_v33  ;;  %v7512_v31 = vld [vmem:[#allocation14 + $0x10] sm:$0xf0]  ;;  %v6688_v33 = vld [vmem:[#allocation17 + $0x3c0] sm:$0xf] }
 0x1a8   :  { %v6121_v24 = vor.u32 %v7512_v31, %v6120_v30  ;;  %v7658_v34 = vld [vmem:[#allocation17 + $0x3dc] sm:$0xf0] }
 0x1a9   :  { %vm2349_vm9 = vcmp.gt.f32.partialorder %v2241_v37, 0.0  ;;  %v2352_v39 = vmul.f32 0.01, %v2241_v37  ;;  %2795 = vmatpush.bf16.msrb.mxu0 %v6189_v35  ;;  %2808 = vmatpush.bf16.msrb.mxu1 %v6193_v36  ;;  %v6944_v35 = vld [vmem:[#allocation17 + $0x5c0] sm:$0xf]  ;;  %v6689_v36 = vor.u32 %v7658_v34, %v6688_v33 }
 0x1ab   :  { %v2355_v41 = vsel %vm2349_vm9, %v2241_v37, %v2352_v39  ;;  %v2242_v42 = vpop.f32.mrf.mxu3  ;;  %v6172_v37 = vld [vmem:[#allocation14 + $0x78] sm:$0xf]  ;;  %v7525_v39 = vld [vmem:[#allocation14 + $0x7c] sm:$0xf] }
 0x1ac   :  { %v2358_v50 = vpack.c.bf16 %v2355_v41, %v2355_v41  ;;  %v2229_v12 = vpop.f32.mrf.mxu2  ;;  %v6180_v41 = vld [vmem:[#allocation14 + $0x80] sm:$0xf]  ;;  %v6177_v42 = vor.u32 %v7525_v39, %v6174_v40  ;;  %v7650_v39 = vld [vmem:[#allocation17 + $0x39c] sm:$0xf0]  ;;  %v2595_v40 = vlaneseq }
 0x1ad   :  { %v6173_v12 = vor.u32 %v7526_v38, %v6172_v37  ;;  %v7722_v37 = vld [vmem:[#allocation17 + $0x5dc] sm:$0xf0] }
 0x1ae   :  { %2577 = vmatmul.bf16.vlgmr.msra.gmra.mxu1 %v2358_v50  ;;  %v7527_v50 = vld [vmem:[#allocation14 + $0x88] sm:$0xf0]  ;;  %2796 = vmatpush.bf16.msrb.mxu0 %v6177_v42  ;;  %v6656_v38 = vld [vmem:[#allocation17 + $0x380] sm:$0xf] }
 0x1af   :  { %v6181_v18 = vor.u32 %v7527_v50, %v6180_v41  ;;  %2783 = vmatpush.bf16.msra.mxu3 %v6173_v12  ;;  %v6945_v41 = vor.u32 %v7722_v37, %v6944_v35  ;;  %v6912_v50 = vld [vmem:[#allocation17 + $0x580] sm:$0xf] }
 0x1b0   :  { %v7714_v12 = vld [vmem:[#allocation17 + $0x59c] sm:$0xf0] }
 0x1b1   :  { %2809 = vmatpush.bf16.msrb.mxu1 %v6181_v18  ;;  %v6432_v42 = vld [vmem:[#allocation17 + $0x1c0] sm:$0xf]  ;;  %v6657_v18 = vor.u32 %v7650_v39, %v6656_v38 }
 0x1b2   :  { %v6528_v35 = vld [vmem:[#allocation17 + $0x280] sm:$0xf] }
 0x1b3   :  { %v6784_v37 = vld [vmem:[#allocation17 + $0x480] sm:$0xf] }
 0x1b4   :  { %v7682_v38 = vld [vmem:[#allocation17 + $0x49c] sm:$0xf0] }
 0x1b6   :  { %v2253_v44 = vpop.f32.mrf.mxu0 }
 0x1b7   :  { %v2254_v59 = vadd.f32 %v2253_v44, %v1008_v56  ;;  %v6168_v56 = vld [vmem:[#allocation14 + $0x68] sm:$0xf] }
 0x1b9   :  { %v2266_v45 = vpop.f32.mrf.mxu1 }
 0x1ba   :  { %v2267_v60 = vadd.f32 %v2266_v45, %v2254_v59 }
 0x1be   :  { %v2255_v48 = vpop.f32.mrf.mxu0 }
 0x1c1   :  { %v2268_v53 = vpop.f32.mrf.mxu1 }
 0x1c2   :  { %v6160_v53 = vld [vmem:[#allocation14 + $0x60] sm:$0xf] }
 0x1c3   :  { %v2292_v52 = vpop.f32.mrf.mxu3 }
 0x1c4   :  { %v2279_v54 = vpop.f32.mrf.mxu2 }
 0x1c5   :  { %v2280_v62 = vadd.f32 %v2279_v54, %v2267_v60  ;;  %v7522_v54 = vld [vmem:[#allocation14 + $0x64] sm:$0xf]  ;;  %v6148_v60 = vld [vmem:[#allocation14 + $0x48] sm:$0xf] }
 0x1c7   :  { %v2293_v0 = vadd.f32 %v2292_v52, %v2280_v62  ;;  %v6161_v52 = vor.u32 %v7523_v51, %v6160_v53  ;;  %v7519_v62 = vld [vmem:[#allocation14 + $0x4c] sm:$0xf]  ;;  %v6624_v51 = vld [vmem:[#allocation17 + $0x340] sm:$0xf] }
 0x1c9   :  { %2784 = vmatpush.bf16.msra.mxu3 %v6161_v52  ;;  %v6880_v52 = vld [vmem:[#allocation17 + $0x540] sm:$0xf] }
 0x1cb   :  { %v2294_v58 = vpop.f32.mrf.mxu3 }
 0x1cc   :  { %v2281_v57 = vpop.f32.mrf.mxu2  ;;  %v6165_v58 = vor.u32 %v7522_v54, %v6162_v55  ;;  %v7642_v54 = vld [vmem:[#allocation17 + $0x35c] sm:$0xf0] }
 0x1cd   :  { %v7524_v57 = vld [vmem:[#allocation14 + $0x70] sm:$0xf0]  ;;  %v7706_v55 = vld [vmem:[#allocation17 + $0x55c] sm:$0xf0] }
 0x1ce   :  { %v6169_v59 = vor.u32 %v7524_v57, %v6168_v56  ;;  %2797 = vmatpush.bf16.msrb.mxu0 %v6165_v58  ;;  %v6400_v56 = vld [vmem:[#allocation17 + $0x180] sm:$0xf]  ;;  %v2596_v58 = vand.u32 127, %v2595_v40 }
 0x1cf   :  { %v7586_v57 = vld [vmem:[#allocation17 + $0x19c] sm:$0xf0] }
 0x1d0   :  { %2810 = vmatpush.bf16.msrb.mxu1 %v6169_v59  ;;  %v6401_v59 = vor.u32 %v7586_v57, %v6400_v56  ;;  %vm2597_vm11 = vcmp.ge.s32.totalorder %v2596_v58, 64  ;;  %vm2598_vm12 = vcmp.lt.s32.totalorder %v2596_v58, 80  ;;  %v7546_v56 = vld [vmem:[#allocation17 + $0x5c] sm:$0xf0]  ;;  %v7542_v57 = vld [vmem:[#allocation17 + $0x44] sm:$0xf] }
 0x1d1   :  { %vm8321_vm13 = vmand %vm2597_vm11, %vm2598_vm12  ;;  %v6242_v58 = vld [vmem:[#allocation17 + $0x60] sm:$0xf0] }
 0x1d6   :  { %v2305_v61 = vpop.f32.mrf.mxu0 }
 0x1d7   :  { %v2306_v1 = vadd.f32 %v2305_v61, %v2293_v0  ;;  %v7520_v61 = vld [vmem:[#allocation14 + $0x50] sm:$0xf0]  ;;  %v6150_v0 = vld [vmem:[#allocation14 + $0x54] sm:$0xf0] }
 0x1d8   :  { %v2318_v63 = vpop.f32.mrf.mxu1 }
 0x1d9   :  { %v2319_v5 = vadd.f32 %v2318_v63, %v2306_v1  ;;  %v6149_v63 = vor.u32 %v7520_v61, %v6148_v60  ;;  %v6156_v1 = vld [vmem:[#allocation14 + $0x50] sm:$0xf]  ;;  %v7582_v60 = vld [vmem:[#allocation17 + $0x184] sm:$0xf] }
 0x1da   :  { %v6402_v61 = vld [vmem:[#allocation17 + $0x1a0] sm:$0xf0] }
 0x1db   :  { %2785 = vmatpush.bf16.msra.mxu3 %v6149_v63  ;;  %v6405_v63 = vor.u32 %v7582_v60, %v6402_v61 }
 0x1de   :  { %v2307_v3 = vpop.f32.mrf.mxu0 }
 0x1df   :  { %v7521_v3 = vld [vmem:[#allocation14 + $0x58] sm:$0xf0] }
 0x1e0   :  { %v2320_v4 = vpop.f32.mrf.mxu1 }
 0x1e1   :  { %v6153_v4 = vor.u32 %v7519_v62, %v6150_v0  ;;  %v6625_v62 = vor.u32 %v7642_v54, %v6624_v51  ;;  %v6592_v0 = vld [vmem:[#allocation17 + $0x300] sm:$0xf] }
 0x1e3   :  { %v2344_v8 = vpop.f32.mrf.mxu3  ;;  %2798 = vmatpush.bf16.msrb.mxu0 %v6153_v4  ;;  %v6368_v4 = vld [vmem:[#allocation17 + $0x140] sm:$0xf] }
 0x1e4   :  { %v2331_v6 = vpop.f32.mrf.mxu2 }
 0x1e5   :  { %v2332_v7 = vadd.f32 %v2331_v6, %v2319_v5  ;;  %v6157_v5 = vor.u32 %v7521_v3, %v6156_v1  ;;  %v6136_v6 = vld [vmem:[#allocation14 + $0x30] sm:$0xf]  ;;  %v7634_v1 = vld [vmem:[#allocation17 + $0x31c] sm:$0xf0]  ;;  %v6881_v3 = vor.u32 %v7706_v55, %v6880_v52 }
 0x1e6   :  { %v6240_v52 = vld [vmem:[#allocation17 + $0x40] sm:$0xf] }
 0x1e7   :  { %v2345_v9 = vadd.f32 %v2344_v8, %v2332_v7  ;;  %2811 = vmatpush.bf16.msrb.mxu1 %v6157_v5  ;;  %v7517_v7 = vld [vmem:[#allocation14 + $0x38] sm:$0xf0]  ;;  %v7578_v5 = vld [vmem:[#allocation17 + $0x15c] sm:$0xf0] }
 0x1e8   :  { %v6137_v8 = vor.u32 %v7517_v7, %v6136_v6  ;;  %v7574_v6 = vld [vmem:[#allocation17 + $0x144] sm:$0xf]  ;;  %v6848_v7 = vld [vmem:[#allocation17 + $0x500] sm:$0xf] }
 0x1e9   :  { %vm2350_vm10 = vcmp.gt.f32.partialorder %v2345_v9, 0.0  ;;  %v2353_v10 = vmul.f32 0.01, %v2345_v9 }
 0x1ea   :  { %2786 = vmatpush.bf16.msra.mxu3 %v6137_v8  ;;  %v7698_v8 = vld [vmem:[#allocation17 + $0x51c] sm:$0xf0] }
 0x1eb   :  { %v2356_v11 = vsel %vm2350_vm10, %v2345_v9, %v2353_v10  ;;  %v2346_v14 = vpop.f32.mrf.mxu3  ;;  %v7516_v9 = vld [vmem:[#allocation14 + $0x34] sm:$0xf]  ;;  %v6138_v10 = vld [vmem:[#allocation14 + $0x3c] sm:$0xf0] }
 0x1ec   :  { %v2359_v46 = vpack.c.bf16 %v2356_v11, %v2356_v11  ;;  %v2333_v13 = vpop.f32.mrf.mxu2  ;;  %v6144_v11 = vld [vmem:[#allocation14 + $0x38] sm:$0xf] }
 0x1ed   :  { %v7518_v13 = vld [vmem:[#allocation14 + $0x40] sm:$0xf0] }
 0x1ee   :  { %2590 = vmatmul.bf16.vlgmr.msra.gmra.mxu2 %v2359_v46  ;;  %v6141_v46 = vor.u32 %v7516_v9, %v6138_v10  ;;  %v6145_v14 = vor.u32 %v7518_v13, %v6144_v11  ;;  %v6370_v9 = vld [vmem:[#allocation17 + $0x160] sm:$0xf0]  ;;  %v6369_v10 = vor.u32 %v7578_v5, %v6368_v4  ;;  %v6593_v13 = vor.u32 %v7634_v1, %v6592_v0  ;;  %v6720_v1 = vld [vmem:[#allocation17 + $0x400] sm:$0xf] }
 0x1ef   :  { %v6373_v11 = vor.u32 %v7574_v6, %v6370_v9  ;;  %v7718_v4 = vld [vmem:[#allocation17 + $0x5c4] sm:$0xf]  ;;  %v6440_v6 = vld [vmem:[#allocation17 + $0x1c8] sm:$0xf]  ;;  %v6245_v9 = vor.u32 %v7542_v57, %v6242_v58 }
 0x1f0   :  { %2799 = vmatpush.bf16.msrb.mxu0 %v6141_v46  ;;  %2812 = vmatpush.bf16.msrb.mxu1 %v6145_v14  ;;  %v6336_v46 = vld [vmem:[#allocation17 + $0x100] sm:$0xf]  ;;  %v6946_v5 = vld [vmem:[#allocation17 + $0x5e0] sm:$0xf0] }
 0x1f1   :  { %v7570_v14 = vld [vmem:[#allocation17 + $0x11c] sm:$0xf0]  ;;  %v6594_v57 = vld [vmem:[#allocation17 + $0x320] sm:$0xf0] }
 0x1f2   :  { %v6337_v27 = vor.u32 %v7570_v14, %v6336_v46  ;;  %v7538_v46 = vld [vmem:[#allocation17 + $0x1c] sm:$0xf0] }
 0x1f4   :  { %2813 = vmatpush.bf16.msrb.mxu1 %v6133_v26  ;;  %v7690_v26 = vld [vmem:[#allocation17 + $0x4dc] sm:$0xf0] }
 0x1f8   :  { %2814 = vmatpush.bf16.msrb.mxu1 %v6121_v24  ;;  %v6306_v24 = vld [vmem:[#allocation17 + $0xe0] sm:$0xf0] }
 0x20a   :  { %v2565_v15 = vpop.f32.mrf.mxu0 }
 0x20b   :  { %v2566_v44 = vadd.f32 %v7809_v43, %v2565_v15  ;;  %v6124_v15 = vld [vmem:[#allocation14 + $0x18] sm:$0xf]  ;;  %v7594_v43 = vld [vmem:[#allocation17 + $0x1dc] sm:$0xf0] }
 0x212   :  { %v2567_v16 = vpop.f32.mrf.mxu0 }
 0x213   :  { %v7514_v16 = vld [vmem:[#allocation14 + $0x20] sm:$0xf0] }
 0x22b   :  { %v2578_v17 = vpop.f32.mrf.mxu1 }
 0x22c   :  { %v2579_v45 = vadd.f32 %v2578_v17, %v2566_v44  ;;  %v7513_v17 = vld [vmem:[#allocation14 + $0x1c] sm:$0xf]  ;;  %v7590_v44 = vld [vmem:[#allocation17 + $0x1c4] sm:$0xf] }
 0x22d   :  { %v6129_v25 = vor.u32 %v7513_v17, %v6126_v21  ;;  %v6560_v21 = vld [vmem:[#allocation17 + $0x2c0] sm:$0xf] }
 0x22e   :  { %v6561_v31 = vor.u32 %v7626_v22, %v6560_v21  ;;  %v6949_v22 = vor.u32 %v7718_v4, %v6946_v5 }
 0x22f   :  { %2800 = vmatpush.bf16.msrb.mxu0 %v6129_v25  ;;  %v6816_v25 = vld [vmem:[#allocation17 + $0x4c0] sm:$0xf] }
 0x230   :  { %v6817_v34 = vor.u32 %v7690_v26, %v6816_v25  ;;  %v7659_v25 = vld [vmem:[#allocation17 + $0x3e4] sm:$0xf0] }
 0x233   :  { %v2580_v20 = vpop.f32.mrf.mxu1  ;;  %2801 = vmatpush.bf16.msrb.mxu0 %v6117_v32  ;;  %v7558_v32 = vld [vmem:[#allocation17 + $0xc4] sm:$0xf] }
 0x234   :  { %v6125_v20 = vor.u32 %v7514_v16, %v6124_v15  ;;  %v7566_v15 = vld [vmem:[#allocation17 + $0x104] sm:$0xf]  ;;  %v6309_v40 = vor.u32 %v7558_v32, %v6306_v24 }
 0x235   :  { %v6338_v16 = vld [vmem:[#allocation17 + $0x120] sm:$0xf0] }
 0x236   :  { %2787 = vmatpush.bf16.msra.mxu3 %v6125_v20  ;;  %v6849_v20 = vor.u32 %v7698_v8, %v6848_v7  ;;  %v6341_v28 = vor.u32 %v7566_v15, %v6338_v16  ;;  %v7595_v7 = vld [vmem:[#allocation17 + $0x1e4] sm:$0xf0]  ;;  %v6241_v8 = vor.u32 %v7546_v56, %v6240_v52  ;;  %v6210_v15 = vld [vmem:[#allocation17 + $0x20] sm:$0xf0] }
 0x237   :  { %4028 = vmatpush.bf16.msra.mxu0 %v6945_v41  ;;  %v6272_v41 = vld [vmem:[#allocation17 + $0x80] sm:$0xf]  ;;  %v7654_v16 = vld [vmem:[#allocation17 + $0x3c4] sm:$0xf]  ;;  %v6441_v26 = vor.u32 %v7595_v7, %v6440_v6 }
 0x238   :  { %v7646_v24 = vld [vmem:[#allocation17 + $0x384] sm:$0xf] }
 0x239   :  { %v7630_v56 = vld [vmem:[#allocation17 + $0x304] sm:$0xf] }
 0x23a   :  { %2788 = vmatpush.bf16.msra.mxu3 %v6113_v29  ;;  %v6304_v29 = vld [vmem:[#allocation17 + $0xc0] sm:$0xf]  ;;  %v7678_v7 = vld [vmem:[#allocation17 + $0x484] sm:$0xf] }
 0x23b   :  { %v6305_v39 = vor.u32 %v7562_v19, %v6304_v29  ;;  %v6408_v29 = vld [vmem:[#allocation17 + $0x188] sm:$0xf] }
 0x23c   :  { %v7587_v19 = vld [vmem:[#allocation17 + $0x1a4] sm:$0xf0] }
 0x23e   :  { %4015 = vmatpush.bf16.msrb.mxu3 %v6689_v36  ;;  %v7618_v36 = vld [vmem:[#allocation17 + $0x29c] sm:$0xf0] }
 0x242   :  { %4016 = vmatpush.bf16.msrb.mxu3 %v6657_v18  ;;  %v6274_v18 = vld [vmem:[#allocation17 + $0xa0] sm:$0xf0] }
 0x246   :  { %4017 = vmatpush.bf16.msrb.mxu3 %v6625_v62  ;;  %v6464_v62 = vld [vmem:[#allocation17 + $0x200] sm:$0xf] }
 0x24a   :  { %4018 = vmatpush.bf16.msrb.mxu3 %v6593_v13  ;;  %v7534_v13 = vld [vmem:[#allocation17 + $0x4] sm:$0xf] }
 0x24e   :  { %4019 = vmatpush.bf16.msrb.mxu3 %v6561_v31 }
 0x271   :  { %v2591_v49 = vpop.f32.mrf.mxu2 }
 0x272   :  { %v8316_v47 = vadd.f32 %v2591_v49, %v2579_v45  ;;  %v6434_v45 = vld [vmem:[#allocation17 + $0x1e0] sm:$0xf0]  ;;  %v6913_v49 = vor.u32 %v7714_v12, %v6912_v50  ;;  %v6529_v50 = vor.u32 %v7618_v36, %v6528_v35  ;;  %v7554_v12 = vld [vmem:[#allocation17 + $0x9c] sm:$0xf0]  ;;  %v6664_v35 = vld [vmem:[#allocation17 + $0x388] sm:$0xf] }
 0x273   :  { %v6437_v53 = vor.u32 %v7590_v44, %v6434_v45  ;;  %v6496_v44 = vld [vmem:[#allocation17 + $0x240] sm:$0xf]  ;;  %v6273_v51 = vor.u32 %v7554_v12, %v6272_v41  ;;  %v7651_v36 = vld [vmem:[#allocation17 + $0x3a4] sm:$0xf0] }
 0x274   :  { %2601 = vrot.lane.b32.xlu0 %v8316_v47, %s8132_s28  ;;  %4029 = vmatpush.bf16.msra.mxu0 %v6913_v49  ;;  %v7610_v45 = vld [vmem:[#allocation17 + $0x25c] sm:$0xf0]  ;;  %v2608_v60 = vsel %vm8321_vm13, %v8316_v47, 0.0  ;;  %v7579_v41 = vld [vmem:[#allocation17 + $0x164] sm:$0xf0]  ;;  %v6665_v12 = vor.u32 %v7651_v36, %v6664_v35 }
 0x275   :  { %4041 = vmatpush.bf16.msra.mxu1 %v6437_v53  ;;  %v6752_v49 = vld [vmem:[#allocation17 + $0x440] sm:$0xf]  ;;  %v2609_v53 = vld [vmem:[#allocation5] sm:$0xff]  ;;  %4020 = vmatpush.bf16.msrb.mxu3 %v6529_v50  ;;  %v6497_v55 = vor.u32 %v7610_v45, %v6496_v44 }
 0x276   :  { %v6632_v44 = vld [vmem:[#allocation17 + $0x348] sm:$0xf] }
 0x277   :  { %v7643_v45 = vld [vmem:[#allocation17 + $0x364] sm:$0xf0] }
 0x278   :  { %4030 = vmatpush.bf16.msra.mxu0 %v6881_v3  ;;  %v7666_v3 = vld [vmem:[#allocation17 + $0x41c] sm:$0xf0]  ;;  %v7539_v35 = vld [vmem:[#allocation17 + $0x24] sm:$0xf0] }
 0x279   :  { %v2593_v48 = vpop.f32.mrf.mxu2  ;;  %4042 = vmatpush.bf16.msra.mxu1 %v6405_v63  ;;  %v7602_v63 = vld [vmem:[#allocation17 + $0x21c] sm:$0xf0]  ;;  %4021 = vmatpush.bf16.msrb.mxu3 %v6497_v55  ;;  %v6721_v21 = vor.u32 %v7666_v3, %v6720_v1  ;;  %v6633_v55 = vor.u32 %v7643_v45, %v6632_v44  ;;  %v7563_v1 = vld [vmem:[#allocation17 + $0xe4] sm:$0xf0]  ;;  %v6597_v3 = vor.u32 %v7630_v56, %v6594_v57  ;;  %v7591_v56 = vld [vmem:[#allocation17 + $0x1cc] sm:$0xf] }
 0x27a   :  { %v6433_v48 = vor.u32 %v7594_v43, %v6432_v42  ;;  %v7550_v42 = vld [vmem:[#allocation17 + $0x84] sm:$0xf]  ;;  %v6785_v43 = vor.u32 %v7682_v38, %v6784_v37  ;;  %v6465_v14 = vor.u32 %v7602_v63, %v6464_v62  ;;  %v6409_v37 = vor.u32 %v7587_v19, %v6408_v29  ;;  %v6536_v29 = vld [vmem:[#allocation17 + $0x288] sm:$0xf]  ;;  %v6442_v57 = vld [vmem:[#allocation17 + $0x1e8] sm:$0xf0] }
 0x27b   :  { %v6277_v54 = vor.u32 %v7550_v42, %v6274_v18  ;;  %v7702_v38 = vld [vmem:[#allocation17 + $0x544] sm:$0xf]  ;;  %v7603_v44 = vld [vmem:[#allocation17 + $0x224] sm:$0xf0] }
 0x27c   :  { %4002 = vmatpush.bf16.msrb.mxu2 %v6433_v48  ;;  %4031 = vmatpush.bf16.msra.mxu0 %v6849_v20  ;;  %v7674_v48 = vld [vmem:[#allocation17 + $0x45c] sm:$0xf0]  ;;  %v7638_v42 = vld [vmem:[#allocation17 + $0x344] sm:$0xf] }
 0x27d   :  { %4043 = vmatpush.bf16.msra.mxu1 %v6373_v11  ;;  %v6753_v61 = vor.u32 %v7674_v48, %v6752_v49  ;;  %v6208_v11 = vld [vmem:[#allocation17] sm:$0xf]  ;;  %4022 = vmatpush.bf16.msrb.mxu3 %v6465_v14  ;;  %v6626_v18 = vld [vmem:[#allocation17 + $0x360] sm:$0xf0] }
 0x27e   :  { %v7694_v48 = vld [vmem:[#allocation17 + $0x504] sm:$0xf]  ;;  %v6629_v52 = vor.u32 %v7638_v42, %v6626_v18 }
 0x27f   :  { %v7686_v62 = vld [vmem:[#allocation17 + $0x4c4] sm:$0xf] }
 0x280   :  { %4003 = vmatpush.bf16.msrb.mxu2 %v6401_v59  ;;  %4032 = vmatpush.bf16.msra.mxu0 %v6817_v34  ;;  %v6818_v63 = vld [vmem:[#allocation17 + $0x4e0] sm:$0xf0] }
 0x281   :  { %4044 = vmatpush.bf16.msra.mxu1 %v6341_v28  ;;  %v6209_v28 = vor.u32 %v7538_v46, %v6208_v11  ;;  %v6821_v5 = vor.u32 %v7686_v62, %v6818_v63  ;;  %v6562_v14 = vld [vmem:[#allocation17 + $0x2e0] sm:$0xf0] }
 0x282   :  { %v6466_v42 = vld [vmem:[#allocation17 + $0x220] sm:$0xf0] }
 0x284   :  { %4004 = vmatpush.bf16.msrb.mxu2 %v6369_v10  ;;  %4033 = vmatpush.bf16.msra.mxu0 %v6785_v43 }
 0x285   :  { %4045 = vmatpush.bf16.msra.mxu1 %v6309_v40  ;;  %v6376_v40 = vld [vmem:[#allocation17 + $0x148] sm:$0xf] }
 0x286   :  { %v6377_v49 = vor.u32 %v7579_v41, %v6376_v40  ;;  %v7611_v41 = vld [vmem:[#allocation17 + $0x264] sm:$0xf0] }
 0x288   :  { %4005 = vmatpush.bf16.msrb.mxu2 %v6337_v27  ;;  %4034 = vmatpush.bf16.msra.mxu0 %v6753_v61  ;;  %v6914_v27 = vld [vmem:[#allocation17 + $0x5a0] sm:$0xf0] }
 0x289   :  { %4046 = vmatpush.bf16.msra.mxu1 %v6277_v54  ;;  %v6917_v34 = vor.u32 %v7710_v2, %v6914_v27  ;;  %v7571_v54 = vld [vmem:[#allocation17 + $0x124] sm:$0xf0]  ;;  %v7614_v27 = vld [vmem:[#allocation17 + $0x284] sm:$0xf] }
 0x28c   :  { %4006 = vmatpush.bf16.msrb.mxu2 %v6305_v39  ;;  %4035 = vmatpush.bf16.msra.mxu0 %v6721_v21  ;;  %v6882_v39 = vld [vmem:[#allocation17 + $0x560] sm:$0xf0] }
 0x28d   :  { %4047 = vmatpush.bf16.msra.mxu1 %v6245_v9  ;;  %v6885_v43 = vor.u32 %v7702_v38, %v6882_v39  ;;  %v6280_v9 = vld [vmem:[#allocation17 + $0x88] sm:$0xf]  ;;  %v7670_v21 = vld [vmem:[#allocation17 + $0x444] sm:$0xf] }
 0x28e   :  { %v6498_v38 = vld [vmem:[#allocation17 + $0x260] sm:$0xf0]  ;;  %v6504_v39 = vld [vmem:[#allocation17 + $0x248] sm:$0xf] }
 0x290   :  { %4007 = vmatpush.bf16.msrb.mxu2 %v6273_v51  ;;  %v6344_v51 = vld [vmem:[#allocation17 + $0x108] sm:$0xf] }
 0x291   :  { %v6345_v61 = vor.u32 %v7571_v54, %v6344_v51 }
 0x294   :  { %4008 = vmatpush.bf16.msrb.mxu2 %v6241_v8  ;;  %v6786_v8 = vld [vmem:[#allocation17 + $0x4a0] sm:$0xf0] }
 0x295   :  { %v6789_v11 = vor.u32 %v7678_v7, %v6786_v8  ;;  %v6410_v7 = vld [vmem:[#allocation17 + $0x1a8] sm:$0xf0] }
 0x298   :  { %4009 = vmatpush.bf16.msrb.mxu2 %v6209_v28  ;;  %v6530_v28 = vld [vmem:[#allocation17 + $0x2a0] sm:$0xf0] }
 0x299   :  { %v6533_v19 = vor.u32 %v7614_v27, %v6530_v28  ;;  %v7639_v27 = vld [vmem:[#allocation17 + $0x34c] sm:$0xf] }
 0x29a   :  { %v6634_v28 = vld [vmem:[#allocation17 + $0x368] sm:$0xf0] }
 0x2e6   :  { %v2602_v17 = vpop.permute.xlu0 %2601 }
 0x2e7   :  { %v2604_v23 = vmul.f32 0.5, %v2602_v17  ;;  %v6690_v17 = vld [vmem:[#allocation17 + $0x3e0] sm:$0xf0] }
 0x2e8   :  { %v6693_v31 = vor.u32 %v7654_v16, %v6690_v17  ;;  %v7627_v17 = vld [vmem:[#allocation17 + $0x2e4] sm:$0xf0] }
 0x2e9   :  { %v2605_v30 = vsel %vm8321_vm13, %v2604_v23, 0.0  ;;  %v6696_v23 = vld [vmem:[#allocation17 + $0x3c8] sm:$0xf] }
 0x2ea   :  { %v2606_v33 = vmul.f32 1.442695, %v2605_v30  ;;  %v6213_v30 = vor.u32 %v7534_v13, %v6210_v15  ;;  %v6697_v32 = vor.u32 %v7659_v25, %v6696_v23  ;;  %4054 = vmatpush.bf16.msra.mxu2 %v6693_v31  ;;  %v7622_v13 = vld [vmem:[#allocation17 + $0x2c4] sm:$0xf]  ;;  %v6568_v15 = vld [vmem:[#allocation17 + $0x2c8] sm:$0xf] }
 0x2eb   :  { %v6565_v16 = vor.u32 %v7622_v13, %v6562_v14  ;;  %v6248_v23 = vld [vmem:[#allocation17 + $0x48] sm:$0xf] }
 0x2ec   :  { %7811 = vpow2.f32 %v2606_v33  ;;  %v6658_v33 = vld [vmem:[#allocation17 + $0x3a0] sm:$0xf0]  ;;  %4048 = vmatpush.bf16.msra.mxu1 %v6213_v30  ;;  %v7619_v30 = vld [vmem:[#allocation17 + $0x2a4] sm:$0xf0] }
 0x2ed   :  { %v6661_v50 = vor.u32 %v7646_v24, %v6658_v33  ;;  %v6537_v31 = vor.u32 %v7619_v30, %v6536_v29  ;;  %v6722_v24 = vld [vmem:[#allocation17 + $0x420] sm:$0xf0]  ;;  %v6216_v33 = vld [vmem:[#allocation17 + $0x8] sm:$0xf] }
 0x2ee   :  { %v6217_v36 = vor.u32 %v7539_v35, %v6216_v33  ;;  %v6952_v13 = vld [vmem:[#allocation17 + $0x5c8] sm:$0xf]  ;;  %v6922_v33 = vld [vmem:[#allocation17 + $0x5a8] sm:$0xf0]  ;;  %v6637_v35 = vor.u32 %v7639_v27, %v6634_v28 }
 0x2ef   :  { %4055 = vmatpush.bf16.msra.mxu2 %v6661_v50  ;;  %v6505_v50 = vor.u32 %v7611_v41, %v6504_v39  ;;  %v7723_v14 = vld [vmem:[#allocation17 + $0x5e4] sm:$0xf0]  ;;  %v7631_v39 = vld [vmem:[#allocation17 + $0x30c] sm:$0xf] }
 0x2f0   :  { %v6920_v30 = vld [vmem:[#allocation17 + $0x588] sm:$0xf]  ;;  %v7599_v27 = vld [vmem:[#allocation17 + $0x20c] sm:$0xf] }
 0x2f1   :  { %v6474_v28 = vld [vmem:[#allocation17 + $0x228] sm:$0xf0] }
 0x2f2   :  { %v7812_v59 = vpop.eup %7811 }
 0x2f3   :  { %v2610_v0 = vmul.f32 %v7812_v59, %v2609_v53  ;;  %v6850_v53 = vld [vmem:[#allocation17 + $0x520] sm:$0xf0]  ;;  %v6600_v59 = vld [vmem:[#allocation17 + $0x308] sm:$0xf]  ;;  %4056 = vmatpush.bf16.msra.mxu2 %v6629_v52 }
 0x2f4   :  { %v6853_v58 = vor.u32 %v7694_v48, %v6850_v53 }
 0x2f5   :  { %v2611_v10 = vadd.f32 %v2610_v0, %v2608_v60  ;;  %v7635_v60 = vld [vmem:[#allocation17 + $0x324] sm:$0xf0] }
 0x2f6   :  { %v6312_v0 = vld [vmem:[#allocation17 + $0xc8] sm:$0xf]  ;;  %v6601_v4 = vor.u32 %v7635_v60, %v6600_v59 }
 0x2f7   :  { %v2612_v20 = vpack.c.bf16 %v2611_v10, %v2611_v10  ;;  %v6313_v6 = vor.u32 %v7563_v1, %v6312_v0  ;;  %4057 = vmatpush.bf16.msra.mxu2 %v6597_v3  ;;  %v7555_v10 = vld [vmem:[#allocation17 + $0xa4] sm:$0xf0]  ;;  %v6445_v0 = vor.u32 %v7591_v56, %v6442_v57  ;;  %v7695_v57 = vld [vmem:[#allocation17 + $0x50c] sm:$0xf] }
 0x2f8   :  { %v6281_v46 = vor.u32 %v7555_v10, %v6280_v9  ;;  %v7647_v10 = vld [vmem:[#allocation17 + $0x38c] sm:$0xf] }
 0x2f9   :  { %2789 = vmatmul.bf16.vlgmr.msra.gmra.mxu3 %v2612_v20  ;;  %2802 = vmatmul.bf16.vlgmr.msrb.gmra.mxu0 %v2612_v20 }
 0x2fa   :  { %2815 = vmatmul.bf16.vlgmr.msrb.gmra.mxu1 %v2612_v20  ;;  %4067 = vmatpush.bf16.msra.mxu3 %v6949_v22  ;;  %v6569_v20 = vor.u32 %v7627_v17, %v6568_v15  ;;  %v6754_v22 = vld [vmem:[#allocation17 + $0x460] sm:$0xf0]  ;;  %v7719_v15 = vld [vmem:[#allocation17 + $0x5cc] sm:$0xf] }
 0x2fb   :  { %4080 = vmatpush.bf16.msrb.mxu0 %v6441_v26  ;;  %4093 = vmatpush.bf16.msrb.mxu1 %v6697_v32  ;;  %v6757_v25 = vor.u32 %v7670_v21, %v6754_v22  ;;  %v7547_v26 = vld [vmem:[#allocation17 + $0x64] sm:$0xf0]  ;;  %v7662_v32 = vld [vmem:[#allocation17 + $0x404] sm:$0xf]  ;;  %v6954_v21 = vld [vmem:[#allocation17 + $0x5e8] sm:$0xf0] }
 0x2fc   :  { %4058 = vmatpush.bf16.msra.mxu2 %v6565_v16  ;;  %v6249_v2 = vor.u32 %v7547_v26, %v6248_v23  ;;  %v7575_v23 = vld [vmem:[#allocation17 + $0x14c] sm:$0xf] }
 0x2fe   :  { %4068 = vmatpush.bf16.msra.mxu3 %v6917_v34  ;;  %v6725_v34 = vor.u32 %v7662_v32, %v6722_v24  ;;  %v7711_v24 = vld [vmem:[#allocation17 + $0x58c] sm:$0xf] }
 0x2ff   :  { %4081 = vmatpush.bf16.msrb.mxu0 %v6409_v37  ;;  %4094 = vmatpush.bf16.msrb.mxu1 %v6665_v12  ;;  %v7606_v37 = vld [vmem:[#allocation17 + $0x244] sm:$0xf]  ;;  %v6925_v41 = vor.u32 %v7711_v24, %v6922_v33  ;;  %v7724_v33 = vld [vmem:[#allocation17 + $0x5ec] sm:$0xf0] }
 0x300   :  { %4059 = vmatpush.bf16.msra.mxu2 %v6533_v19  ;;  %v6501_v40 = vor.u32 %v7606_v37, %v6498_v38  ;;  %v7598_v12 = vld [vmem:[#allocation17 + $0x204] sm:$0xf]  ;;  %v6957_v19 = vor.u32 %v7719_v15, %v6954_v21  ;;  %v6346_v37 = vld [vmem:[#allocation17 + $0x128] sm:$0xf0] }
 0x301   :  { %v6469_v18 = vor.u32 %v7598_v12, %v6466_v42  ;;  %v7707_v12 = vld [vmem:[#allocation17 + $0x564] sm:$0xf0]  ;;  %v6506_v15 = vld [vmem:[#allocation17 + $0x268] sm:$0xf0] }
 0x302   :  { %4069 = vmatpush.bf16.msra.mxu3 %v6885_v43  ;;  %v6472_v43 = vld [vmem:[#allocation17 + $0x208] sm:$0xf] }
 0x303   :  { %4082 = vmatpush.bf16.msrb.mxu0 %v6377_v49  ;;  %4095 = vmatpush.bf16.msrb.mxu1 %v6633_v55  ;;  %v6473_v45 = vor.u32 %v7603_v44, %v6472_v43  ;;  %v2645_v49 = vld [vmem:[#allocation16] sm:$0x7]  ;;  %v6890_v43 = vld [vmem:[#allocation17 + $0x568] sm:$0xf0] }
 0x304   :  { %4060 = vmatpush.bf16.msra.mxu2 %v6501_v40  ;;  %v2648_v48 = vperm.slane %v2645_v49, 1  ;;  %v2649_v53 = vperm.slane %v2645_v49, 2  ;;  %v2647_v60 = vperm.slane %v2645_v49, 0  ;;  %v6602_v40 = vld [vmem:[#allocation17 + $0x328] sm:$0xf0] }
 0x305   :  { %v6605_v44 = vor.u32 %v7631_v39, %v6602_v40  ;;  %v6314_v49 = vld [vmem:[#allocation17 + $0xe8] sm:$0xf0]  ;;  %v6477_v39 = vor.u32 %v7599_v27, %v6474_v28  ;;  %v6832_v28 = vld [vmem:[#allocation17 + $0x4d0] sm:$0xf] }
 0x306   :  { %4070 = vmatpush.bf16.msra.mxu3 %v6853_v58  ;;  %v7655_v58 = vld [vmem:[#allocation17 + $0x3cc] sm:$0xf] }
 0x307   :  { %4083 = vmatpush.bf16.msrb.mxu0 %v6345_v61  ;;  %4096 = vmatpush.bf16.msrb.mxu1 %v6601_v4  ;;  %v6698_v61 = vld [vmem:[#allocation17 + $0x3e8] sm:$0xf0] }
 0x308   :  { %4061 = vmatpush.bf16.msra.mxu2 %v6469_v18  ;;  %v7703_v18 = vld [vmem:[#allocation17 + $0x54c] sm:$0xf] }
 0x30a   :  { %4071 = vmatpush.bf16.msra.mxu3 %v6821_v5  ;;  %v6701_v5 = vor.u32 %v7655_v58, %v6698_v61  ;;  %v6858_v58 = vld [vmem:[#allocation17 + $0x528] sm:$0xf0] }
 0x30b   :  { %4084 = vmatpush.bf16.msrb.mxu0 %v6313_v6  ;;  %4097 = vmatpush.bf16.msrb.mxu1 %v6569_v20  ;;  %v7583_v6 = vld [vmem:[#allocation17 + $0x18c] sm:$0xf] }
 0x30c   :  { %v6413_v20 = vor.u32 %v7583_v6, %v6410_v7  ;;  %v6282_v61 = vld [vmem:[#allocation17 + $0xa8] sm:$0xf0] }
 0x30d   :  { %v7687_v7 = vld [vmem:[#allocation17 + $0x4cc] sm:$0xf] }
 0x30e   :  { %4072 = vmatpush.bf16.msra.mxu3 %v6789_v11  ;;  %v6666_v11 = vld [vmem:[#allocation17 + $0x3a8] sm:$0xf0] }
 0x30f   :  { %4085 = vmatpush.bf16.msrb.mxu0 %v6281_v46  ;;  %4098 = vmatpush.bf16.msrb.mxu1 %v6537_v31  ;;  %v6669_v22 = vor.u32 %v7647_v10, %v6666_v11  ;;  %v7715_v31 = vld [vmem:[#allocation17 + $0x5a4] sm:$0xf0]  ;;  %v7543_v11 = vld [vmem:[#allocation17 + $0x4c] sm:$0xf] }
 0x310   :  { %v6921_v38 = vor.u32 %v7715_v31, %v6920_v30  ;;  %v6704_v30 = vld [vmem:[#allocation17 + $0x3d0] sm:$0xf] }
 0x311   :  { %v7660_v31 = vld [vmem:[#allocation17 + $0x3ec] sm:$0xf0] }
 0x312   :  { %4073 = vmatpush.bf16.msra.mxu3 %v6757_v25  ;;  %v6378_v25 = vld [vmem:[#allocation17 + $0x168] sm:$0xf0]  ;;  %v6705_v40 = vor.u32 %v7660_v31, %v6704_v30  ;;  %v6352_v31 = vld [vmem:[#allocation17 + $0x110] sm:$0xf] }
 0x313   :  { %4086 = vmatpush.bf16.msrb.mxu0 %v6249_v2  ;;  %4099 = vmatpush.bf16.msrb.mxu1 %v6505_v50  ;;  %v6953_v2 = vor.u32 %v7723_v14, %v6952_v13  ;;  %v6381_v32 = vor.u32 %v7575_v23, %v6378_v25  ;;  %v6888_v50 = vld [vmem:[#allocation17 + $0x548] sm:$0xf]  ;;  %v7607_v14 = vld [vmem:[#allocation17 + $0x24c] sm:$0xf] }
 0x314   :  { %v6794_v23 = vld [vmem:[#allocation17 + $0x4a8] sm:$0xf0] }
 0x315   :  { %v7535_v25 = vld [vmem:[#allocation17 + $0xc] sm:$0xf] }
 0x316   :  { %4074 = vmatpush.bf16.msra.mxu3 %v6725_v34 }
 0x317   :  { %4087 = vmatpush.bf16.msrb.mxu0 %v6217_v36  ;;  %4100 = vmatpush.bf16.msrb.mxu1 %v6473_v45  ;;  %v7567_v36 = vld [vmem:[#allocation17 + $0x10c] sm:$0xf] }
 0x318   :  { %v6349_v42 = vor.u32 %v7567_v36, %v6346_v37  ;;  %v7559_v45 = vld [vmem:[#allocation17 + $0xcc] sm:$0xf] }
 0x319   :  { %v6317_v56 = vor.u32 %v7559_v45, %v6314_v49  ;;  %v7671_v37 = vld [vmem:[#allocation17 + $0x44c] sm:$0xf]  ;;  %v6728_v45 = vld [vmem:[#allocation17 + $0x408] sm:$0xf] }
 0x31a   :  { %v7667_v49 = vld [vmem:[#allocation17 + $0x424] sm:$0xf0] }
 0x376   :  { %v2803_v51 = vpop.f32.mrf.mxu0 }
 0x377   :  { %v2804_v54 = vadd.f32 %v2803_v51, %v2648_v48  ;;  %v2816_v52 = vpop.f32.mrf.mxu1  ;;  %v6889_v48 = vor.u32 %v7707_v12, %v6888_v50  ;;  %v6570_v51 = vld [vmem:[#allocation17 + $0x2e8] sm:$0xf0] }
 0x378   :  { %v2817_v55 = vadd.f32 %v2816_v52, %v2649_v53  ;;  %v7623_v53 = vld [vmem:[#allocation17 + $0x2cc] sm:$0xf]  ;;  %v6856_v52 = vld [vmem:[#allocation17 + $0x508] sm:$0xf] }
 0x379   :  { %vm2821_vm14 = vcmp.gt.f32.partialorder %v2804_v54, 0.0  ;;  %v2824_v59 = vmul.f32 0.01, %v2804_v54 }
 0x37a   :  { %vm2822_vm15 = vcmp.gt.f32.partialorder %v2817_v55, 0.0  ;;  %v2825_v62 = vmul.f32 0.01, %v2817_v55 }
 0x37b   :  { %v2827_v63 = vsel %vm2821_vm14, %v2804_v54, %v2824_v59  ;;  %v6893_v54 = vor.u32 %v7703_v18, %v6890_v43  ;;  %v6573_v59 = vor.u32 %v7623_v53, %v6570_v51  ;;  %v6928_v18 = vld [vmem:[#allocation17 + $0x590] sm:$0xf]  ;;  %v6730_v53 = vld [vmem:[#allocation17 + $0x428] sm:$0xf0] }
 0x37c   :  { %v8330_v1 = vpack.c.bf16 %v2827_v63, %v2827_v63  ;;  %v2828_v3 = vsel %vm2822_vm15, %v2817_v55, %v2825_v62  ;;  %v2790_v4 = vpop.f32.mrf.mxu3  ;;  %v7699_v55 = vld [vmem:[#allocation17 + $0x524] sm:$0xf0]  ;;  %v7615_v63 = vld [vmem:[#allocation17 + $0x28c] sm:$0xf]  ;;  %v7716_v43 = vld [vmem:[#allocation17 + $0x5ac] sm:$0xf0] }
 0x37d   :  { %v8332_v8 = vpack.c.bf16 %v2828_v3, %v2828_v3  ;;  %v2791_v9 = vadd.f32 %v2790_v4, %v2647_v60  ;;  %v7551_v60 = vld [vmem:[#allocation17 + $0x8c] sm:$0xf]  ;;  %v6857_v62 = vor.u32 %v7699_v55, %v6856_v52  ;;  %v6861_v3 = vor.u32 %v7695_v57, %v6858_v58  ;;  %v6824_v4 = vld [vmem:[#allocation17 + $0x4c8] sm:$0xf]  ;;  %v6448_v51 = vld [vmem:[#allocation17 + $0x1d0] sm:$0xf] }
 0x37e   :  { %v2805_v46 = vpop.f32.mrf.mxu0  ;;  %4023 = vmatmul.bf16.vlgmr.msrb.gmra.mxu3 %v8330_v1  ;;  %v6285_v6 = vor.u32 %v7551_v60, %v6282_v61  ;;  %v7592_v55 = vld [vmem:[#allocation17 + $0x1d4] sm:$0xf]  ;;  %v6929_v57 = vor.u32 %v7716_v43, %v6928_v18  ;;  %v6729_v58 = vor.u32 %v7667_v49, %v6728_v45  ;;  %v7644_v60 = vld [vmem:[#allocation17 + $0x36c] sm:$0xf0] }
 0x37f   :  { %vm2820_vm0 = vcmp.gt.f32.partialorder %v2791_v9, 0.0  ;;  %v2823_v16 = vmul.f32 0.01, %v2791_v9  ;;  %v2818_v17 = vpop.f32.mrf.mxu1  ;;  %4036 = vmatmul.bf16.vlgmr.msra.gmra.mxu0 %v8332_v8  ;;  %4119 = vmatpush.bf16.msrb.mxu3 %v6445_v0  ;;  %v6538_v0 = vld [vmem:[#allocation17 + $0x2a8] sm:$0xf0] }
 0x380   :  { %4132 = vmatpush.bf16.msra.mxu0 %v6701_v5  ;;  %v7691_v5 = vld [vmem:[#allocation17 + $0x4e4] sm:$0xf0]  ;;  %v6541_v10 = vor.u32 %v7615_v63, %v6538_v0  ;;  %v6250_v46 = vld [vmem:[#allocation17 + $0x68] sm:$0xf0]  ;;  %v6896_v63 = vld [vmem:[#allocation17 + $0x550] sm:$0xf] }
 0x381   :  { %v2826_v26 = vsel %vm2820_vm0, %v2791_v9, %v2823_v16  ;;  %v6826_v9 = vld [vmem:[#allocation17 + $0x4e8] sm:$0xf0]  ;;  %v6825_v13 = vor.u32 %v7691_v5, %v6824_v4  ;;  %v6792_v17 = vld [vmem:[#allocation17 + $0x488] sm:$0xf]  ;;  %v6253_v21 = vor.u32 %v7543_v11, %v6250_v46  ;;  %v7708_v0 = vld [vmem:[#allocation17 + $0x56c] sm:$0xf0] }
 0x382   :  { %v8336_v29 = vpack.c.bf16 %v2826_v26, %v2826_v26  ;;  %v6829_v16 = vor.u32 %v7687_v7, %v6826_v9  ;;  %v6509_v26 = vor.u32 %v7607_v14, %v6506_v15  ;;  %v6416_v4 = vld [vmem:[#allocation17 + $0x190] sm:$0xf]  ;;  %v7584_v7 = vld [vmem:[#allocation17 + $0x194] sm:$0xf] }
 0x383   :  { %4120 = vmatpush.bf16.msrb.mxu3 %v6413_v20  ;;  %v7683_v20 = vld [vmem:[#allocation17 + $0x4a4] sm:$0xf0]  ;;  %v7588_v5 = vld [vmem:[#allocation17 + $0x1ac] sm:$0xf0]  ;;  %v6418_v9 = vld [vmem:[#allocation17 + $0x1b0] sm:$0xf0] }
 0x384   :  { %4133 = vmatpush.bf16.msra.mxu0 %v6669_v22  ;;  %v2792_v34 = vpop.f32.mrf.mxu3  ;;  %4010 = vmatmul.bf16.vlgmr.msrb.gmra.mxu2 %v8336_v29  ;;  %v7679_v22 = vld [vmem:[#allocation17 + $0x48c] sm:$0xf]  ;;  %v6608_v11 = vld [vmem:[#allocation17 + $0x310] sm:$0xf]  ;;  %v7560_v18 = vld [vmem:[#allocation17 + $0xd4] sm:$0xf] }
 0x385   :  { %4049 = vmatmul.bf16.vlgmr.msra.gmra.mxu1 %v8336_v29  ;;  %4106 = vmatpush.bf16.msrb.mxu2 %v6953_v2  ;;  %v6218_v2 = vld [vmem:[#allocation17 + $0x28] sm:$0xf0]  ;;  %v6797_v24 = vor.u32 %v7679_v22, %v6794_v23  ;;  %v6760_v34 = vld [vmem:[#allocation17 + $0x448] sm:$0xf]  ;;  %v7636_v46 = vld [vmem:[#allocation17 + $0x32c] sm:$0xf0] }
 0x386   :  { %4145 = vmatpush.bf16.msra.mxu1 %v6957_v19  ;;  %v6793_v19 = vor.u32 %v7683_v20, %v6792_v17  ;;  %v6221_v36 = vor.u32 %v7535_v25, %v6218_v2  ;;  %v6864_v14 = vld [vmem:[#allocation17 + $0x510] sm:$0xf]  ;;  %v7576_v22 = vld [vmem:[#allocation17 + $0x154] sm:$0xf] }
 0x387   :  { %4121 = vmatpush.bf16.msrb.mxu3 %v6381_v32  ;;  %v6960_v32 = vld [vmem:[#allocation17 + $0x5d0] sm:$0xf]  ;;  %v6386_v23 = vld [vmem:[#allocation17 + $0x170] sm:$0xf0] }
 0x388   :  { %4134 = vmatpush.bf16.msra.mxu0 %v6637_v35  ;;  %v7675_v35 = vld [vmem:[#allocation17 + $0x464] sm:$0xf0]  ;;  %v6961_v50 = vor.u32 %v7724_v33, %v6960_v32  ;;  %v7700_v15 = vld [vmem:[#allocation17 + $0x52c] sm:$0xf0]  ;;  %v6389_v30 = vor.u32 %v7576_v22, %v6386_v23  ;;  %v7568_v33 = vld [vmem:[#allocation17 + $0x114] sm:$0xf] }
 0x389   :  { %4107 = vmatpush.bf16.msrb.mxu2 %v6921_v38  ;;  %v6762_v38 = vld [vmem:[#allocation17 + $0x468] sm:$0xf0]  ;;  %v6761_v12 = vor.u32 %v7675_v35, %v6760_v34  ;;  %v6384_v17 = vld [vmem:[#allocation17 + $0x150] sm:$0xf]  ;;  %v6865_v25 = vor.u32 %v7700_v15, %v6864_v14  ;;  %v6354_v34 = vld [vmem:[#allocation17 + $0x130] sm:$0xf0] }
 0x38a   :  { %4146 = vmatpush.bf16.msra.mxu1 %v6925_v41  ;;  %v6672_v41 = vld [vmem:[#allocation17 + $0x390] sm:$0xf]  ;;  %v6322_v43 = vld [vmem:[#allocation17 + $0xf0] sm:$0xf0]  ;;  %v6424_v22 = vld [vmem:[#allocation17 + $0x198] sm:$0xf] }
 0x38b   :  { %4122 = vmatpush.bf16.msrb.mxu3 %v6349_v42  ;;  %v7652_v42 = vld [vmem:[#allocation17 + $0x3ac] sm:$0xf0]  ;;  %v7589_v23 = vld [vmem:[#allocation17 + $0x1b4] sm:$0xf0] }
 0x38c   :  { %4135 = vmatpush.bf16.msra.mxu0 %v6605_v44  ;;  %v6765_v44 = vor.u32 %v7671_v37, %v6762_v38  ;;  %v6673_v52 = vor.u32 %v7652_v42, %v6672_v41  ;;  %v7580_v20 = vld [vmem:[#allocation17 + $0x16c] sm:$0xf0]  ;;  %v6357_v41 = vor.u32 %v7568_v33, %v6354_v34  ;;  %v6425_v33 = vor.u32 %v7589_v23, %v6424_v22  ;;  %v6584_v22 = vld [vmem:[#allocation17 + $0x2d8] sm:$0xf] }
 0x38d   :  { %4108 = vmatpush.bf16.msrb.mxu2 %v6889_v48  ;;  %v7663_v48 = vld [vmem:[#allocation17 + $0x40c] sm:$0xf]  ;;  %v7628_v2 = vld [vmem:[#allocation17 + $0x2ec] sm:$0xf0]  ;;  %v6385_v27 = vor.u32 %v7580_v20, %v6384_v17  ;;  %v7629_v23 = vld [vmem:[#allocation17 + $0x2f4] sm:$0xf0] }
 0x38e   :  { %4147 = vmatpush.bf16.msra.mxu1 %v6893_v54  ;;  %4075 = vmatmul.bf16.vlgmr.msra.gmra.mxu3 %v8332_v8  ;;  %v7596_v54 = vld [vmem:[#allocation17 + $0x1ec] sm:$0xf0]  ;;  %v6733_v61 = vor.u32 %v7663_v48, %v6730_v53 }
 0x38f   :  { %4088 = vmatmul.bf16.vlgmr.msrb.gmra.mxu0 %v8336_v29  ;;  %4123 = vmatpush.bf16.msrb.mxu3 %v6317_v56  ;;  %v6450_v56 = vld [vmem:[#allocation17 + $0x1f0] sm:$0xf0]  ;;  %v7572_v32 = vld [vmem:[#allocation17 + $0x12c] sm:$0xf0] }
 0x390   :  { %4136 = vmatpush.bf16.msra.mxu0 %v6573_v59  ;;  %v6640_v59 = vld [vmem:[#allocation17 + $0x350] sm:$0xf]  ;;  %v6353_v38 = vor.u32 %v7572_v32, %v6352_v31  ;;  %v6712_v32 = vld [vmem:[#allocation17 + $0x3d8] sm:$0xf] }
 0x391   :  { %4109 = vmatpush.bf16.msrb.mxu2 %v6857_v62  ;;  %v6449_v62 = vor.u32 %v7596_v54, %v6448_v51  ;;  %v7620_v37 = vld [vmem:[#allocation17 + $0x2ac] sm:$0xf0]  ;;  %v6325_v54 = vor.u32 %v7560_v18, %v6322_v43  ;;  %v6680_v18 = vld [vmem:[#allocation17 + $0x398] sm:$0xf] }
 0x392   :  { %4148 = vmatpush.bf16.msra.mxu1 %v6861_v3  ;;  %v6453_v3 = vor.u32 %v7592_v55, %v6450_v56  ;;  %v6512_v45 = vld [vmem:[#allocation17 + $0x250] sm:$0xf]  ;;  %v7653_v43 = vld [vmem:[#allocation17 + $0x3b4] sm:$0xf0] }
 0x393   :  { %4124 = vmatpush.bf16.msrb.mxu3 %v6285_v6  ;;  %v6641_v6 = vor.u32 %v7644_v60, %v6640_v59  ;;  %v7612_v49 = vld [vmem:[#allocation17 + $0x26c] sm:$0xf0] }
 0x394   :  { %4137 = vmatpush.bf16.msra.mxu0 %v6541_v10  ;;  %4062 = vmatmul.bf16.vlgmr.msra.gmra.mxu2 %v8330_v1  ;;  %v6897_v10 = vor.u32 %v7708_v0, %v6896_v63  ;;  %v6768_v53 = vld [vmem:[#allocation17 + $0x450] sm:$0xf]  ;;  %v6513_v56 = vor.u32 %v7612_v49, %v6512_v45  ;;  %v7696_v45 = vld [vmem:[#allocation17 + $0x514] sm:$0xf] }
 0x395   :  { %4101 = vmatmul.bf16.vlgmr.msrb.gmra.mxu1 %v8330_v1  ;;  %4110 = vmatpush.bf16.msrb.mxu2 %v6825_v13  ;;  %v6417_v13 = vor.u32 %v7588_v5, %v6416_v4  ;;  %v7676_v51 = vld [vmem:[#allocation17 + $0x46c] sm:$0xf0]  ;;  %v6962_v4 = vld [vmem:[#allocation17 + $0x5f0] sm:$0xf0]  ;;  %v6456_v5 = vld [vmem:[#allocation17 + $0x1d8] sm:$0xf] }
 0x396   :  { %4149 = vmatpush.bf16.msra.mxu1 %v6829_v16  ;;  %v6421_v16 = vor.u32 %v7584_v7, %v6418_v9  ;;  %v7556_v55 = vld [vmem:[#allocation17 + $0xac] sm:$0xf0]  ;;  %v6769_v60 = vor.u32 %v7676_v51, %v6768_v53  ;;  %v7597_v7 = vld [vmem:[#allocation17 + $0x1f4] sm:$0xf0]  ;;  %v6866_v49 = vld [vmem:[#allocation17 + $0x530] sm:$0xf0] }
 0x397   :  { %4125 = vmatpush.bf16.msrb.mxu3 %v6253_v21  ;;  %v6609_v21 = vor.u32 %v7636_v46, %v6608_v11  ;;  %v6480_v59 = vld [vmem:[#allocation17 + $0x210] sm:$0xf]  ;;  %v7544_v46 = vld [vmem:[#allocation17 + $0x54] sm:$0xf]  ;;  %v6457_v17 = vor.u32 %v7597_v7, %v6456_v5  ;;  %v6360_v53 = vld [vmem:[#allocation17 + $0x118] sm:$0xf] }
 0x398   :  { %4138 = vmatpush.bf16.msra.mxu0 %v6509_v26  ;;  %v6576_v26 = vld [vmem:[#allocation17 + $0x2d0] sm:$0xf]  ;;  %v7573_v51 = vld [vmem:[#allocation17 + $0x134] sm:$0xf0]  ;;  %v6610_v5 = vld [vmem:[#allocation17 + $0x330] sm:$0xf0] }
 0x399   :  { %4111 = vmatpush.bf16.msrb.mxu2 %v6793_v19  ;;  %v7692_v19 = vld [vmem:[#allocation17 + $0x4ec] sm:$0xf0]  ;;  %v6616_v7 = vld [vmem:[#allocation17 + $0x318] sm:$0xf] }
 0x39a   :  { %4150 = vmatpush.bf16.msra.mxu1 %v6797_v24  ;;  %v6577_v24 = vor.u32 %v7628_v2, %v6576_v26  ;;  %v6833_v35 = vor.u32 %v7692_v19, %v6832_v28  ;;  %v7668_v63 = vld [vmem:[#allocation17 + $0x42c] sm:$0xf0]  ;;  %v6226_v28 = vld [vmem:[#allocation17 + $0x30] sm:$0xf0] }
 0x39b   :  { %4126 = vmatpush.bf16.msrb.mxu3 %v6221_v36  ;;  %v6544_v36 = vld [vmem:[#allocation17 + $0x290] sm:$0xf]  ;;  %v7656_v19 = vld [vmem:[#allocation17 + $0x3d4] sm:$0xf] }
 0x39c   :  { %4139 = vmatpush.bf16.msra.mxu0 %v6477_v39  ;;  %v6800_v39 = vld [vmem:[#allocation17 + $0x490] sm:$0xf]  ;;  %v6545_v42 = vor.u32 %v7620_v37, %v6544_v36  ;;  %v6898_v36 = vld [vmem:[#allocation17 + $0x570] sm:$0xf0] }
 0x39d   :  { %4112 = vmatpush.bf16.msrb.mxu2 %v6761_v12  ;;  %v7564_v12 = vld [vmem:[#allocation17 + $0xec] sm:$0xf0] }
 0x39e   :  { %4151 = vmatpush.bf16.msra.mxu1 %v6765_v44  ;;  %4127 = vmatmul.bf16.vlgmr.msrb.gmra.mxu3 %v8336_v29  ;;  %v6256_v9 = vld [vmem:[#allocation17 + $0x50] sm:$0xf] }
 0x39f   :  { %4171 = vmatpush.bf16.msra.mxu3 %v6705_v40  ;;  %4140 = vmatmul.bf16.vlgmr.msra.gmra.mxu0 %v8330_v1  ;;  %v7684_v40 = vld [vmem:[#allocation17 + $0x4ac] sm:$0xf0] }
 0x3a0   :  { %4184 = vmatpush.bf16.msrb.mxu0 %v6961_v50  ;;  %v6320_v50 = vld [vmem:[#allocation17 + $0xd0] sm:$0xf]  ;;  %v6801_v44 = vor.u32 %v7684_v40, %v6800_v39  ;;  %v6392_v39 = vld [vmem:[#allocation17 + $0x158] sm:$0xf] }
 0x3a1   :  { %4113 = vmatpush.bf16.msrb.mxu2 %v6729_v58  ;;  %v6321_v48 = vor.u32 %v7564_v12, %v6320_v50  ;;  %v6290_v58 = vld [vmem:[#allocation17 + $0xb0] sm:$0xf0]  ;;  %v6224_v26 = vld [vmem:[#allocation17 + $0x10] sm:$0xf]  ;;  %v7581_v40 = vld [vmem:[#allocation17 + $0x174] sm:$0xf0] }
 0x3a2   :  { %4152 = vmatpush.bf16.msra.mxu1 %v6733_v61  ;;  %v7604_v61 = vld [vmem:[#allocation17 + $0x22c] sm:$0xf0]  ;;  %v7648_v50 = vld [vmem:[#allocation17 + $0x394] sm:$0xf] }
 0x3a3   :  { %4172 = vmatpush.bf16.msra.mxu3 %v6673_v52  ;;  %v6288_v52 = vld [vmem:[#allocation17 + $0x90] sm:$0xf]  ;;  %v6481_v11 = vor.u32 %v7604_v61, %v6480_v59  ;;  %v6674_v12 = vld [vmem:[#allocation17 + $0x3b0] sm:$0xf0]  ;;  %v6361_v59 = vor.u32 %v7573_v51, %v6360_v53 }
 0x3a4   :  { %4185 = vmatpush.bf16.msrb.mxu0 %v6929_v57  ;;  %4114 = vmatmul.bf16.vlgmr.msrb.gmra.mxu2 %v8332_v8  ;;  %v7552_v57 = vld [vmem:[#allocation17 + $0x94] sm:$0xf]  ;;  %v6289_v0 = vor.u32 %v7556_v55, %v6288_v52  ;;  %v7540_v2 = vld [vmem:[#allocation17 + $0x2c] sm:$0xf0] }
 0x3a5   :  { %4158 = vmatpush.bf16.msra.mxu2 %v6449_v62  ;;  %4153 = vmatmul.bf16.vlgmr.msra.gmra.mxu1 %v8332_v8  ;;  %v6736_v62 = vld [vmem:[#allocation17 + $0x410] sm:$0xf]  ;;  %v6225_v34 = vor.u32 %v7540_v2, %v6224_v26  ;;  %v7640_v52 = vld [vmem:[#allocation17 + $0x354] sm:$0xf] }
 0x3a6   :  { %4197 = vmatpush.bf16.msrb.mxu1 %v6453_v3  ;;  %v7720_v3 = vld [vmem:[#allocation17 + $0x5d4] sm:$0xf]  ;;  %v6737_v14 = vor.u32 %v7668_v63, %v6736_v62  ;;  %v6328_v63 = vld [vmem:[#allocation17 + $0xd8] sm:$0xf] }
 0x3a7   :  { %4173 = vmatpush.bf16.msra.mxu3 %v6641_v6  ;;  %v6293_v6 = vor.u32 %v7552_v57, %v6290_v58  ;;  %v6965_v15 = vor.u32 %v7720_v3, %v6962_v4  ;;  %v6642_v55 = vld [vmem:[#allocation17 + $0x370] sm:$0xf0]  ;;  %v6648_v57 = vld [vmem:[#allocation17 + $0x358] sm:$0xf] }
 0x3a8   :  { %4186 = vmatpush.bf16.msrb.mxu0 %v6897_v10  ;;  %v7548_v10 = vld [vmem:[#allocation17 + $0x6c] sm:$0xf0]  ;;  %v7645_v58 = vld [vmem:[#allocation17 + $0x374] sm:$0xf0]  ;;  %v6834_v61 = vld [vmem:[#allocation17 + $0x4f0] sm:$0xf0]  ;;  %v6645_v62 = vor.u32 %v7640_v52, %v6642_v55 }
 0x3a9   :  { %4159 = vmatpush.bf16.msra.mxu2 %v6417_v13  ;;  %v6258_v13 = vld [vmem:[#allocation17 + $0x70] sm:$0xf0]  ;;  %v6257_v20 = vor.u32 %v7548_v10, %v6256_v9  ;;  %v6649_v3 = vor.u32 %v7645_v58, %v6648_v57  ;;  %v7637_v9 = vld [vmem:[#allocation17 + $0x334] sm:$0xf0]  ;;  %v7649_v57 = vld [vmem:[#allocation17 + $0x39c] sm:$0xf] }
 0x3aa   :  { %4198 = vmatpush.bf16.msrb.mxu1 %v6421_v16  ;;  %v7712_v16 = vld [vmem:[#allocation17 + $0x594] sm:$0xf]  ;;  %v6682_v58 = vld [vmem:[#allocation17 + $0x3b8] sm:$0xf0] }
 0x3ab   :  { %4174 = vmatpush.bf16.msra.mxu3 %v6609_v21  ;;  %v6930_v21 = vld [vmem:[#allocation17 + $0x5b0] sm:$0xf0] }
 0x3ac   :  { %4187 = vmatpush.bf16.msrb.mxu0 %v6865_v25  ;;  %v6261_v25 = vor.u32 %v7544_v46, %v6258_v13  ;;  %v6933_v31 = vor.u32 %v7712_v16, %v6930_v21  ;;  %v7632_v4 = vld [vmem:[#allocation17 + $0x314] sm:$0xf]  ;;  %v6617_v16 = vor.u32 %v7637_v9, %v6616_v7  ;;  %v6685_v7 = vor.u32 %v7649_v57, %v6682_v58  ;;  %v7689_v57 = vld [vmem:[#allocation17 + $0x4dc] sm:$0xf] }
 0x3ad   :  { %4160 = vmatpush.bf16.msra.mxu2 %v6385_v27  ;;  %v7536_v27 = vld [vmem:[#allocation17 + $0x14] sm:$0xf]  ;;  %v6613_v13 = vor.u32 %v7632_v4, %v6610_v5  ;;  %v7721_v5 = vld [vmem:[#allocation17 + $0x5dc] sm:$0xf] }
 0x3ae   :  { %4199 = vmatpush.bf16.msrb.mxu1 %v6389_v30  ;;  %v6706_v30 = vld [vmem:[#allocation17 + $0x3f0] sm:$0xf0]  ;;  %v6229_v37 = vor.u32 %v7536_v27, %v6226_v28  ;;  %v6264_v28 = vld [vmem:[#allocation17 + $0x58] sm:$0xf]  ;;  %v6842_v58 = vld [vmem:[#allocation17 + $0x4f8] sm:$0xf0] }
 0x3af   :  { %4175 = vmatpush.bf16.msra.mxu3 %v6577_v24  ;;  %v7661_v24 = vld [vmem:[#allocation17 + $0x3f4] sm:$0xf0]  ;;  %v6802_v46 = vld [vmem:[#allocation17 + $0x4b0] sm:$0xf0] }
 0x3b0   :  { %4188 = vmatpush.bf16.msrb.mxu0 %v6833_v35  ;;  %v7704_v35 = vld [vmem:[#allocation17 + $0x554] sm:$0xf] }
 0x3b1   :  { %4161 = vmatpush.bf16.msra.mxu2 %v6353_v38  ;;  %v6709_v38 = vor.u32 %v7656_v19, %v6706_v30  ;;  %v7672_v26 = vld [vmem:[#allocation17 + $0x454] sm:$0xf]  ;;  %v7549_v19 = vld [vmem:[#allocation17 + $0x74] sm:$0xf0]  ;;  %v6585_v30 = vor.u32 %v7629_v23, %v6584_v22  ;;  %v7713_v22 = vld [vmem:[#allocation17 + $0x59c] sm:$0xf] }
 0x3b2   :  { %4200 = vmatpush.bf16.msrb.mxu1 %v6357_v41  ;;  %v6713_v41 = vor.u32 %v7661_v24, %v6712_v32  ;;  %v6770_v2 = vld [vmem:[#allocation17 + $0x470] sm:$0xf0]  ;;  %v6938_v23 = vld [vmem:[#allocation17 + $0x5b8] sm:$0xf0] }
 0x3b3   :  { %4176 = vmatpush.bf16.msra.mxu3 %v6545_v42  ;;  %v6901_v42 = vor.u32 %v7704_v35, %v6898_v36  ;;  %v6546_v32 = vld [vmem:[#allocation17 + $0x2b0] sm:$0xf0]  ;;  %v6773_v24 = vor.u32 %v7672_v26, %v6770_v2  ;;  %v6265_v36 = vor.u32 %v7549_v19, %v6264_v28  ;;  %v7569_v26 = vld [vmem:[#allocation17 + $0x11c] sm:$0xf] }
 0x3b4   :  { %4189 = vmatpush.bf16.msrb.mxu0 %v6801_v44  ;;  %v6393_v44 = vor.u32 %v7581_v40, %v6392_v39  ;;  %v7664_v35 = vld [vmem:[#allocation17 + $0x414] sm:$0xf]  ;;  %v7541_v39 = vld [vmem:[#allocation17 + $0x34] sm:$0xf0]  ;;  %v6362_v2 = vld [vmem:[#allocation17 + $0x138] sm:$0xf0] }
 0x3b5   :  { %4162 = vmatpush.bf16.msra.mxu2 %v6321_v48  ;;  %v6677_v48 = vor.u32 %v7648_v50, %v6674_v12  ;;  %v6458_v50 = vld [vmem:[#allocation17 + $0x1f8] sm:$0xf0] }
 0x3b6   :  { %4201 = vmatpush.bf16.msrb.mxu1 %v6325_v54  ;;  %v6681_v54 = vor.u32 %v7653_v43, %v6680_v18  ;;  %v7657_v12 = vld [vmem:[#allocation17 + $0x3dc] sm:$0xf]  ;;  %v7608_v43 = vld [vmem:[#allocation17 + $0x254] sm:$0xf] }
 0x3b7   :  { %4177 = vmatpush.bf16.msra.mxu3 %v6513_v56  ;;  %v6869_v56 = vor.u32 %v7696_v45, %v6866_v49  ;;  %v6714_v18 = vld [vmem:[#allocation17 + $0x3f8] sm:$0xf0]  ;;  %v6520_v49 = vld [vmem:[#allocation17 + $0x258] sm:$0xf] }
 0x3b8   :  { %4190 = vmatpush.bf16.msrb.mxu0 %v6769_v60  ;;  %v7688_v60 = vld [vmem:[#allocation17 + $0x4d4] sm:$0xf]  ;;  %v6717_v52 = vor.u32 %v7657_v12, %v6714_v18  ;;  %v7633_v28 = vld [vmem:[#allocation17 + $0x31c] sm:$0xf]  ;;  %v7701_v12 = vld [vmem:[#allocation17 + $0x534] sm:$0xf0] }
 0x3b9   :  { %4163 = vmatpush.bf16.msra.mxu2 %v6289_v0  ;;  %v7565_v0 = vld [vmem:[#allocation17 + $0xf4] sm:$0xf0]  ;;  %v6618_v19 = vld [vmem:[#allocation17 + $0x338] sm:$0xf0] }
 0x3ba   :  { %4202 = vmatpush.bf16.msrb.mxu1 %v6293_v6  ;;  %v6837_v6 = vor.u32 %v7688_v60, %v6834_v61  ;;  %v6329_v10 = vor.u32 %v7565_v0, %v6328_v63  ;;  %v7600_v60 = vld [vmem:[#allocation17 + $0x214] sm:$0xf]  ;;  %v7605_v63 = vld [vmem:[#allocation17 + $0x234] sm:$0xf0]  ;;  %v7697_v18 = vld [vmem:[#allocation17 + $0x51c] sm:$0xf] }
 0x3bb   :  { %4178 = vmatpush.bf16.msra.mxu3 %v6481_v11  ;;  %v7680_v11 = vld [vmem:[#allocation17 + $0x494] sm:$0xf]  ;;  %v6968_v0 = vld [vmem:[#allocation17 + $0x5d8] sm:$0xf] }
 0x3bc   :  { %4191 = vmatpush.bf16.msrb.mxu0 %v6737_v14  ;;  %v6296_v14 = vld [vmem:[#allocation17 + $0x98] sm:$0xf]  ;;  %v6805_v21 = vor.u32 %v7680_v11, %v6802_v46  ;;  %v6482_v61 = vld [vmem:[#allocation17 + $0x230] sm:$0xf0]  ;;  %v6394_v11 = vld [vmem:[#allocation17 + $0x178] sm:$0xf0] }
 0x3bd   :  { %4164 = vmatpush.bf16.msra.mxu2 %v6257_v20  ;;  %v6578_v20 = vld [vmem:[#allocation17 + $0x2f0] sm:$0xf0]  ;;  %v6485_v9 = vor.u32 %v7600_v60, %v6482_v61  ;;  %v7545_v60 = vld [vmem:[#allocation17 + $0x5c] sm:$0xf] }
 0x3be   :  { %4203 = vmatpush.bf16.msrb.mxu1 %v6261_v25  ;;  %4179 = vmatmul.bf16.vlgmr.msra.gmra.mxu3 %v8330_v1  ;;  %v6266_v61 = vld [vmem:[#allocation17 + $0x78] sm:$0xf0] }
 0x3bf   :  { %4223 = vmatpush.bf16.msrb.mxu3 %v6965_v15  ;;  %4192 = vmatmul.bf16.vlgmr.msrb.gmra.mxu0 %v8332_v8  ;;  %v7557_v15 = vld [vmem:[#allocation17 + $0xb4] sm:$0xf0] }
 0x3c0   :  { %4236 = vmatpush.bf16.msra.mxu0 %v6457_v17  ;;  %v7624_v17 = vld [vmem:[#allocation17 + $0x2d4] sm:$0xf]  ;;  %v6297_v25 = vor.u32 %v7557_v15, %v6296_v14  ;;  %v7641_v14 = vld [vmem:[#allocation17 + $0x35c] sm:$0xf] }
 0x3c1   :  { %4165 = vmatpush.bf16.msra.mxu2 %v6225_v34  ;;  %v6581_v27 = vor.u32 %v7624_v17, %v6578_v20  ;;  %v7621_v34 = vld [vmem:[#allocation17 + $0x2b4] sm:$0xf0]  ;;  %v6650_v15 = vld [vmem:[#allocation17 + $0x378] sm:$0xf0] }
 0x3c2   :  { %4204 = vmatpush.bf16.msrb.mxu1 %v6229_v37  ;;  %v6738_v37 = vld [vmem:[#allocation17 + $0x430] sm:$0xf0]  ;;  %v6936_v17 = vld [vmem:[#allocation17 + $0x598] sm:$0xf] }
 0x3c3   :  { %4224 = vmatpush.bf16.msrb.mxu3 %v6933_v31  ;;  %v7616_v31 = vld [vmem:[#allocation17 + $0x294] sm:$0xf]  ;;  %v6741_v45 = vor.u32 %v7664_v35, %v6738_v37  ;;  %v7717_v20 = vld [vmem:[#allocation17 + $0x5b4] sm:$0xf0]  ;;  %v6621_v35 = vor.u32 %v7633_v28, %v6618_v19  ;;  %v6330_v37 = vld [vmem:[#allocation17 + $0xf8] sm:$0xf0] }
 0x3c4   :  { %4237 = vmatpush.bf16.msra.mxu0 %v6425_v33  ;;  %4166 = vmatmul.bf16.vlgmr.msra.gmra.mxu2 %v8336_v29  ;;  %v6552_v33 = vld [vmem:[#allocation17 + $0x298] sm:$0xf]  ;;  %v6549_v40 = vor.u32 %v7616_v31, %v6546_v32 }
 0x3c5   :  { %4210 = vmatpush.bf16.msrb.mxu2 %v6709_v38  ;;  %4205 = vmatmul.bf16.vlgmr.msrb.gmra.mxu1 %v8336_v29  ;;  %v6232_v38 = vld [vmem:[#allocation17 + $0x18] sm:$0xf] }
 0x3c6   :  { %4249 = vmatpush.bf16.msra.mxu1 %v6713_v41  ;;  %v7593_v41 = vld [vmem:[#allocation17 + $0x1dc] sm:$0xf]  ;;  %v6233_v53 = vor.u32 %v7541_v39, %v6232_v38  ;;  %v6904_v31 = vld [vmem:[#allocation17 + $0x558] sm:$0xf] }
 0x3c7   :  { %4225 = vmatpush.bf16.msrb.mxu3 %v6901_v42  ;;  %v6553_v42 = vor.u32 %v7621_v34, %v6552_v33  ;;  %v6461_v51 = vor.u32 %v7593_v41, %v6458_v50  ;;  %v7709_v32 = vld [vmem:[#allocation17 + $0x574] sm:$0xf0]  ;;  %v7705_v33 = vld [vmem:[#allocation17 + $0x55c] sm:$0xf] }
 0x3c8   :  { %4238 = vmatpush.bf16.msra.mxu0 %v6393_v44  ;;  %v6514_v44 = vld [vmem:[#allocation17 + $0x270] sm:$0xf0]  ;;  %v6906_v34 = vld [vmem:[#allocation17 + $0x578] sm:$0xf0]  ;;  %v6905_v38 = vor.u32 %v7709_v32, %v6904_v31  ;;  %v6872_v50 = vld [vmem:[#allocation17 + $0x518] sm:$0xf] }
 0x3c9   :  { %4211 = vmatpush.bf16.msrb.mxu2 %v6677_v48  ;;  %v7613_v48 = vld [vmem:[#allocation17 + $0x274] sm:$0xf0]  ;;  %v6517_v55 = vor.u32 %v7608_v43, %v6514_v44  ;;  %v7625_v39 = vld [vmem:[#allocation17 + $0x2dc] sm:$0xf]  ;;  %v6909_v41 = vor.u32 %v7705_v33, %v6906_v34  ;;  %v7748_v34 = vld [vmem:[#allocation19 + $0xb0] sm:$0xff] }
 0x3ca   :  { %4250 = vmatpush.bf16.msra.mxu1 %v6681_v54  ;;  %v7585_v54 = vld [vmem:[#allocation17 + $0x19c] sm:$0xf]  ;;  %v6744_v19 = vld [vmem:[#allocation17 + $0x418] sm:$0xf] }
 0x3cb   :  { %4226 = vmatpush.bf16.msrb.mxu3 %v6869_v56  ;;  %v6426_v56 = vld [vmem:[#allocation17 + $0x1b8] sm:$0xf0] }
 0x3cc   :  { %4239 = vmatpush.bf16.msra.mxu0 %v6361_v59  ;;  %v6521_v59 = vor.u32 %v7613_v48, %v6520_v49  ;;  %v6429_v4 = vor.u32 %v7585_v54, %v6426_v56  ;;  %v6874_v43 = vld [vmem:[#allocation17 + $0x538] sm:$0xf0]  ;;  %v6873_v48 = vor.u32 %v7701_v12, %v6872_v50  ;;  %v7738_v50 = vld [vmem:[#allocation19 + $0x60] sm:$0xff]  ;;  %v7731_v12 = vld [vmem:[#allocation19 + $0x28] sm:$0xff] }
 0x3cd   :  { %4212 = vmatpush.bf16.msrb.mxu2 %v6645_v62  ;;  %v6488_v62 = vld [vmem:[#allocation17 + $0x218] sm:$0xf]  ;;  %v6298_v49 = vld [vmem:[#allocation17 + $0xb8] sm:$0xf0]  ;;  %v6877_v54 = vor.u32 %v7697_v18, %v6874_v43 }
 0x3ce   :  { %4251 = vmatpush.bf16.msra.mxu1 %v6649_v3  ;;  %v7725_v3 = vld [vmem:[#allocation17 + $0x5f4] sm:$0xf0]  ;;  %v6489_v46 = vor.u32 %v7605_v63, %v6488_v62  ;;  %v7609_v63 = vld [vmem:[#allocation17 + $0x25c] sm:$0xf] }
 0x3cf   :  { %4227 = vmatpush.bf16.msrb.mxu3 %v6837_v6  ;;  %v6970_v6 = vld [vmem:[#allocation17 + $0x5f8] sm:$0xf0] }
 0x3d0   :  { %4240 = vmatpush.bf16.msra.mxu0 %v6329_v10  ;;  %v7577_v10 = vld [vmem:[#allocation17 + $0x15c] sm:$0xf] }
 0x3d1   :  { %4213 = vmatpush.bf16.msrb.mxu2 %v6613_v13  ;;  %v6969_v13 = vor.u32 %v7725_v3, %v6968_v0  ;;  %v6522_v0 = vld [vmem:[#allocation17 + $0x278] sm:$0xf0]  ;;  %v6845_v3 = vor.u32 %v7689_v57, %v6842_v58  ;;  %v7735_v58 = vld [vmem:[#allocation19 + $0x48] sm:$0xff] }
 0x3d2   :  { %4252 = vmatpush.bf16.msra.mxu1 %v6617_v16  ;;  %v6973_v16 = vor.u32 %v7721_v5, %v6970_v6  ;;  %v7685_v5 = vld [vmem:[#allocation17 + $0x4b4] sm:$0xf0]  ;;  %v6269_v6 = vor.u32 %v7545_v60, %v6266_v61  ;;  %v7665_v31 = vld [vmem:[#allocation17 + $0x41c] sm:$0xf]  ;;  %v7743_v60 = vld [vmem:[#allocation19 + $0x88] sm:$0xff] }
 0x3d3   :  { %4228 = vmatpush.bf16.msrb.mxu3 %v6805_v21  ;;  %v6397_v21 = vor.u32 %v7577_v10, %v6394_v11  ;;  %v6525_v10 = vor.u32 %v7609_v63, %v6522_v0  ;;  %v7537_v11 = vld [vmem:[#allocation17 + $0x1c] sm:$0xf] }
 0x3d4   :  { %4241 = vmatpush.bf16.msra.mxu0 %v6297_v25  ;;  %v6653_v25 = vor.u32 %v7641_v14, %v6650_v15  ;;  %v7601_v14 = vld [vmem:[#allocation17 + $0x21c] sm:$0xf] }
 0x3d5   :  { %4214 = vmatpush.bf16.msrb.mxu2 %v6581_v27  ;;  %v6937_v27 = vor.u32 %v7717_v20, %v6936_v17  ;;  %v6490_v15 = vld [vmem:[#allocation17 + $0x238] sm:$0xf0]  ;;  %v6776_v17 = vld [vmem:[#allocation17 + $0x458] sm:$0xf] }
 0x3d6   :  { %4253 = vmatpush.bf16.msra.mxu1 %v6585_v30  ;;  %v6941_v30 = vor.u32 %v7713_v22, %v6938_v23  ;;  %v7677_v20 = vld [vmem:[#allocation17 + $0x474] sm:$0xf0]  ;;  %v7673_v22 = vld [vmem:[#allocation17 + $0x45c] sm:$0xf] }
 0x3d7   :  { %4229 = vmatpush.bf16.msrb.mxu3 %v6773_v24  ;;  %v6365_v24 = vor.u32 %v7569_v26, %v6362_v2  ;;  %v6778_v23 = vld [vmem:[#allocation17 + $0x478] sm:$0xf0]  ;;  %v6777_v2 = vor.u32 %v7677_v20, %v6776_v17  ;;  %v7750_v17 = vld [vmem:[#allocation19 + $0xc0] sm:$0xff] }
 0x3d8   :  { %4242 = vmatpush.bf16.msra.mxu0 %v6265_v36  ;;  %v7561_v36 = vld [vmem:[#allocation17 + $0xdc] sm:$0xf]  ;;  %v6781_v28 = vor.u32 %v7673_v22, %v6778_v23 }
 0x3d9   :  { %4215 = vmatpush.bf16.msrb.mxu2 %v6549_v40  ;;  %v6586_v40 = vld [vmem:[#allocation17 + $0x2f8] sm:$0xf0] }
 0x3da   :  { %4254 = vmatpush.bf16.msra.mxu1 %v6553_v42  ;;  %v6333_v42 = vor.u32 %v7561_v36, %v6330_v37  ;;  %v6589_v44 = vor.u32 %v7625_v39, %v6586_v40  ;;  %v7741_v26 = vld [vmem:[#allocation19 + $0x78] sm:$0xff]  ;;  %v7747_v39 = vld [vmem:[#allocation19 + $0xa8] sm:$0xff]  ;;  %v7732_v40 = vld [vmem:[#allocation19 + $0x30] sm:$0xff] }
 0x3db   :  { %4230 = vmatpush.bf16.msrb.mxu3 %v6741_v45  ;;  %v7553_v45 = vld [vmem:[#allocation17 + $0x9c] sm:$0xf] }
 0x3dc   :  { %4243 = vmatpush.bf16.msra.mxu0 %v6233_v53  ;;  %v7617_v53 = vld [vmem:[#allocation17 + $0x29c] sm:$0xf]  ;;  %v6301_v56 = vor.u32 %v7553_v45, %v6298_v49  ;;  %v7730_v45 = vld [vmem:[#allocation19 + $0x20] sm:$0xff] }
 0x3dd   :  { %4216 = vmatpush.bf16.msrb.mxu2 %v6517_v55  ;;  %v7693_v55 = vld [vmem:[#allocation17 + $0x4f4] sm:$0xf0]  ;;  %v6746_v32 = vld [vmem:[#allocation17 + $0x438] sm:$0xf0] }
 0x3de   :  { %4255 = vmatpush.bf16.msra.mxu1 %v6521_v59  ;;  %4231 = vmatmul.bf16.vlgmr.msrb.gmra.mxu3 %v8332_v8  ;;  %v7733_v36 = vld [vmem:[#allocation19 + $0x38] sm:$0xff] }
 0x3df   :  { %4275 = vmatpush.bf16.msra.mxu3 %v6461_v51  ;;  %4244 = vmatmul.bf16.vlgmr.msra.gmra.mxu0 %v8336_v29  ;;  %v6554_v51 = vld [vmem:[#allocation17 + $0x2b8] sm:$0xf0] }
 0x3e0   :  { %4288 = vmatpush.bf16.msrb.mxu0 %v6717_v52  ;;  %v6840_v52 = vld [vmem:[#allocation17 + $0x4d8] sm:$0xf]  ;;  %v6557_v59 = vor.u32 %v7617_v53, %v6554_v51  ;;  %v7736_v53 = vld [vmem:[#allocation19 + $0x50] sm:$0xff] }
 0x3e1   :  { %4217 = vmatpush.bf16.msrb.mxu2 %v6485_v9  ;;  %v6841_v62 = vor.u32 %v7693_v55, %v6840_v52  ;;  %v6810_v9 = vld [vmem:[#allocation17 + $0x4b8] sm:$0xf0]  ;;  %v7744_v52 = vld [vmem:[#allocation19 + $0x90] sm:$0xff] }
 0x3e2   :  { %4256 = vmatpush.bf16.msra.mxu1 %v6489_v46  ;;  %v6234_v46 = vld [vmem:[#allocation17 + $0x38] sm:$0xf0] }
 0x3e3   :  { %4276 = vmatpush.bf16.msra.mxu3 %v6429_v4  ;;  %v6808_v4 = vld [vmem:[#allocation17 + $0x498] sm:$0xf] }
 0x3e4   :  { %4289 = vmatpush.bf16.msrb.mxu0 %v6685_v7  ;;  %4218 = vmatmul.bf16.vlgmr.msrb.gmra.mxu2 %v8330_v1  ;;  %v7681_v7 = vld [vmem:[#allocation17 + $0x49c] sm:$0xf] }
 0x3e5   :  { %4262 = vmatpush.bf16.msra.mxu2 %v6969_v13  ;;  %4257 = vmatmul.bf16.vlgmr.msra.gmra.mxu1 %v8330_v1  ;;  %v6809_v13 = vor.u32 %v7685_v5, %v6808_v4  ;;  %v7757_v37 = vld [vmem:[#allocation19 + $0xf8] sm:$0xff]  ;;  %v7734_v4 = vld [vmem:[#allocation19 + $0x40] sm:$0xff] }
 0x3e6   :  { %4301 = vmatpush.bf16.msrb.mxu1 %v6973_v16  ;;  %v6813_v16 = vor.u32 %v7681_v7, %v6810_v9  ;;  %v7737_v18 = vld [vmem:[#allocation19 + $0x58] sm:$0xff]  ;;  %v7742_v7 = vld [vmem:[#allocation19 + $0x80] sm:$0xff]  ;;  %v7727_v9 = vld [vmem:[#allocation19 + $0x8] sm:$0xff] }
 0x3e7   :  { %4277 = vmatpush.bf16.msra.mxu3 %v6397_v21  ;;  %v6237_v21 = vor.u32 %v7537_v11, %v6234_v46  ;;  %v7745_v43 = vld [vmem:[#allocation19 + $0x98] sm:$0xff] }
 0x3e8   :  { %4290 = vmatpush.bf16.msrb.mxu0 %v6653_v25  ;;  %v6493_v25 = vor.u32 %v7601_v14, %v6490_v15  ;;  %v7729_v55 = vld [vmem:[#allocation19 + $0x18] sm:$0xff]  ;;  %v7726_v14 = vld [vmem:[#allocation19] sm:$0xff] }
 0x3e9   :  { %4263 = vmatpush.bf16.msra.mxu2 %v6937_v27  ;;  %v7749_v27 = vld [vmem:[#allocation19 + $0xb8] sm:$0xff] }
 0x3ea   :  { %4302 = vmatpush.bf16.msrb.mxu1 %v6941_v30  ;;  %v7669_v30 = vld [vmem:[#allocation17 + $0x434] sm:$0xf0] }
 0x3eb   :  { %4278 = vmatpush.bf16.msra.mxu3 %v6365_v24  ;;  %v7740_v24 = vld [vmem:[#allocation19 + $0x70] sm:$0xff]  ;;  %v6745_v33 = vor.u32 %v7669_v30, %v6744_v19  ;;  %v7765_v20 = vld [vmem:[#allocation19 + $0x138] sm:$0xff] }
 0x3ec   :  { %4291 = vmatpush.bf16.msrb.mxu0 %v6621_v35  ;;  %v6749_v35 = vor.u32 %v7665_v31, %v6746_v32  ;;  %v7763_v31 = vld [vmem:[#allocation19 + $0x128] sm:$0xff] }
 0x3ed   :  { %4264 = vmatpush.bf16.msra.mxu2 %v6905_v38  ;;  %v7739_v38 = vld [vmem:[#allocation19 + $0x68] sm:$0xff] }
 0x3ee   :  { %4303 = vmatpush.bf16.msrb.mxu1 %v6909_v41  ;;  %v7756_v41 = vld [vmem:[#allocation19 + $0xf0] sm:$0xff] }
 0x3ef   :  { %4279 = vmatpush.bf16.msra.mxu3 %v6333_v42  ;;  %v7755_v42 = vld [vmem:[#allocation19 + $0xe8] sm:$0xff] }
 0x3f0   :  { %4292 = vmatpush.bf16.msrb.mxu0 %v6589_v44 }
 0x3f1   :  { %4265 = vmatpush.bf16.msra.mxu2 %v6873_v48  ;;  %v7754_v48 = vld [vmem:[#allocation19 + $0xe0] sm:$0xff] }
 0x3f2   :  { %4304 = vmatpush.bf16.msrb.mxu1 %v6877_v54 }
 0x3f3   :  { %4280 = vmatpush.bf16.msra.mxu3 %v6301_v56  ;;  %v7753_v56 = vld [vmem:[#allocation19 + $0xd8] sm:$0xff] }
 0x3f4   :  { %4293 = vmatpush.bf16.msrb.mxu0 %v6557_v59 }
 0x3f5   :  { %4266 = vmatpush.bf16.msra.mxu2 %v6841_v62  ;;  %v7728_v62 = vld [vmem:[#allocation19 + $0x10] sm:$0xff] }
 0x3f6   :  { %4305 = vmatpush.bf16.msrb.mxu1 %v6845_v3  ;;  %v7752_v3 = vld [vmem:[#allocation19 + $0xd0] sm:$0xff] }
 0x3f7   :  { %4281 = vmatpush.bf16.msra.mxu3 %v6269_v6 }
 0x3f8   :  { %4294 = vmatpush.bf16.msrb.mxu0 %v6525_v10  ;;  %v7751_v10 = vld [vmem:[#allocation19 + $0xc8] sm:$0xff] }
 0x3f9   :  { %4267 = vmatpush.bf16.msra.mxu2 %v6809_v13 }
 0x3fa   :  { %4306 = vmatpush.bf16.msrb.mxu1 %v6813_v16 }
 0x3fb   :  { %4282 = vmatpush.bf16.msra.mxu3 %v6237_v21 }
 0x3fc   :  { %4295 = vmatpush.bf16.msrb.mxu0 %v6493_v25 }
 0x3fd   :  { %4268 = vmatpush.bf16.msra.mxu2 %v6777_v2 }
 0x3fe   :  { %4307 = vmatpush.bf16.msrb.mxu1 %v6781_v28  ;;  %4283 = vmatmul.bf16.vlgmr.msra.gmra.mxu3 %v8336_v29  ;;  %v4037_v29 = vpop.f32.mrf.mxu0 }
 0x3ff   :  { %4875 = vmatpush.bf16.msrb.mxu3 %v7741_v26  ;;  %4296 = vmatmul.bf16.vlgmr.msrb.gmra.mxu0 %v8330_v1  ;;  %v7746_v1 = vld [vmem:[#allocation19 + $0xa0] sm:$0xff]  ;;  %v7764_v26 = vld [vmem:[#allocation19 + $0x130] sm:$0xff] }
 0x400   :  { %4888 = vmatpush.bf16.msra.mxu0 %v7749_v27 }
 0x401   :  { %4269 = vmatpush.bf16.msra.mxu2 %v6745_v33  ;;  %v4024_v44 = vpop.f32.mrf.mxu3 }
 0x402   :  { %4308 = vmatpush.bf16.msrb.mxu1 %v6749_v35  ;;  %v4050_v49 = vpop.f32.mrf.mxu1  ;;  %v7762_v35 = vld [vmem:[#allocation19 + $0x120] sm:$0xff] }
 0x403   :  { %4876 = vmatpush.bf16.msrb.mxu3 %v7740_v24 }
 0x404   :  { %4889 = vmatpush.bf16.msra.mxu0 %v7748_v34  ;;  %4270 = vmatmul.bf16.vlgmr.msra.gmra.mxu2 %v8332_v8 }
 0x405   :  { %4862 = vmatpush.bf16.msrb.mxu2 %v7733_v36  ;;  %4309 = vmatmul.bf16.vlgmr.msrb.gmra.mxu1 %v8332_v8  ;;  %v8363_v8 = vld [vmem:[%s8391_s11] sm:$0xff] }
 0x406   :  { %4901 = vmatpush.bf16.msra.mxu1 %v7757_v37  ;;  %v4039_v51 = vpop.f32.mrf.mxu0  ;;  %v3026_v54 = vperm.slane %v8363_v8, 0  ;;  %v3027_v15 = vperm.slane %v8363_v8, 1  ;;  %v3029_v34 = vperm.slane %v8363_v8, 3 }
 0x407   :  { %4877 = vmatpush.bf16.msrb.mxu3 %v7739_v38  ;;  %v4011_v57 = vpop.f32.mrf.mxu2  ;;  %v3028_v38 = vperm.slane %v8363_v8, 2 }
 0x408   :  { %4890 = vmatpush.bf16.msra.mxu0 %v7747_v39  ;;  %v4012_v59 = vadd.f32 %v4011_v57, %v3026_v54  ;;  %v4051_v23 = vadd.f32 %v4050_v49, %v3027_v15  ;;  %v7781_v15 = vld [vmem:[#allocation19 + $0x1b8] sm:$0xff] }
 0x409   :  { %4863 = vmatpush.bf16.msrb.mxu2 %v7732_v40  ;;  %v4026_v61 = vpop.f32.mrf.mxu3 }
 0x40a   :  { %4902 = vmatpush.bf16.msra.mxu1 %v7756_v41  ;;  %v4025_v63 = vadd.f32 %v4024_v44, %v4012_v59  ;;  %v4052_v0 = vpop.f32.mrf.mxu1  ;;  %v7758_v59 = vld [vmem:[#allocation19 + $0x100] sm:$0xff]  ;;  %v7772_v61 = vld [vmem:[#allocation19 + $0x170] sm:$0xff] }
 0x40b   :  { %4878 = vmatpush.bf16.msrb.mxu3 %v7738_v50  ;;  %v7761_v50 = vld [vmem:[#allocation19 + $0x118] sm:$0xff] }
 0x40c   :  { %4891 = vmatpush.bf16.msra.mxu0 %v7746_v1  ;;  %v4038_v5 = vadd.f32 %v4037_v29, %v4025_v63  ;;  %v7770_v63 = vld [vmem:[#allocation19 + $0x160] sm:$0xff] }
 0x40d   :  { %4864 = vmatpush.bf16.msrb.mxu2 %v7731_v12 }
 0x40e   :  { %4903 = vmatpush.bf16.msra.mxu1 %v7755_v42  ;;  %v4089_v6 = vpop.f32.mrf.mxu0  ;;  %v4322_v11 = vmul.f32 0.01, %v4038_v5  ;;  %vm4314_vm1 = vcmp.gt.f32.partialorder %v4038_v5, 0.0 }
 0x40f   :  { %4879 = vmatpush.bf16.msrb.mxu3 %v7737_v18  ;;  %v4013_v46 = vpop.f32.mrf.mxu2  ;;  %v4090_v29 = vadd.f32 %v4089_v6, %v3028_v38 }
 0x410   :  { %4892 = vmatpush.bf16.msra.mxu0 %v7745_v43  ;;  %v4330_v21 = vsel %vm4314_vm1, %v4038_v5, %v4322_v11  ;;  %v7760_v43 = vld [vmem:[#allocation19 + $0x110] sm:$0xff]  ;;  %v7789_v46 = vld [vmem:[#allocation19 + $0x1f8] sm:$0xff] }
 0x411   :  { %4865 = vmatpush.bf16.msrb.mxu2 %v7730_v45  ;;  %v4076_v13 = vpop.f32.mrf.mxu3  ;;  %v4338_v25 = vpack.c.bf16 %v4330_v21, %v4330_v21  ;;  %v7768_v5 = vld [vmem:[#allocation19 + $0x150] sm:$0xff] }
 0x412   :  { %4904 = vmatpush.bf16.msra.mxu1 %v7754_v48  ;;  %v4102_v16 = vpop.f32.mrf.mxu1  ;;  %v7788_v21 = vld [vmem:[#allocation19 + $0x1f0] sm:$0xff] }
 0x413   :  { %4880 = vmatpush.bf16.msrb.mxu3 %v7736_v53  ;;  %v4103_v42 = vadd.f32 %v4102_v16, %v4090_v29  ;;  %v7782_v29 = vld [vmem:[#allocation19 + $0x1c0] sm:$0xff] }
 0x414   :  { %4893 = vmatpush.bf16.msra.mxu0 %v7744_v52  ;;  %v7759_v52 = vld [vmem:[#allocation19 + $0x108] sm:$0xff] }
 0x415   :  { %4866 = vmatpush.bf16.msrb.mxu2 %v7729_v55 }
 0x416   :  { %4905 = vmatpush.bf16.msra.mxu1 %v7753_v56  ;;  %v4091_v22 = vpop.f32.mrf.mxu0  ;;  %v7773_v56 = vld [vmem:[#allocation19 + $0x178] sm:$0xff] }
 0x417   :  { %4881 = vmatpush.bf16.msrb.mxu3 %v7735_v58  ;;  %v4063_v2 = vpop.f32.mrf.mxu2 }
 0x418   :  { %4894 = vmatpush.bf16.msra.mxu0 %v7743_v60  ;;  %v4064_v27 = vadd.f32 %v4063_v2, %v4051_v23  ;;  %v7780_v23 = vld [vmem:[#allocation19 + $0x1b0] sm:$0xff] }
 0x419   :  { %4867 = vmatpush.bf16.msrb.mxu2 %v7728_v62  ;;  %v4078_v28 = vpop.f32.mrf.mxu3  ;;  %v7771_v62 = vld [vmem:[#allocation19 + $0x168] sm:$0xff] }
 0x41a   :  { %4906 = vmatpush.bf16.msra.mxu1 %v7752_v3  ;;  %v4077_v19 = vadd.f32 %v4076_v13, %v4064_v27  ;;  %v4104_v30 = vpop.f32.mrf.mxu1  ;;  %v7769_v3 = vld [vmem:[#allocation19 + $0x158] sm:$0xff]  ;;  %v7779_v27 = vld [vmem:[#allocation19 + $0x1a8] sm:$0xff] }
 0x41b   :  { %4882 = vmatpush.bf16.msrb.mxu3 %v7734_v4  ;;  %v7786_v30 = vld [vmem:[#allocation19 + $0x1e0] sm:$0xff] }
 0x41c   :  { %4895 = vmatpush.bf16.msra.mxu0 %v7742_v7  ;;  %vm4315_vm2 = vcmp.gt.f32.partialorder %v4077_v19, 0.0  ;;  %v4323_v32 = vmul.f32 0.01, %v4077_v19 }
 0x41d   :  { %4868 = vmatpush.bf16.msrb.mxu2 %v7727_v9  ;;  %v3030_v9 = vperm.slane %v8363_v8, 4 }
 0x41e   :  { %4907 = vmatpush.bf16.msra.mxu1 %v7751_v10  ;;  %v4141_v24 = vpop.f32.mrf.mxu0  ;;  %v4331_v33 = vsel %vm4315_vm2, %v4077_v19, %v4323_v32  ;;  %v7767_v10 = vld [vmem:[#allocation19 + $0x148] sm:$0xff]  ;;  %v7785_v32 = vld [vmem:[#allocation19 + $0x1d8] sm:$0xff] }
 0x41f   :  { %v4339_v36 = vpack.c.bf16 %v4331_v33, %v4331_v33  ;;  %v4065_v37 = vpop.f32.mrf.mxu2  ;;  %4927 = vmatpush.bf16.msra.mxu3 %v7773_v56 }
 0x420   :  { %4940 = vmatpush.bf16.msrb.mxu0 %v7781_v15  ;;  %v3031_v37 = vperm.slane %v8363_v8, 5 }
 0x421   :  { %4869 = vmatpush.bf16.msrb.mxu2 %v7726_v14  ;;  %v4128_v39 = vpop.f32.mrf.mxu3  ;;  %4883 = vmatmul.bf16.vlgmr.msrb.gmra.mxu3 %v4339_v36 }
 0x422   :  { %4908 = vmatpush.bf16.msra.mxu1 %v7750_v17  ;;  %v4129_v40 = vadd.f32 %v4128_v39, %v3029_v34  ;;  %v4154_v41 = vpop.f32.mrf.mxu1  ;;  %v7784_v34 = vld [vmem:[#allocation19 + $0x1d0] sm:$0xff]  ;;  %v7783_v39 = vld [vmem:[#allocation19 + $0x1c8] sm:$0xff] }
 0x423   :  { %4928 = vmatpush.bf16.msra.mxu3 %v7772_v61 }
 0x424   :  { %4870 = vmatmul.bf16.vlgmr.msrb.gmra.mxu2 %v4338_v25  ;;  %v4142_v1 = vadd.f32 %v4141_v24, %v4129_v40  ;;  %4941 = vmatpush.bf16.msrb.mxu0 %v7780_v23  ;;  %v7777_v24 = vld [vmem:[#allocation19 + $0x198] sm:$0xff] }
 0x425   :  { %4914 = vmatpush.bf16.msra.mxu2 %v7765_v20  ;;  %v7766_v20 = vld [vmem:[#allocation19 + $0x140] sm:$0xff] }
 0x426   :  { %v4143_v12 = vpop.f32.mrf.mxu0  ;;  %v4155_v18 = vadd.f32 %v4154_v41, %v4142_v1  ;;  %4953 = vmatpush.bf16.msrb.mxu1 %v7789_v46  ;;  %v7775_v41 = vld [vmem:[#allocation19 + $0x188] sm:$0xff] }
 0x427   :  { %v4115_v44 = vpop.f32.mrf.mxu2  ;;  %4929 = vmatpush.bf16.msra.mxu3 %v7771_v62 }
 0x428   :  { %vm4317_vm3 = vcmp.gt.f32.partialorder %v4155_v18, 0.0  ;;  %v4325_v45 = vmul.f32 0.01, %v4155_v18  ;;  %v4116_v49 = vadd.f32 %v4115_v44, %v4103_v42  ;;  %4942 = vmatpush.bf16.msrb.mxu0 %v7779_v27  ;;  %v7774_v42 = vld [vmem:[#allocation19 + $0x180] sm:$0xff] }
 0x429   :  { %4915 = vmatpush.bf16.msra.mxu2 %v7764_v26  ;;  %v4130_v48 = vpop.f32.mrf.mxu3  ;;  %v7787_v26 = vld [vmem:[#allocation19 + $0x1e8] sm:$0xff] }
 0x42a   :  { %v4333_v53 = vsel %vm4317_vm3, %v4155_v18, %v4325_v45  ;;  %vm4316_vm4 = vcmp.gt.f32.partialorder %v4116_v49, 0.0  ;;  %v4324_v51 = vmul.f32 0.01, %v4116_v49  ;;  %v4156_v54 = vpop.f32.mrf.mxu1  ;;  %4954 = vmatpush.bf16.msrb.mxu1 %v7788_v21 }
 0x42b   :  { %v4341_v55 = vpack.c.bf16 %v4333_v53, %v4333_v53  ;;  %4930 = vmatpush.bf16.msra.mxu3 %v7770_v63  ;;  %v3033_v54 = vperm.slane %v8363_v8, 7 }
 0x42c   :  { %v4332_v57 = vsel %vm4316_vm4, %v4116_v49, %v4324_v51 }
 0x42d   :  { %4916 = vmatpush.bf16.msra.mxu2 %v7763_v31  ;;  %v4340_v58 = vpack.c.bf16 %v4332_v57, %v4332_v57  ;;  %4909 = vmatmul.bf16.vlgmr.msra.gmra.mxu1 %v4341_v55  ;;  %v7778_v31 = vld [vmem:[#allocation19 + $0x1a0] sm:$0xff] }
 0x42e   :  { %4955 = vmatpush.bf16.msrb.mxu1 %v7787_v26  ;;  %4943 = vmatpush.bf16.msrb.mxu0 %v7778_v31 }
 0x42f   :  { %v4117_v60 = vpop.f32.mrf.mxu2  ;;  %4896 = vmatmul.bf16.vlgmr.msra.gmra.mxu0 %v4340_v58  ;;  %4931 = vmatpush.bf16.msra.mxu3 %v7769_v3 }
 0x431   :  { %4917 = vmatpush.bf16.msra.mxu2 %v7762_v35  ;;  %v7776_v35 = vld [vmem:[#allocation19 + $0x190] sm:$0xff] }
 0x432   :  { %4956 = vmatpush.bf16.msrb.mxu1 %v7786_v30  ;;  %4944 = vmatpush.bf16.msrb.mxu0 %v7777_v24 }
 0x433   :  { %4932 = vmatpush.bf16.msra.mxu3 %v7768_v5 }
 0x435   :  { %4918 = vmatpush.bf16.msra.mxu2 %v7761_v50 }
 0x436   :  { %4957 = vmatpush.bf16.msrb.mxu1 %v7785_v32  ;;  %4945 = vmatpush.bf16.msrb.mxu0 %v7776_v35 }
 0x437   :  { %4933 = vmatpush.bf16.msra.mxu3 %v7767_v10 }
 0x439   :  { %4919 = vmatpush.bf16.msra.mxu2 %v7760_v43 }
 0x43a   :  { %4958 = vmatpush.bf16.msrb.mxu1 %v7784_v34  ;;  %4946 = vmatpush.bf16.msrb.mxu0 %v7775_v41 }
 0x43b   :  { %4934 = vmatpush.bf16.msra.mxu3 %v7766_v20 }
 0x43c   :  { %v4193_v0 = vpop.f32.mrf.mxu0 }
 0x43d   :  { %4920 = vmatpush.bf16.msra.mxu2 %v7759_v52  ;;  %v3032_v52 = vperm.slane %v8363_v8, 6 }
 0x43e   :  { %4959 = vmatpush.bf16.msrb.mxu1 %v7783_v39  ;;  %4947 = vmatpush.bf16.msrb.mxu0 %v7774_v42 }
 0x441   :  { %4921 = vmatpush.bf16.msra.mxu2 %v7758_v59  ;;  %v4180_v4 = vpop.f32.mrf.mxu3 }
 0x442   :  { %v4206_v6 = vpop.f32.mrf.mxu1  ;;  %4960 = vmatpush.bf16.msrb.mxu1 %v7782_v29 }
 0x443   :  { %v4207_v50 = vadd.f32 %v4206_v6, %v3031_v37 }
 0x444   :  { %v4195_v7 = vpop.f32.mrf.mxu0 }
 0x447   :  { %v4167_v11 = vpop.f32.mrf.mxu2 }
 0x448   :  { %v4168_v13 = vadd.f32 %v4167_v11, %v3030_v9 }
 0x449   :  { %v4182_v14 = vpop.f32.mrf.mxu3 }
 0x44a   :  { %v4181_v16 = vadd.f32 %v4180_v4, %v4168_v13  ;;  %v4208_v17 = vpop.f32.mrf.mxu1  ;;  %v7810_v13 = vld [vmem:[%s8393_s13] ss:$0 sm:$0xff]  ;;  %s8133_s13 = smov [#allocation20]  }
 0x44b   :  { %s4973_s3 = sshll.u32 %s8133_s13, 4  ;;  %s4974_s3 = int_to_ptr.vmem [resolvable:$true] %s4973_s3 }
 0x44c   :  { %v4194_v22 = vadd.f32 %v4193_v0, %v4181_v16 }
 0x44e   :  { %vm4318_vm5 = vcmp.gt.f32.partialorder %v4194_v22, 0.0  ;;  %v4326_v25 = vmul.f32 0.01, %v4194_v22 }
 0x44f   :  { %v4169_v2 = vpop.f32.mrf.mxu2 }
 0x450   :  { %v4334_v28 = vsel %vm4318_vm5, %v4194_v22, %v4326_v25 }
 0x451   :  { %v4342_v19 = vpack.c.bf16 %v4334_v28, %v4334_v28 }
 0x453   :  { %4922 = vmatmul.bf16.vlgmr.msra.gmra.mxu2 %v4342_v19 }
 0x45c   :  { %v4245_v33 = vpop.f32.mrf.mxu0 }
 0x45d   :  { %v4246_v58 = vadd.f32 %v4245_v33, %v3032_v52 }
 0x461   :  { %v4232_v36 = vpop.f32.mrf.mxu3 }
 0x462   :  { %v4258_v38 = vpop.f32.mrf.mxu1 }
 0x463   :  { %v4259_v61 = vadd.f32 %v4258_v38, %v4246_v58 }
 0x464   :  { %v4247_v40 = vpop.f32.mrf.mxu0 }
 0x467   :  { %v4219_v1 = vpop.f32.mrf.mxu2 }
 0x468   :  { %v4220_v12 = vadd.f32 %v4219_v1, %v4207_v50 }
 0x469   :  { %v4234_v18 = vpop.f32.mrf.mxu3 }
 0x46a   :  { %v4233_v43 = vadd.f32 %v4232_v36, %v4220_v12  ;;  %v4260_v44 = vpop.f32.mrf.mxu1 }
 0x46c   :  { %vm4319_vm6 = vcmp.gt.f32.partialorder %v4233_v43, 0.0  ;;  %v4327_v45 = vmul.f32 0.01, %v4233_v43 }
 0x46e   :  { %v4335_v49 = vsel %vm4319_vm6, %v4233_v43, %v4327_v45 }
 0x46f   :  { %v4343_v48 = vpack.c.bf16 %v4335_v49, %v4335_v49  ;;  %v4221_v53 = vpop.f32.mrf.mxu2 }
 0x471   :  { %4935 = vmatmul.bf16.vlgmr.msra.gmra.mxu3 %v4343_v48 }
 0x47c   :  { %v4297_v51 = vpop.f32.mrf.mxu0 }
 0x481   :  { %v4284_v55 = vpop.f32.mrf.mxu3 }
 0x482   :  { %v4285_v56 = vadd.f32 %v4284_v55, %v3033_v54  ;;  %v4310_v57 = vpop.f32.mrf.mxu1 }
 0x484   :  { %v4298_v59 = vadd.f32 %v4297_v51, %v4285_v56  ;;  %v4299_v60 = vpop.f32.mrf.mxu0 }
 0x486   :  { %v4311_v62 = vadd.f32 %v4310_v57, %v4298_v59 }
 0x487   :  { %v4271_v63 = vpop.f32.mrf.mxu2 }
 0x488   :  { %vm4321_vm7 = vcmp.gt.f32.partialorder %v4311_v62, 0.0  ;;  %v4329_v0 = vmul.f32 0.01, %v4311_v62  ;;  %v4272_v3 = vadd.f32 %v4271_v63, %v4259_v61 }
 0x489   :  { %v4286_v4 = vpop.f32.mrf.mxu3 }
 0x48a   :  { %v4337_v5 = vsel %vm4321_vm7, %v4311_v62, %v4329_v0  ;;  %vm4320_vm8 = vcmp.gt.f32.partialorder %v4272_v3, 0.0  ;;  %v4328_v6 = vmul.f32 0.01, %v4272_v3  ;;  %v4312_v7 = vpop.f32.mrf.mxu1 }
 0x48b   :  { %v4345_v9 = vpack.c.bf16 %v4337_v5, %v4337_v5 }
 0x48c   :  { %v4336_v10 = vsel %vm4320_vm8, %v4272_v3, %v4328_v6 }
 0x48d   :  { %v4344_v8 = vpack.c.bf16 %v4336_v10, %v4336_v10  ;;  %4961 = vmatmul.bf16.vlgmr.msrb.gmra.mxu1 %v4345_v9 }
 0x48f   :  { %v4273_v11 = vpop.f32.mrf.mxu2  ;;  %4948 = vmatmul.bf16.vlgmr.msrb.gmra.mxu0 %v4344_v8 }
 0x4a4   :  { %v4884_v16 = vpop.f32.mrf.mxu3 }
 0x4a7   :  { %v4871_v46 = vpop.f32.mrf.mxu2 }
 0x4a8   :  { %v4872_v14 = vadd.f32 %v7810_v13, %v4871_v46 }
 0x4aa   :  { %v4885_v17 = vadd.f32 %v4884_v16, %v4872_v14  ;;  %v4910_v20 = vpop.f32.mrf.mxu1 }
 0x4ac   :  { %v4886_v21 = vpop.f32.mrf.mxu3  ;;  %v4897_v22 = vpop.f32.mrf.mxu0 }
 0x4ad   :  { %v4898_v23 = vadd.f32 %v4897_v22, %v4885_v17 }
 0x4af   :  { %v4873_v15 = vpop.f32.mrf.mxu2  ;;  %v4911_v25 = vadd.f32 %v4910_v20, %v4898_v23 }
 0x4b2   :  { %v4912_v26 = vpop.f32.mrf.mxu1 }
 0x4b4   :  { %v4899_v2 = vpop.f32.mrf.mxu0 }
 0x4d6   :  { %v4923_v27 = vpop.f32.mrf.mxu2 }
 0x4d7   :  { %v4924_v31 = vadd.f32 %v4923_v27, %v4911_v25 }
 0x4de   :  { %v4925_v28 = vpop.f32.mrf.mxu2 }
 0x4f4   :  { %v4936_v19 = vpop.f32.mrf.mxu3 }
 0x4f5   :  { %v4937_v24 = vadd.f32 %v4936_v19, %v4924_v31 }
 0x4fc   :  { %v4938_v30 = vpop.f32.mrf.mxu3 }
 0x50a   :  { %v4962_v32 = vpop.f32.mrf.mxu1 }
 0x50c   :  { %v4949_v33 = vpop.f32.mrf.mxu0 }
 0x50d   :  { %v4950_v34 = vadd.f32 %v4949_v33, %v4937_v24 }
 0x50f   :  { %v4963_v35 = vadd.f32 %v4962_v32, %v4950_v34 }
 0x511   :  { %v4966_v36 = vadd.f32 %v4963_v35, %v8316_v47 }
 0x512   :  { %v4964_v37 = vpop.f32.mrf.mxu1 }
 0x513   :  { %4967 = vst [vmem:[#allocation20] sm:$0xff] %v4966_v36 }
 0x514   :  { %v4951_v38 = vpop.f32.mrf.mxu0  ;;  %4978 = dma.vmem_to_hbm [thread:$0]  %s4974_s3, 128, %s4976_s0, [#allocation4]  }
 0x515   :  { %8113 = dma.done.wait [#allocation4], 128  }
 0x516   :  { %8114 = vsyncadd [#allocation4], 4294967168 }
 0x517   :  { %4983 = vsyncpa [#allocation3], 1 }
 0x518   :  { %4984 = vsyncpa [#allocation6], 1 }
 0x519   :  { %4985 = vsyncpa [#allocation9], 1 }
 0x51a   :  { %4986 = vsyncpa [#allocation12], 1 }
 0x51b   :  { %4987 = vsyncpa [#allocation15], 1 }
 0x51c   :  { %4988 = vsyncpa [#allocation18], 1 }
 0x51d   :  { %4989 = vsyncpa [#allocation4], 1 }

</bundles_post_ra>
